<compile_context>
chip_gen: v7x
topology: tpu7x:2x2x1
jax: 0.10.0
libtpu: 0.0.40
codegen_flags: <defaults>
</compile_context>

<pallas_src>
import functools

import jax
import jax.numpy as jnp
from jax.experimental import pallas as pl
from jax.experimental.pallas import tpu as pltpu


def _round_up(x, m):
    return (x + m - 1) // m * m


def _pick_row_tile(H, W, row_tile=None):
    """Pick a row-tile TH that divides H; keep the im2col M dimension modest."""
    if row_tile is not None:
        assert H % row_tile == 0, "row_tile must divide H"
        return row_tile
    if H % 8 != 0 or H * W <= 1024:
        return H
    cands = [th for th in range(8, H + 1, 8) if H % th == 0]
    ok = [th for th in cands if th * W <= 1024]
    return max(ok) if ok else min(cands)


# ---------------------------------------------------------------------------
# Fused kernel: conv1 + BN1 + SiLU + conv2 + BN2 + residual + SiLU
# grid = (N, H // TH);  axis 0 "parallel", axis 1 "arbitrary" (scratch reuse).
# ---------------------------------------------------------------------------
def _basic_block_kernel(x_ref, w1_ref, s1_ref, b1_ref, w2_ref, s2_ref, b2_ref,
                        o_ref, xfull_ref, ypad_ref, *, H, W, Cp, TH):
    # x_ref:    (1, H, W, Cp)  full (channel-padded) image, resident across t
    # w*_ref:   (9*Cp, Cp) bf16  im2col-ordered weights (dy, dx, ci; ci fastest)
    # s*/b*:    (1, Cp) f32      folded BN scale / bias (zero in padded lanes)
    # o_ref:    (1, TH, W, Cp)   output row tile
    # xfull_ref:(H+4, W+2, Cp) bf16  zero-framed input slab (built at t == 0)
    # ypad_ref: (TH+2, W+2, Cp) bf16 zero-framed conv1-output slab (per tile)
    t = pl.program_id(1)
    r0 = pl.multiple_of(t * TH, TH)

    # ---- build the zero-framed input slab once per image (t == 0) ----------
    # The frame (2 rows top/bottom, 1 col left/right) is never written with
    # non-zero data afterwards, so it only needs zeroing here; the interior is
    # fully overwritten for every image.
    @pl.when(t == 0)
    def _():
        zrow = jnp.zeros((2, W + 2, Cp), jnp.bfloat16)
        zcol = jnp.zeros((H + 4, 1, Cp), jnp.bfloat16)
        xfull_ref[0:2, :, :] = zrow
        xfull_ref[H + 2:H + 4, :, :] = zrow
        xfull_ref[:, 0:1, :] = zcol
        xfull_ref[:, W + 1:W + 2, :] = zcol
        xfull_ref[2:H + 2, 1:W + 1, :] = x_ref[0].astype(jnp.bfloat16)
        # ypad halo columns never receive non-zero data either.
        zc2 = jnp.zeros((TH + 2, 1, Cp), jnp.bfloat16)
        ypad_ref[:, 0:1, :] = zc2
        ypad_ref[:, W + 1:W + 2, :] = zc2

    def conv3x3(src_ref, base, rows, w_ref):
        # 9 shifted windows concatenated along lanes -> ONE matmul, K = 9*Cp.
        taps = []
        for dy in range(3):
            for dx in range(3):
                taps.append(src_ref[pl.ds(base + dy, rows), dx:dx + W, :])
        patch = jnp.concatenate(taps, axis=-1)            # (rows, W, 9*Cp) bf16
        patch = patch.reshape(rows * W, 9 * Cp)
        return jnp.dot(patch, w_ref[...],
                       preferred_element_type=jnp.float32)  # (rows*W, Cp) f32

    # ---- conv1 -> BN1 -> SiLU over TH+2 rows (1-row halo for conv2) --------
    # Local y1 row m corresponds to global row r0 - 1 + m.
    y1 = conv3x3(xfull_ref, r0, TH + 2, w1_ref)
    y1 = y1 * s1_ref[0] + b1_ref[0]
    y1 = y1 * jax.nn.sigmoid(y1)
    ypad_ref[:, 1:W + 1, :] = y1.reshape(TH + 2, W, Cp).astype(jnp.bfloat16)

    # y1 rows outside the image must be exactly zero for conv2's SAME padding.
    @pl.when(t == 0)
    def _():
        ypad_ref[0:1, :, :] = jnp.zeros((1, W + 2, Cp), jnp.bfloat16)

    @pl.when(t == pl.num_programs(1) - 1)
    def _():
        ypad_ref[TH + 1:TH + 2, :, :] = jnp.zeros((1, W + 2, Cp), jnp.bfloat16)

    # ---- conv2 -> BN2 -> +residual -> SiLU (all lane-dense, full Cp) -------
    y2 = conv3x3(ypad_ref, 0, TH, w2_ref)                 # (TH*W, Cp) f32
    y2 = y2 * s2_ref[0] + b2_ref[0]
    res = x_ref[0, pl.ds(r0, TH), :, :].astype(jnp.float32).reshape(TH * W, Cp)
    y2 = y2 + res                                         # padded lanes stay 0
    y2 = y2 * jax.nn.sigmoid(y2)
    o_ref[0] = y2.reshape(TH, W, Cp).astype(o_ref.dtype)


# ---------------------------------------------------------------------------
# Parameter packing (pure JAX, outside the kernel).
# ---------------------------------------------------------------------------
def _pack_weight(w_oihw, cp):
    """(Cout, Cin, 3, 3) -> lane-padded, im2col-ordered (9*cp, cp) bf16."""
    co, ci, _, _ = w_oihw.shape
    w_hwio = jnp.transpose(w_oihw, (2, 3, 1, 0))          # (3, 3, ci, co)
    w_hwio = jnp.pad(w_hwio, ((0, 0), (0, 0), (0, cp - ci), (0, cp - co)))
    return w_hwio.reshape(9 * cp, cp).astype(jnp.bfloat16)


def _pack_affine(v, cp):
    return jnp.pad(v.astype(jnp.float32), (0, cp - v.shape[0])).reshape(1, cp)


# ---------------------------------------------------------------------------
# Wrappers.
# ---------------------------------------------------------------------------
def basic_block_forward_nhwc(x_nhwc, params, *, row_tile=None):
    """Fused BasicBlock in NHWC (channels-last). Preferred entry point.
    A stacked AFPN should keep activations channel-padded to a multiple of 128
    and stay in this layout between blocks."""
    N, H, W, C = x_nhwc.shape
    assert params["w1_oihw"].shape[0] == C, "residual needs filter_in == filter_out"
    Cp = _round_up(C, 128)                                 # lane-dense channels
    TH = _pick_row_tile(H, W, row_tile)
    T = H // TH

    # Channel-pad the HBM input once so every block store/load is lane-dense.
    x_p = x_nhwc if C == Cp else jnp.pad(
        x_nhwc, ((0, 0), (0, 0), (0, 0), (0, Cp - C)))

    w1 = _pack_weight(params["w1_oihw"], Cp)
    w2 = _pack_weight(params["w2_oihw"], Cp)
    s1 = _pack_affine(params["s1"], Cp)
    b1 = _pack_affine(params["b1"], Cp)
    s2 = _pack_affine(params["s2"], Cp)
    b2 = _pack_affine(params["b2"], Cp)

    itemsize = jnp.dtype(x_nhwc.dtype).itemsize
    est = (2 * H * W * Cp * itemsize                       # x block (dbl-buffered)
           + 2 * TH * W * Cp * itemsize                    # out block
           + 2 * 2 * 9 * Cp * Cp * 2                       # weights (bf16)
           + (H + 4) * (W + 2) * Cp * 2                    # input slab
           + (TH + 2) * (W + 2) * Cp * 2                   # conv1-output slab
           + 2 * (TH + 2) * W * 9 * Cp * 2                 # im2col patches
           + 4 * (TH + 2) * W * Cp * 4)                    # f32 intermediates
    vmem_limit = int(min(96 * 2**20, max(32 * 2**20, 2 * est)))

    kernel = functools.partial(_basic_block_kernel, H=H, W=W, Cp=Cp, TH=TH)
    wgt_spec = pl.BlockSpec((9 * Cp, Cp), lambda n, t: (0, 0))
    chn_spec = pl.BlockSpec((1, Cp), lambda n, t: (0, 0))

    out_p = pl.pallas_call(
        kernel,
        out_shape=jax.ShapeDtypeStruct((N, H, W, Cp), x_nhwc.dtype),
        grid=(N, T),
        in_specs=[
            pl.BlockSpec((1, H, W, Cp), lambda n, t: (n, 0, 0, 0)),  # x (+residual)
            wgt_spec, chn_spec, chn_spec,                            # conv1 / BN1
            wgt_spec, chn_spec, chn_spec,                            # conv2 / BN2
        ],
        out_specs=pl.BlockSpec((1, TH, W, Cp), lambda n, t: (n, t, 0, 0)),
        scratch_shapes=[
            pltpu.VMEM((H + 4, W + 2, Cp), jnp.bfloat16),   # zero-framed input slab
            pltpu.VMEM((TH + 2, W + 2, Cp), jnp.bfloat16),  # zero-framed conv1 out
        ],
        compiler_params=pltpu.CompilerParams(
            dimension_semantics=("parallel", "arbitrary"),
            vmem_limit_bytes=vmem_limit),
    )(x_p, w1, s1, b1, w2, s2, b2)

    return out_p if C == Cp else out_p[..., :C]


def basic_block_forward(x_nchw, params, *, row_tile=None):
    """PyTorch-layout (NCHW) entry point. A stacked network should stay in
    NHWC / channel-padded and call basic_block_forward_nhwc directly."""
    x = jnp.transpose(x_nchw, (0, 2, 3, 1))                # -> NHWC
    out = basic_block_forward_nhwc(x, params, row_tile=row_tile)
    return jnp.transpose(out, (0, 3, 1, 2))                # -> NCHW


# ---------------------------------------------------------------------------
# Deterministic parameters + pure-JAX reference (f32) for checking.
# ---------------------------------------------------------------------------
def make_params(key, c_in, c_out, eps=1e-5):
    ks = jax.random.split(key, 10)

    def bn_fold(kg, kb, km, kv, c):
        gamma = 1.0 + 0.1 * jax.random.normal(kg, (c,), jnp.float32)
        beta = 0.1 * jax.random.normal(kb, (c,), jnp.float32)
        rmean = 0.1 * jax.random.normal(km, (c,), jnp.float32)
        rvar = jax.nn.softplus(jax.random.normal(kv, (c,), jnp.float32)) + 0.5
        scale = gamma / jnp.sqrt(rvar + eps)
        bias = beta - rmean * scale
        return scale, bias

    w1_oihw = 0.1 * jax.random.normal(ks[0], (c_out, c_in, 3, 3), jnp.float32)
    w2_oihw = 0.1 * jax.random.normal(ks[1], (c_out, c_out, 3, 3), jnp.float32)
    s1, b1 = bn_fold(ks[2], ks[3], ks[4], ks[5], c_out)
    s2, b2 = bn_fold(ks[6], ks[7], ks[8], ks[9], c_out)
    return {"w1_oihw": w1_oihw, "s1": s1, "b1": b1,
            "w2_oihw": w2_oihw, "s2": s2, "b2": b2}


def reference_forward(x_nchw, params):
    x = jnp.transpose(x_nchw, (0, 2, 3, 1))  # NHWC

    def conv_bn(x, w_oihw, s, b):
        w_hwio = jnp.transpose(w_oihw, (2, 3, 1, 0))
        y = jax.lax.conv_general_dilated(
            x, w_hwio, window_strides=(1, 1), padding="SAME",
            dimension_numbers=("NHWC", "HWIO", "NHWC"))
        return y * s + b

    out = conv_bn(x, params["w1_oihw"], params["s1"], params["b1"])
    out = out * jax.nn.sigmoid(out)
    out = conv_bn(out, params["w2_oihw"], params["s2"], params["b2"])
    out = out + x
    out = out * jax.nn.sigmoid(out)
    return jnp.transpose(out, (0, 3, 1, 2))


if __name__ == "__main__":
    key = jax.random.PRNGKey(0)
    k_x, k_p = jax.random.split(key)

    N, C, H, W = 2, 4, 16, 16                  # filter_in == filter_out (residual)
    x = jax.random.normal(k_x, (N, C, H, W), jnp.float32)
    params = make_params(k_p, C, C)

    ref = jax.block_until_ready(reference_forward(x, params))

    # Row-tiled path (grid = (N, 2), exercises the halo / edge-row logic).
    out_tiled = jax.block_until_ready(basic_block_forward(x, params, row_tile=8))
    assert out_tiled.shape == (N, C, H, W)
    # bf16 MXU inputs (f32 accumulation) -> bf16-level tolerance vs f32 reference.
    assert jnp.allclose(out_tiled, ref, atol=2e-2, rtol=2e-2), "tiled mismatch"

    # Single-tile path (grid = (N, 1)) must give the same result.
    out_full = jax.block_until_ready(basic_block_forward(x, params, row_tile=16))
    assert jnp.allclose(out_full, ref, atol=2e-2, rtol=2e-2), "full-tile mismatch"

    print("KERNEL_OK")
</pallas_src>

<mosaic_0001>
module attributes {stable_mosaic.version = 11 : i64} {
  func.func @_basic_block_kernel(%arg0: i32, %arg1: i32, %arg2: memref<1x16x16x128xf32, #tpu.memory_space<vmem>>, %arg3: memref<1152x128xbf16, #tpu.memory_space<vmem>>, %arg4: memref<1x128xf32, #tpu.memory_space<vmem>>, %arg5: memref<1x128xf32, #tpu.memory_space<vmem>>, %arg6: memref<1152x128xbf16, #tpu.memory_space<vmem>>, %arg7: memref<1x128xf32, #tpu.memory_space<vmem>>, %arg8: memref<1x128xf32, #tpu.memory_space<vmem>>, %arg9: memref<1x8x16x128xf32, #tpu.memory_space<vmem>>, %arg10: memref<20x18x128xbf16, #tpu.memory_space<vmem>>, %arg11: memref<10x18x128xbf16, #tpu.memory_space<vmem>>) attributes {dimension_semantics = [#tpu.dimension_semantics<parallel>, #tpu.dimension_semantics<arbitrary>], iteration_bounds = array<i64: 2, 2>, scalar_prefetch = 0 : i64, scratch_operands = 2 : i64, tpu.core_type = #tpu.core_type<tc>, window_params = [{transform_indices = @transform_0, window_bounds = array<i64: 1, 16, 16, 128>}, {pipeline_mode = #tpu.pipeline_mode<synchronous>, transform_indices = @transform_1, window_bounds = array<i64: 1152, 128>}, {pipeline_mode = #tpu.pipeline_mode<synchronous>, transform_indices = @transform_2, window_bounds = array<i64: 1, 128>}, {pipeline_mode = #tpu.pipeline_mode<synchronous>, transform_indices = @transform_3, window_bounds = array<i64: 1, 128>}, {pipeline_mode = #tpu.pipeline_mode<synchronous>, transform_indices = @transform_4, window_bounds = array<i64: 1152, 128>}, {pipeline_mode = #tpu.pipeline_mode<synchronous>, transform_indices = @transform_5, window_bounds = array<i64: 1, 128>}, {pipeline_mode = #tpu.pipeline_mode<synchronous>, transform_indices = @transform_6, window_bounds = array<i64: 1, 128>}, {transform_indices = @transform_7, window_bounds = array<i64: 1, 8, 16, 128>}]} {
    %c8_i32 = arith.constant 8 : i32
    %0 = arith.muli %arg1, %c8_i32 : i32
    %1 = tpu.assume_multiple %0, 8 : i32
    %c0_i32 = arith.constant 0 : i32
    %2 = arith.cmpi eq, %arg1, %c0_i32 : i32
    %3 = arith.extui %2 : i1 to i32
    %c0_i32_0 = arith.constant 0 : i32
    %4 = arith.cmpi ne, %3, %c0_i32_0 : i32
    scf.if %4 {
      %cst_79 = arith.constant 0.000000e+00 : bf16
      %99 = vector.broadcast %cst_79 : bf16 to vector<2x18x128xbf16>
      %cst_80 = arith.constant 0.000000e+00 : bf16
      %100 = vector.broadcast %cst_80 : bf16 to vector<20x1x128xbf16>
      %c0_81 = arith.constant 0 : index
      %c0_82 = arith.constant 0 : index
      %c0_83 = arith.constant 0 : index
      %101 = vector.load %arg10[%c0_81, %c0_82, %c0_83] : memref<20x18x128xbf16, #tpu.memory_space<vmem>>, vector<2x18x128xbf16>
      tpu.vector_store %arg10[%c0_81, %c0_82, %c0_83], %99 {strides = array<i32>} : memref<20x18x128xbf16, #tpu.memory_space<vmem>>, vector<2x18x128xbf16>,
      %c18 = arith.constant 18 : index
      %c0_84 = arith.constant 0 : index
      %c0_85 = arith.constant 0 : index
      %102 = vector.load %arg10[%c18, %c0_84, %c0_85] : memref<20x18x128xbf16, #tpu.memory_space<vmem>>, vector<2x18x128xbf16>
      tpu.vector_store %arg10[%c18, %c0_84, %c0_85], %99 {strides = array<i32>} : memref<20x18x128xbf16, #tpu.memory_space<vmem>>, vector<2x18x128xbf16>,
      %c0_86 = arith.constant 0 : index
      %c0_87 = arith.constant 0 : index
      %c0_88 = arith.constant 0 : index
      %103 = vector.load %arg10[%c0_86, %c0_87, %c0_88] : memref<20x18x128xbf16, #tpu.memory_space<vmem>>, vector<20x1x128xbf16>
      tpu.vector_store %arg10[%c0_86, %c0_87, %c0_88], %100 {strides = array<i32>} : memref<20x18x128xbf16, #tpu.memory_space<vmem>>, vector<20x1x128xbf16>,
      %c0_89 = arith.constant 0 : index
      %c17 = arith.constant 17 : index
      %c0_90 = arith.constant 0 : index
      %104 = vector.load %arg10[%c0_89, %c17, %c0_90] : memref<20x18x128xbf16, #tpu.memory_space<vmem>>, vector<20x1x128xbf16>
      tpu.vector_store %arg10[%c0_89, %c17, %c0_90], %100 {strides = array<i32>} : memref<20x18x128xbf16, #tpu.memory_space<vmem>>, vector<20x1x128xbf16>,
      %c0_91 = arith.constant 0 : index
      %c0_92 = arith.constant 0 : index
      %c0_93 = arith.constant 0 : index
      %c0_94 = arith.constant 0 : index
      %105 = vector.load %arg2[%c0_91, %c0_92, %c0_93, %c0_94] : memref<1x16x16x128xf32, #tpu.memory_space<vmem>>, vector<1x16x16x128xf32>
      %106 = vector.shape_cast %105 : vector<1x16x16x128xf32> to vector<16x16x128xf32>
      %107 = arith.truncf %106 : vector<16x16x128xf32> to vector<16x16x128xbf16>
      %c2_95 = arith.constant 2 : index
      %c1_96 = arith.constant 1 : index
      %c0_97 = arith.constant 0 : index
      %108 = vector.load %arg10[%c2_95, %c1_96, %c0_97] : memref<20x18x128xbf16, #tpu.memory_space<vmem>>, vector<16x16x128xbf16>
      tpu.vector_store %arg10[%c2_95, %c1_96, %c0_97], %107 {strides = array<i32>} : memref<20x18x128xbf16, #tpu.memory_space<vmem>>, vector<16x16x128xbf16>,
      %cst_98 = arith.constant 0.000000e+00 : bf16
      %109 = vector.broadcast %cst_98 : bf16 to vector<10x1x128xbf16>
      %c0_99 = arith.constant 0 : index
      %c0_100 = arith.constant 0 : index
      %c0_101 = arith.constant 0 : index
      %110 = vector.load %arg11[%c0_99, %c0_100, %c0_101] : memref<10x18x128xbf16, #tpu.memory_space<vmem>>, vector<10x1x128xbf16>
      tpu.vector_store %arg11[%c0_99, %c0_100, %c0_101], %109 {strides = array<i32>} : memref<10x18x128xbf16, #tpu.memory_space<vmem>>, vector<10x1x128xbf16>,
      %c0_102 = arith.constant 0 : index
      %c17_103 = arith.constant 17 : index
      %c0_104 = arith.constant 0 : index
      %111 = vector.load %arg11[%c0_102, %c17_103, %c0_104] : memref<10x18x128xbf16, #tpu.memory_space<vmem>>, vector<10x1x128xbf16>
      tpu.vector_store %arg11[%c0_102, %c17_103, %c0_104], %109 {strides = array<i32>} : memref<10x18x128xbf16, #tpu.memory_space<vmem>>, vector<10x1x128xbf16>,
    } else {
    }
    %c0_i32_1 = arith.constant 0 : i32
    %5 = arith.addi %1, %c0_i32_1 : i32
    %6 = arith.index_cast %5 : i32 to index
    %c0 = arith.constant 0 : index
    %c0_2 = arith.constant 0 : index
    %7 = vector.load %arg10[%6, %c0, %c0_2] : memref<20x18x128xbf16, #tpu.memory_space<vmem>>, vector<10x16x128xbf16>
    %c0_i32_3 = arith.constant 0 : i32
    %8 = arith.addi %1, %c0_i32_3 : i32
    %9 = arith.index_cast %8 : i32 to index
    %c1 = arith.constant 1 : index
    %c0_4 = arith.constant 0 : index
    %10 = vector.load %arg10[%9, %c1, %c0_4] : memref<20x18x128xbf16, #tpu.memory_space<vmem>>, vector<10x16x128xbf16>
    %c0_i32_5 = arith.constant 0 : i32
    %11 = arith.addi %1, %c0_i32_5 : i32
    %12 = arith.index_cast %11 : i32 to index
    %c2 = arith.constant 2 : index
    %c0_6 = arith.constant 0 : index
    %13 = vector.load %arg10[%12, %c2, %c0_6] : memref<20x18x128xbf16, #tpu.memory_space<vmem>>, vector<10x16x128xbf16>
    %c1_i32 = arith.constant 1 : i32
    %14 = arith.addi %1, %c1_i32 : i32
    %15 = arith.index_cast %14 : i32 to index
    %c0_7 = arith.constant 0 : index
    %c0_8 = arith.constant 0 : index
    %16 = vector.load %arg10[%15, %c0_7, %c0_8] : memref<20x18x128xbf16, #tpu.memory_space<vmem>>, vector<10x16x128xbf16>
    %c1_i32_9 = arith.constant 1 : i32
    %17 = arith.addi %1, %c1_i32_9 : i32
    %18 = arith.index_cast %17 : i32 to index
    %c1_10 = arith.constant 1 : index
    %c0_11 = arith.constant 0 : index
    %19 = vector.load %arg10[%18, %c1_10, %c0_11] : memref<20x18x128xbf16, #tpu.memory_space<vmem>>, vector<10x16x128xbf16>
    %c1_i32_12 = arith.constant 1 : i32
    %20 = arith.addi %1, %c1_i32_12 : i32
    %21 = arith.index_cast %20 : i32 to index
    %c2_13 = arith.constant 2 : index
    %c0_14 = arith.constant 0 : index
    %22 = vector.load %arg10[%21, %c2_13, %c0_14] : memref<20x18x128xbf16, #tpu.memory_space<vmem>>, vector<10x16x128xbf16>
    %c2_i32 = arith.constant 2 : i32
    %23 = arith.addi %1, %c2_i32 : i32
    %24 = arith.index_cast %23 : i32 to index
    %c0_15 = arith.constant 0 : index
    %c0_16 = arith.constant 0 : index
    %25 = vector.load %arg10[%24, %c0_15, %c0_16] : memref<20x18x128xbf16, #tpu.memory_space<vmem>>, vector<10x16x128xbf16>
    %c2_i32_17 = arith.constant 2 : i32
    %26 = arith.addi %1, %c2_i32_17 : i32
    %27 = arith.index_cast %26 : i32 to index
    %c1_18 = arith.constant 1 : index
    %c0_19 = arith.constant 0 : index
    %28 = vector.load %arg10[%27, %c1_18, %c0_19] : memref<20x18x128xbf16, #tpu.memory_space<vmem>>, vector<10x16x128xbf16>
    %c2_i32_20 = arith.constant 2 : i32
    %29 = arith.addi %1, %c2_i32_20 : i32
    %30 = arith.index_cast %29 : i32 to index
    %c2_21 = arith.constant 2 : index
    %c0_22 = arith.constant 0 : index
    %31 = vector.load %arg10[%30, %c2_21, %c0_22] : memref<20x18x128xbf16, #tpu.memory_space<vmem>>, vector<10x16x128xbf16>
    %32 = tpu.concatenate %7, %10, %13, %16, %19, %22, %25, %28, %31 in 2 : vector<10x16x128xbf16>, vector<10x16x128xbf16>, vector<10x16x128xbf16>, vector<10x16x128xbf16>, vector<10x16x128xbf16>, vector<10x16x128xbf16>, vector<10x16x128xbf16>, vector<10x16x128xbf16>, vector<10x16x128xbf16> -> vector<10x16x1152xbf16>
    %33 = vector.shape_cast %32 : vector<10x16x1152xbf16> to vector<160x1152xbf16>
    %c0_23 = arith.constant 0 : index
    %c0_24 = arith.constant 0 : index
    %34 = vector.load %arg3[%c0_23, %c0_24] : memref<1152x128xbf16, #tpu.memory_space<vmem>>, vector<1152x128xbf16>
    %cst = arith.constant dense<0.000000e+00> : vector<160x128xf32>
    %35 = tpu.matmul %33, %34, %cst {dimension_numbers = #tpu.dot_dimension_numbers<[1], [0], [0], [1], [0, 0, 1, 1], [], []>} : vector<160x1152xbf16>, vector<1152x128xbf16>, vector<160x128xf32> -> vector<160x128xf32>
    %c0_25 = arith.constant 0 : index
    %c0_26 = arith.constant 0 : index
    %36 = vector.load %arg4[%c0_25, %c0_26] : memref<1x128xf32, #tpu.memory_space<vmem>>, vector<1x128xf32>
    %37 = vector.shape_cast %36 : vector<1x128xf32> to vector<128xf32>
    %38 = vector.shape_cast %37 : vector<128xf32> to vector<1x128xf32>
    %39 = vector.broadcast %38 : vector<1x128xf32> to vector<160x128xf32>
    %40 = arith.mulf %35, %39 : vector<160x128xf32>
    %c0_27 = arith.constant 0 : index
    %c0_28 = arith.constant 0 : index
    %41 = vector.load %arg5[%c0_27, %c0_28] : memref<1x128xf32, #tpu.memory_space<vmem>>, vector<1x128xf32>
    %42 = vector.shape_cast %41 : vector<1x128xf32> to vector<128xf32>
    %43 = vector.shape_cast %42 : vector<128xf32> to vector<1x128xf32>
    %44 = vector.broadcast %43 : vector<1x128xf32> to vector<160x128xf32>
    %45 = arith.addf %40, %44 : vector<160x128xf32>
    %46 = arith.negf %45 : vector<160x128xf32>
    %47 = math.exp %46 : vector<160x128xf32>
    %cst_29 = arith.constant 1.000000e+00 : f32
    %48 = vector.broadcast %cst_29 : f32 to vector<160x128xf32>
    %49 = arith.addf %48, %47 : vector<160x128xf32>
    %50 = arith.divf %48, %49 : vector<160x128xf32>
    %51 = arith.mulf %45, %50 : vector<160x128xf32>
    %52 = vector.shape_cast %51 : vector<160x128xf32> to vector<10x16x128xf32>
    %53 = arith.truncf %52 : vector<10x16x128xf32> to vector<10x16x128xbf16>
    %c0_30 = arith.constant 0 : index
    %c1_31 = arith.constant 1 : index
    %c0_32 = arith.constant 0 : index
    %54 = vector.load %arg11[%c0_30, %c1_31, %c0_32] : memref<10x18x128xbf16, #tpu.memory_space<vmem>>, vector<10x16x128xbf16>
    tpu.vector_store %arg11[%c0_30, %c1_31, %c0_32], %53 {strides = array<i32>} : memref<10x18x128xbf16, #tpu.memory_space<vmem>>, vector<10x16x128xbf16>,
    %c0_i32_33 = arith.constant 0 : i32
    %55 = arith.cmpi eq, %arg1, %c0_i32_33 : i32
    %56 = arith.extui %55 : i1 to i32
    %c0_i32_34 = arith.constant 0 : i32
    %57 = arith.cmpi ne, %56, %c0_i32_34 : i32
    scf.if %57 {
      %cst_79 = arith.constant 0.000000e+00 : bf16
      %99 = vector.broadcast %cst_79 : bf16 to vector<1x18x128xbf16>
      %c0_80 = arith.constant 0 : index
      %c0_81 = arith.constant 0 : index
      %c0_82 = arith.constant 0 : index
      %100 = vector.load %arg11[%c0_80, %c0_81, %c0_82] : memref<10x18x128xbf16, #tpu.memory_space<vmem>>, vector<1x18x128xbf16>
      tpu.vector_store %arg11[%c0_80, %c0_81, %c0_82], %99 {strides = array<i32>} : memref<10x18x128xbf16, #tpu.memory_space<vmem>>, vector<1x18x128xbf16>,
    } else {
    }
    %c1_i32_35 = arith.constant 1 : i32
    %58 = arith.cmpi eq, %arg1, %c1_i32_35 : i32
    %59 = arith.extui %58 : i1 to i32
    %c0_i32_36 = arith.constant 0 : i32
    %60 = arith.cmpi ne, %59, %c0_i32_36 : i32
    scf.if %60 {
      %cst_79 = arith.constant 0.000000e+00 : bf16
      %99 = vector.broadcast %cst_79 : bf16 to vector<1x18x128xbf16>
      %c9 = arith.constant 9 : index
      %c0_80 = arith.constant 0 : index
      %c0_81 = arith.constant 0 : index
      %100 = vector.load %arg11[%c9, %c0_80, %c0_81] : memref<10x18x128xbf16, #tpu.memory_space<vmem>>, vector<1x18x128xbf16>
      tpu.vector_store %arg11[%c9, %c0_80, %c0_81], %99 {strides = array<i32>} : memref<10x18x128xbf16, #tpu.memory_space<vmem>>, vector<1x18x128xbf16>,
    } else {
    }
    %c0_37 = arith.constant 0 : index
    %c0_38 = arith.constant 0 : index
    %c0_39 = arith.constant 0 : index
    %61 = vector.load %arg11[%c0_37, %c0_38, %c0_39] : memref<10x18x128xbf16, #tpu.memory_space<vmem>>, vector<8x16x128xbf16>
    %c0_40 = arith.constant 0 : index
    %c1_41 = arith.constant 1 : index
    %c0_42 = arith.constant 0 : index
    %62 = vector.load %arg11[%c0_40, %c1_41, %c0_42] : memref<10x18x128xbf16, #tpu.memory_space<vmem>>, vector<8x16x128xbf16>
    %c0_43 = arith.constant 0 : index
    %c2_44 = arith.constant 2 : index
    %c0_45 = arith.constant 0 : index
    %63 = vector.load %arg11[%c0_43, %c2_44, %c0_45] : memref<10x18x128xbf16, #tpu.memory_space<vmem>>, vector<8x16x128xbf16>
    %c1_46 = arith.constant 1 : index
    %c0_47 = arith.constant 0 : index
    %c0_48 = arith.constant 0 : index
    %64 = vector.load %arg11[%c1_46, %c0_47, %c0_48] : memref<10x18x128xbf16, #tpu.memory_space<vmem>>, vector<8x16x128xbf16>
    %c1_49 = arith.constant 1 : index
    %c1_50 = arith.constant 1 : index
    %c0_51 = arith.constant 0 : index
    %65 = vector.load %arg11[%c1_49, %c1_50, %c0_51] : memref<10x18x128xbf16, #tpu.memory_space<vmem>>, vector<8x16x128xbf16>
    %c1_52 = arith.constant 1 : index
    %c2_53 = arith.constant 2 : index
    %c0_54 = arith.constant 0 : index
    %66 = vector.load %arg11[%c1_52, %c2_53, %c0_54] : memref<10x18x128xbf16, #tpu.memory_space<vmem>>, vector<8x16x128xbf16>
    %c2_55 = arith.constant 2 : index
    %c0_56 = arith.constant 0 : index
    %c0_57 = arith.constant 0 : index
    %67 = vector.load %arg11[%c2_55, %c0_56, %c0_57] : memref<10x18x128xbf16, #tpu.memory_space<vmem>>, vector<8x16x128xbf16>
    %c2_58 = arith.constant 2 : index
    %c1_59 = arith.constant 1 : index
    %c0_60 = arith.constant 0 : index
    %68 = vector.load %arg11[%c2_58, %c1_59, %c0_60] : memref<10x18x128xbf16, #tpu.memory_space<vmem>>, vector<8x16x128xbf16>
    %c2_61 = arith.constant 2 : index
    %c2_62 = arith.constant 2 : index
    %c0_63 = arith.constant 0 : index
    %69 = vector.load %arg11[%c2_61, %c2_62, %c0_63] : memref<10x18x128xbf16, #tpu.memory_space<vmem>>, vector<8x16x128xbf16>
    %70 = tpu.concatenate %61, %62, %63, %64, %65, %66, %67, %68, %69 in 2 : vector<8x16x128xbf16>, vector<8x16x128xbf16>, vector<8x16x128xbf16>, vector<8x16x128xbf16>, vector<8x16x128xbf16>, vector<8x16x128xbf16>, vector<8x16x128xbf16>, vector<8x16x128xbf16>, vector<8x16x128xbf16> -> vector<8x16x1152xbf16>
    %71 = vector.shape_cast %70 : vector<8x16x1152xbf16> to vector<128x1152xbf16>
    %c0_64 = arith.constant 0 : index
    %c0_65 = arith.constant 0 : index
    %72 = vector.load %arg6[%c0_64, %c0_65] : memref<1152x128xbf16, #tpu.memory_space<vmem>>, vector<1152x128xbf16>
    %cst_66 = arith.constant dense<0.000000e+00> : vector<128x128xf32>
    %73 = tpu.matmul %71, %72, %cst_66 {dimension_numbers = #tpu.dot_dimension_numbers<[1], [0], [0], [1], [0, 0, 1, 1], [], []>} : vector<128x1152xbf16>, vector<1152x128xbf16>, vector<128x128xf32> -> vector<128x128xf32>
    %c0_67 = arith.constant 0 : index
    %c0_68 = arith.constant 0 : index
    %74 = vector.load %arg7[%c0_67, %c0_68] : memref<1x128xf32, #tpu.memory_space<vmem>>, vector<1x128xf32>
    %75 = vector.shape_cast %74 : vector<1x128xf32> to vector<128xf32>
    %76 = vector.shape_cast %75 : vector<128xf32> to vector<1x128xf32>
    %77 = vector.broadcast %76 : vector<1x128xf32> to vector<128x128xf32>
    %78 = arith.mulf %73, %77 : vector<128x128xf32>
    %c0_69 = arith.constant 0 : index
    %c0_70 = arith.constant 0 : index
    %79 = vector.load %arg8[%c0_69, %c0_70] : memref<1x128xf32, #tpu.memory_space<vmem>>, vector<1x128xf32>
    %80 = vector.shape_cast %79 : vector<1x128xf32> to vector<128xf32>
    %81 = vector.shape_cast %80 : vector<128xf32> to vector<1x128xf32>
    %82 = vector.broadcast %81 : vector<1x128xf32> to vector<128x128xf32>
    %83 = arith.addf %78, %82 : vector<128x128xf32>
    %c0_71 = arith.constant 0 : index
    %84 = arith.index_cast %1 : i32 to index
    %c0_72 = arith.constant 0 : index
    %c0_73 = arith.constant 0 : index
    %85 = vector.load %arg2[%c0_71, %84, %c0_72, %c0_73] : memref<1x16x16x128xf32, #tpu.memory_space<vmem>>, vector<1x8x16x128xf32>
    %86 = vector.shape_cast %85 : vector<1x8x16x128xf32> to vector<8x16x128xf32>
    %87 = vector.shape_cast %86 : vector<8x16x128xf32> to vector<128x128xf32>
    %88 = arith.addf %83, %87 : vector<128x128xf32>
    %89 = arith.negf %88 : vector<128x128xf32>
    %90 = math.exp %89 : vector<128x128xf32>
    %cst_74 = arith.constant 1.000000e+00 : f32
    %91 = vector.broadcast %cst_74 : f32 to vector<128x128xf32>
    %92 = arith.addf %91, %90 : vector<128x128xf32>
    %93 = arith.divf %91, %92 : vector<128x128xf32>
    %94 = arith.mulf %88, %93 : vector<128x128xf32>
    %95 = vector.shape_cast %94 : vector<128x128xf32> to vector<8x16x128xf32>
    %c0_75 = arith.constant 0 : index
    %c0_76 = arith.constant 0 : index
    %c0_77 = arith.constant 0 : index
    %c0_78 = arith.constant 0 : index
    %96 = vector.load %arg9[%c0_75, %c0_76, %c0_77, %c0_78] : memref<1x8x16x128xf32, #tpu.memory_space<vmem>>, vector<1x8x16x128xf32>
    %97 = vector.shape_cast %96 : vector<1x8x16x128xf32> to vector<8x16x128xf32>
    %98 = vector.shape_cast %95 : vector<8x16x128xf32> to vector<1x8x16x128xf32>
    tpu.vector_store %arg9[%c0_75, %c0_76, %c0_77, %c0_78], %98 {strides = array<i32>} : memref<1x8x16x128xf32, #tpu.memory_space<vmem>>, vector<1x8x16x128xf32>,
    return
  }
  func.func @transform_0(%arg0: i32, %arg1: i32) -> (i32, i32, i32, i32) {
    %c0_i32 = arith.constant 0 : i32
    %c0_i32_0 = arith.constant 0 : i32
    %c0_i32_1 = arith.constant 0 : i32
    %c0_i32_2 = arith.constant 0 : i32
    return %arg0, %c0_i32, %c0_i32_0, %c0_i32_1 : i32, i32, i32, i32
  }
  func.func @transform_1(%arg0: i32, %arg1: i32) -> (i32, i32) {
    %c0_i32 = arith.constant 0 : i32
    %c0_i32_0 = arith.constant 0 : i32
    %c0_i32_1 = arith.constant 0 : i32
    return %c0_i32, %c0_i32_0 : i32, i32
  }
  func.func @transform_2(%arg0: i32, %arg1: i32) -> (i32, i32) {
    %c0_i32 = arith.constant 0 : i32
    %c0_i32_0 = arith.constant 0 : i32
    %c0_i32_1 = arith.constant 0 : i32
    return %c0_i32, %c0_i32_0 : i32, i32
  }
  func.func @transform_3(%arg0: i32, %arg1: i32) -> (i32, i32) {
    %c0_i32 = arith.constant 0 : i32
    %c0_i32_0 = arith.constant 0 : i32
    %c0_i32_1 = arith.constant 0 : i32
    return %c0_i32, %c0_i32_0 : i32, i32
  }
  func.func @transform_4(%arg0: i32, %arg1: i32) -> (i32, i32) {
    %c0_i32 = arith.constant 0 : i32
    %c0_i32_0 = arith.constant 0 : i32
    %c0_i32_1 = arith.constant 0 : i32
    return %c0_i32, %c0_i32_0 : i32, i32
  }
  func.func @transform_5(%arg0: i32, %arg1: i32) -> (i32, i32) {
    %c0_i32 = arith.constant 0 : i32
    %c0_i32_0 = arith.constant 0 : i32
    %c0_i32_1 = arith.constant 0 : i32
    return %c0_i32, %c0_i32_0 : i32, i32
  }
  func.func @transform_6(%arg0: i32, %arg1: i32) -> (i32, i32) {
    %c0_i32 = arith.constant 0 : i32
    %c0_i32_0 = arith.constant 0 : i32
    %c0_i32_1 = arith.constant 0 : i32
    return %c0_i32, %c0_i32_0 : i32, i32
  }
  func.func @transform_7(%arg0: i32, %arg1: i32) -> (i32, i32, i32, i32) {
    %c0_i32 = arith.constant 0 : i32
    %c0_i32_0 = arith.constant 0 : i32
    %c0_i32_1 = arith.constant 0 : i32
    return %arg0, %arg1, %c0_i32, %c0_i32_0 : i32, i32, i32, i32
  }
}

</mosaic_0001>

<bundles_post_ra>
// kernel: tpu_custom_call.1
= control target key start
LH: loop header
LB: loop body
LE: loop exit
PB: predicated region body
PF: predicated region fallthrough
CT: control target
= control target key end

     0   :  { %s9966_s0 = inlined_call_operand.hbm [shape: f32[2,16,16,128], index: 0, kind: input, shape index: {}]   ;;  %s9967_s1 = inlined_call_operand.hbm [shape: bf16[1152,128], index: 1, kind: input, shape index: {}]   ;;  %s9968_s2 = inlined_call_operand.vmem [shape: f32[1,128], index: 2, kind: input, shape index: {}]   ;;  %s9969_s3 = inlined_call_operand.vmem [shape: f32[1,128], index: 3, kind: input, shape index: {}]   ;;  %s9970_s4 = inlined_call_operand.hbm [shape: bf16[1152,128], index: 4, kind: input, shape index: {}]   ;;  %s9971_s5 = inlined_call_operand.vmem [shape: f32[1,128], index: 5, kind: input, shape index: {}]   ;;  %s9972_s6 = inlined_call_operand.vmem [shape: f32[1,128], index: 6, kind: input, shape index: {}]   ;;  %s9973_s7 = inlined_call_operand.hbm [shape: f32[2,16,16,128], index: 7, kind: output, shape index: {}]  }
   0x1   :  { %9986 = sst [smem:[#allocation20_spill]] %s9967_s1 }
   0x2   :  { %9987 = sst [smem:[#allocation21_spill]] %s9970_s4 }
   0x3   :  { %9988 = sst [smem:[#allocation22_spill]] %s9972_s6 }
   0x4   :  { %9989 = sst [smem:[#allocation23_spill]] %s9973_s7 }
   0x5   :  { %12 = vsyncpa [#allocation5], 0 }
   0x6   :  { %14 = vsyncpa [#allocation5 + $0x1], 0 }
   0x7   :  { %15 = vsyncpa [#allocation8], 0 }
   0x8   :  { %16 = vsyncpa [#allocation6], 0 }
   0x9   :  { %18 = vsyncpa [#allocation6 + $0x1], 0  ;;  %s8075_s24 = smov 0   ;;  %s8077_s25 = smov 0  }
   0xa   :  { %s8079_s26 = smov 0   ;;  %s8081_s27 = smov 0  }
   0xb   :  { %s8083_s28 = smov 0   ;;  %s8085_s29 = smov 0  }
   0xc   :  { %s8087_s30 = smov 0   ;;  %s8089_s8 = smov 0  }
   0xd   :  { %s8091_s9 = smov 0   ;;  %s8093_s10 = smov 0  }
   0xe   :  { %s8095_s11 = smov 0  }
   0xf LB: > { %9990 = sst [smem:[#allocation14_spill]] %s7980_s24  ;;  %s5998_s12 = sadd.s32 4294967295, %s8020_s11   ;;  %s8020_s11 = sphi %s8095_s11, %s24_s11   ;;  %s8016_s10 = sphi %s8093_s10, %s10041_s10   ;;  %s8012_s9 = sphi %s8091_s9, %s10033_s9   ;;  %s8008_s8 = sphi %s8089_s8, %s10040_s8   ;;  %s8004_s30 = sphi %s8087_s30, %s10032_s30   ;;  %s8000_s29 = sphi %s8085_s29, %s10039_s29   ;;  %s7996_s28 = sphi %s8083_s28, %s10038_s28   ;;  %s7992_s27 = sphi %s8081_s27, %s10037_s27   ;;  %s7988_s26 = sphi %s8079_s26, %s10036_s26   ;;  %s7984_s25 = sphi %s8077_s25, %s10035_s25   ;;  %s7980_s24 = sphi %s8075_s24, %s10034_s24  }
  0x10   : > { %9991 = sst [smem:[#allocation15_spill]] %s8008_s8  ;;  %s5999_s13 = sadd.s32 4294967294, %s8020_s11  }
  0x11   : > { %9992 = sst [smem:[#allocation16_spill]] %s8012_s9  ;;  %p56_p0 = scmp.ne.s32.totalorder %s7996_s28, %s7992_s27 }
  0x12   : > { %p8131_p1 = scmp.eq.s32.totalorder %s5998_s12, 0  ;;  %p207_p2 = scmp.ne.s32.totalorder %s7988_s26, %s7984_s25 }
  0x13   : > { %p208_p4 = scmp.eq.s32.totalorder %s5998_s12, 3  ;;  %p213_p5 = scmp.ne.s32.totalorder %s7984_s25, %s7980_s24 }
  0x14   : > { %s9993_s14 = scalar_select %p8131_p1, 1, 0 }
  0x15   : > { %p8140_p3 = por %p8131_p1, %p56_p0  ;;  %p214_p6 = scmp.eq.s32.totalorder %s5999_s13, 3 }
  0x16   : > { %p8146_p7 = por %p208_p4, %p207_p2  ;;  %p6000_p8 = scmp.ge.s32.totalorder %s8020_s11, 1 }
  0x17   : > { %s9994_s16 = scalar_select %p8140_p3, 1, 0 }
  0x18   : > { %s9995_s17 = scalar_select %p8146_p7, 1, 0 }
  0x19   : > { %p8151_p9 = por %p214_p6, %p213_p5  ;;  %p221_p10 = scmp.lt.s32.totalorder %s8020_s11, 5 }
  0x1a   : > { %9996 = sst [smem:[#allocation17_spill]] %s9995_s17  ;;  %s8022_s20 = smov [#allocation7]  }
  0x1b   : > { %s9997_s18 = scalar_select %p8151_p9, 1, 0 }
  0x1c   : > { %p8156_p11 = pnand %p6000_p8, %p221_p10  ;;  %s233_s21 = sshll.u32 %s8022_s20, 4  ;;  %s234_s21 = int_to_ptr.vmem [resolvable:$true] %s233_s21 }
  0x1d   : > { %9998 = sst [smem:[#allocation18_spill]] %s9997_s18  ;;  %s8023_s23 = smov [#allocation9]  }
  0x1e   : > { %s9999_s19 = scalar_select %p8156_p11, 1, 0 }
  0x1f   : > { %p7238_p12 = pneg %p8156_p11  ;;  %s252_s27 = sshll.u32 %s8023_s23, 4  ;;  %s8168_s27 = int_to_ptr.vmem [resolvable:$true] %s252_s27 }
  0x20   : > { %s10001_s1 = sld [smem:[#allocation20_spill]] }
  0x21   : > { %p8164_p13 = pnand %p7238_p12, %p8131_p1 }
  0x23   : > { %p7810_p2 = pneg %p8164_p13 }
  0x26   : > { %s7808_s15 = scalar_lea.hbm %s10001_s1, 9216 }
  0x27   : > { %p7809_p0 = scmp.ne.s32.totalorder %s10001_s1, %s7808_s15  ;;  %p7815_p6 = scmp.lt.u32.totalorder %s7808_s15, %s10001_s1 }
  0x29   : > { %p7811_p4 = pnand %p7810_p2, %p7809_p0 }
  0x2b   : > { %p7812_p5 = pneg %p7811_p4 }
  0x2d   : > { %p7817_p8 = pnand %p7815_p6, %p7812_p5 }
  0x2f   : > { %7820 = shalt.err (!%p7817_p8)
}
  0x30   : > { %s7821_s23 = scalar_lea.vmem %s234_s21, 9216  ;;  %p7829_p7 = scmp.lt.s32.totalorder %s234_s21, %s234_s21 }
  0x31   : > { %p7822_p10 = scmp.ne.s32.totalorder %s234_s21, %s7821_s23  ;;  %p7830_p1 = scmp.lt.s32.totalorder %s7821_s23, %s7821_s23 }
  0x33   : > { %p7824_p12 = pnand %p7822_p10, %p7810_p2  ;;  %p7831_p3 = por %p7830_p1, %p7829_p7 }
  0x35   : > { %p7825_p9 = pneg %p7824_p12 }
  0x37   : > { %p7832_p11 = pnand %p7831_p3, %p7825_p9 }
  0x39   : > { %7835 = shalt.err (!%p7832_p11)
}
  0x3a   : > { %s8024_s18 = smov 64   ;;  %s8025_s12 = smov 4  }
  0x3b   : > { %7241 = dma.hbm_to_vmem [thread:$0]  (!%p8164_p13), %s10001_s1, 9216, %s234_s21, [#allocation8], %s8024_s18, %s8024_s18, %s8025_s12  }
  0x3c   : > { %s10002_s4 = sld [smem:[#allocation21_spill]] }
  0x42   : > { %s7836_s20 = scalar_lea.hbm %s10002_s4, 9216 }
  0x43   : > { %p7837_p0 = scmp.ne.s32.totalorder %s10002_s4, %s7836_s20  ;;  %p7843_p7 = scmp.lt.u32.totalorder %s7836_s20, %s10002_s4 }
  0x45   : > { %p7839_p1 = pnand %p7837_p0, %p7810_p2 }
  0x47   : > { %p7840_p3 = pneg %p7839_p1 }
  0x49   : > { %p7845_p9 = pnand %p7843_p7, %p7840_p3 }
  0x4b   : > { %7848 = shalt.err (!%p7845_p9)
}
  0x4c   : > { %s7849_s21 = scalar_lea.vmem %s8168_s27, 9216  ;;  %p7857_p6 = scmp.lt.s32.totalorder %s8168_s27, %s8168_s27 }
  0x4d   : > { %p7850_p11 = scmp.ne.s32.totalorder %s8168_s27, %s7849_s21  ;;  %p7858_p8 = scmp.lt.s32.totalorder %s7849_s21, %s7849_s21 }
  0x4f   : > { %p7852_p4 = pnand %p7850_p11, %p7810_p2  ;;  %p7859_p10 = por %p7858_p8, %p7857_p6 }
  0x51   : > { %p7853_p5 = pneg %p7852_p4 }
  0x53   : > { %p7860_p12 = pnand %p7859_p10, %p7853_p5 }
  0x55   : > { %7863 = shalt.err (!%p7860_p12)
}
  0x56   : > { %7244 = dma.hbm_to_vmem [thread:$0]  (!%p8164_p13), %s10002_s4, 9216, %s8168_s27, [#allocation8], %s8024_s18, %s8024_s18, %s8025_s12  }
  0x57   : > { %s33_s17 = sadd.s32 1, %s8012_s9  ;;  %s36_s7 = sadd.s32 1, %s8016_s10 }
  0x58   : > { %p34_p2 = scmp.ge.s32.totalorder %s33_s17, 2  ;;  %s43_s22 = sadd.s32 1, %s8000_s29 }
  0x59   : > { %p50_p0 = scmp.ne.s32.totalorder %s8000_s29, %s7996_s28  ;;  %p51_p1 = scmp.eq.s32.totalorder %s8020_s11, 0 }
  0x5a   : > { %s10043_s17 = smov (%p34_p2, %s33_s17), 0  ;;  %s10045_s7 = smov (!%p34_p2, %s36_s7), %s8016_s10 }
  0x5b   : > { %10003 = sst [smem:[#allocation19_spill]] %s10043_s17  ;;  %p8226_p3 = por %p51_p1, %p50_p0 }
  0x5c   : > { %s193_s15 = ssub.s32 %s8012_s9, %s10043_s17  ;;  %p38_p13 = scmp.ge.s32.totalorder %s10045_s7, 2 }
  0x5d   : > { %p7255_p7 = scmp.lt.s32.totalorder %s8020_s11, 4  ;;  %s272_s27 = sand.u32 1, %s8000_s29  }
  0x5e   : > { %s6508_s18 = sshll.u32 %s8016_s10, 12  ;;  %s10047_s7 = smov (%p38_p13, %s10045_s7), 0 }
  0x5f   : > { %s6004_s12 = sshll.u32 %s272_s27, 8  ;;  %s40_s13 = ssub.s32 %s8016_s10, %s10047_s7 }
  0x60   : > { %p41_p9 = scmp.eq.s32.totalorder %s40_s13, 0  ;;  %s194_s20 = sor.u32 %s193_s15, %s40_s13 }
  0x61   : > { %p195_p11 = scmp.eq.s32.totalorder %s194_s20, 0  ;;  %s8242_s6 = scalar_lea.hbm %s9966_s0, %s6508_s18 }
  0x62   : > { %s8245_s8 = scalar_select %p41_p9, %s8000_s29, %s43_s22  }
  0x63   : > { %s10005_s1 = sadd.s32 1, %s7988_s26  ;;  %s276_s17 = scalar_lea.vmem [#allocation4], %s6004_s12 }
  0x64   : > { %s8250_s4 = scalar_select %p195_p11, %s7988_s26, %s10005_s1  }
  0x65   : > { %s283_s9 = sshll.u32 %s276_s17, 4  ;;  %p8256_p4 = pnand %p7255_p7, %p8226_p3  ;;  %s8260_s9 = int_to_ptr.vmem [resolvable:$true] %s283_s9 }
  0x66   : > { %s8262_s18 = scalar_lea.sflag [#allocation5], %s272_s27  ;;  %s7864_s22 = scalar_lea.hbm %s8242_s6, 4096 }
  0x67   : > { %p7865_p5 = scmp.ne.s32.totalorder %s8242_s6, %s7864_s22  ;;  %p7866_p6 = pneg %p8256_p4 }
  0x68   : > { %s7869_s24 = scalar_lea.hbm %s9966_s0, 8192  ;;  %p7870_p12 = scmp.lt.u32.totalorder %s8242_s6, %s9966_s0 }
  0x69   : > { %p7867_p8 = pnand %p7866_p6, %p7865_p5  ;;  %p7871_p2 = scmp.lt.u32.totalorder %s7869_s24, %s7864_s22 }
  0x6a   : > { %p7873_p1 = scmp.lt.u32.totalorder %s7864_s22, %s8242_s6 }
  0x6b   : > { %p7868_p10 = pneg %p7867_p8  ;;  %p7872_p0 = por %p7871_p2, %p7870_p12 }
  0x6d   : > { %p7874_p3 = por %p7873_p1, %p7872_p0 }
  0x6f   : > { %p7875_p13 = pnand %p7874_p3, %p7868_p10 }
  0x71   : > { %7878 = shalt.err (!%p7875_p13)
}
  0x72   : > { %s7879_s27 = scalar_lea.vmem %s8260_s9, 4096  ;;  %s8026_s20 = smov [#allocation4]  }
  0x73   : > { %p7880_p7 = scmp.ne.s32.totalorder %s8260_s9, %s7879_s27  ;;  %s7884_s23 = sshll.u32 %s8026_s20, 4  ;;  %s7885_s23 = int_to_ptr.vmem [resolvable:$false] %s7884_s23 }
  0x74   : > { %s7886_s21 = scalar_lea.vmem %s7885_s23, 8192  ;;  %p7887_p5 = scmp.lt.s32.totalorder %s8260_s9, %s7885_s23 }
  0x75   : > { %p7882_p9 = pnand %p7880_p7, %p7866_p6  ;;  %p7888_p8 = scmp.lt.s32.totalorder %s7886_s21, %s7879_s27 }
  0x77   : > { %p7883_p11 = pneg %p7882_p9  ;;  %p7889_p12 = por %p7888_p8, %p7887_p5 }
  0x79   : > { %p7890_p2 = pnand %p7889_p12, %p7883_p11 }
  0x7b   : > { %7893 = shalt.err (!%p7890_p2)
}
  0x7c   : > { %s8027_s22 = smov 128   ;;  %s8028_s1 = smov 8  }
  0x7d   : > { %7248 = dma.hbm_to_vmem [thread:$0]  (!%p8256_p4), %s8242_s6, 4096, %s8260_s9, %s8262_s18, %s8027_s22, %s8027_s22, %s8028_s1  }
  0x7e   : > { %p10007_p6 = scmp.ne.s32.totalorder %s9999_s19, 0 }
  0x7f   : > { %s297_s17 = sand.u32 (!%p10007_p6), 1, %s7996_s28   ;;  %p10008_p10 = scmp.ne.s32.totalorder (!%p10007_p6), %s9994_s16, 0 }
  0x80   : > { %295 = sbr.rel (%p10007_p6) target bundleno = 1227 (0x4cb), region = 48  ;;  %s6008_s24 = sshll.u32 (!%p10007_p6), %s297_s17, 8 }
  0x81   : > { %s298_s12 = scalar_lea.sflag (!%p10007_p6), [#allocation5], %s297_s17  ;;  %s8293_s13 = scalar_lea.vmem (!%p10007_p6), [#allocation4], %s6008_s24 }
  0x87   : > { %7967 = dma.done.wait (%p10008_p10), %s298_s12, 4096  }
  0x88   : > { %7969 = vsyncadd (%p10008_p10), %s298_s12, 4294963200  ;;  %p10009_p0 = scmp.ne.s32.totalorder %s9993_s14, 0 }
  0x8a   : > { %7971 = dma.done.wait (%p10009_p0), [#allocation8], 18432  }
  0x8b   : > { %7973 = vsyncadd (%p10009_p0), [#allocation8], 4294948864  ;;  %s337_s9 = sand.u32 1, %s7984_s25   ;;  %p6013_p4 = scmp.ne.s32.totalorder %s8004_s30, 0 }
  0x8c   : > { %s6011_s19 = sshll.u32 %s337_s9, 7  ;;  %vm360_vm0 = vcmask (!%p6013_p4), 1040384   ;;  %vm361_vm1 = vsmask.f32 (!%p6013_p4), 256  ;;  %v369_v0 = vld [vmem:[#allocation2 + $0x18] sm:$0x1] (!%p6013_p4) }
  0x8d   : > { %s8306_s6 = scalar_lea.vmem [#allocation10], %s6011_s19  ;;  %346 = sbr.rel (%p6013_p4) target bundleno = 256 (0x100), region = 64  ;;  %v8029_v1 = vmov (!%p6013_p4), 0   ;;  %vm8313_vm2 = vmand (!%p6013_p4), %vm360_vm0, %vm361_vm1  ;;  %v372_v3 = vld [vmem:[#allocation2 + $0x24] sm:$0x1] (!%p6013_p4)  ;;  %v485_v49 = vld [vmem:[%s8293_s13] sm:$0xff] (!%p6013_p4) }
  0x8e   : > { %347 = vst [vmem:[#allocation2] sm:$0xf] (!%p6013_p4), %v8029_v1  ;;  %348 = vst [vmem:[#allocation2 + $0x4] sm:$0xf] (!%p6013_p4), %v8029_v1  ;;  %v375_v4 = vld [vmem:[#allocation2 + $0x30] sm:$0x1] (!%p6013_p4) }
  0x8f   : > { %349 = vst [vmem:[#allocation2 + $0x8] sm:$0x1] (!%p6013_p4), %v8029_v1  ;;  %350 = vst [vmem:[#allocation2 + $0xc] sm:$0xf] (!%p6013_p4), %v8029_v1  ;;  %vm423_vm3 = vsmask.f32 (!%p6013_p4), 7938 }
  0x90   : > { %351 = vst [vmem:[#allocation2 + $0x10] sm:$0xf] (!%p6013_p4), %v8029_v1  ;;  %352 = vst [vmem:[#allocation2 + $0x14] sm:$0x1] (!%p6013_p4), %v8029_v1  ;;  %v370_v5 = vsel (!%p6013_p4), %vm8313_vm2, 0, %v369_v0  ;;  %v373_v6 = vsel (!%p6013_p4), %vm8313_vm2, 0, %v372_v3 }
  0x91   : > { %354 = vst [vmem:[#allocation2 + $0xd8] sm:$0xf] (!%p6013_p4), %v8029_v1  ;;  %355 = vst [vmem:[#allocation2 + $0xdc] sm:$0xf] (!%p6013_p4), %v8029_v1  ;;  %v376_v7 = vsel (!%p6013_p4), %vm8313_vm2, 0, %v375_v4  ;;  %vm936_vm5 = vcmask (!%p6013_p4), 1043456  }
  0x92   : > { %356 = vst [vmem:[#allocation2 + $0xe0] sm:$0x1] (!%p6013_p4), %v8029_v1  ;;  %357 = vst [vmem:[#allocation2 + $0xe4] sm:$0xf] (!%p6013_p4), %v8029_v1  ;;  %v378_v8 = vld [vmem:[#allocation2 + $0x3c] sm:$0x1] (!%p6013_p4) }
  0x93   : > { %358 = vst [vmem:[#allocation2 + $0xe8] sm:$0xf] (!%p6013_p4), %v8029_v1  ;;  %359 = vst [vmem:[#allocation2 + $0xec] sm:$0x1] (!%p6013_p4), %v8029_v1  ;;  %v379_v9 = vsel (!%p6013_p4), %vm8313_vm2, 0, %v378_v8 }
  0x94   : > { %371 = vst [vmem:[#allocation2 + $0x18] sm:$0x1] %v370_v5  ;;  %374 = vst [vmem:[#allocation2 + $0x24] sm:$0x1] %v373_v6  ;;  %v381_v10 = vld [vmem:[#allocation2 + $0x48] sm:$0x1] }
  0x95   : > { %377 = vst [vmem:[#allocation2 + $0x30] sm:$0x1] %v376_v7  ;;  %v384_v11 = vld [vmem:[#allocation2 + $0x54] sm:$0x1]  ;;  %380 = vst [vmem:[#allocation2 + $0x3c] sm:$0x1] %v379_v9  ;;  %v6509_v7 = vpack.c.bf16 %v485_v49, %v485_v49 }
  0x96   : > { %v382_v12 = vsel %vm8313_vm2, 0, %v381_v10  ;;  %v385_v13 = vsel %vm8313_vm2, 0, %v384_v11  ;;  %v387_v14 = vld [vmem:[#allocation2 + $0x60] sm:$0x1]  ;;  %v390_v15 = vld [vmem:[#allocation2 + $0x6c] sm:$0x1]  ;;  %vm8343_vm4 = vmand %vm360_vm0, %vm423_vm3 }
  0x97   : > { %383 = vst [vmem:[#allocation2 + $0x48] sm:$0x1] %v382_v12  ;;  %386 = vst [vmem:[#allocation2 + $0x54] sm:$0x1] %v385_v13  ;;  %v388_v16 = vsel %vm8313_vm2, 0, %v387_v14  ;;  %v391_v17 = vsel %vm8313_vm2, 0, %v390_v15 }
  0x98   : > { %v393_v18 = vld [vmem:[#allocation2 + $0x78] sm:$0x1]  ;;  %v396_v19 = vld [vmem:[#allocation2 + $0x84] sm:$0x1]  ;;  %389 = vst [vmem:[#allocation2 + $0x60] sm:$0x1] %v388_v16  ;;  %vm8409_vm6 = vmand %vm936_vm5, %vm423_vm3 }
  0x99   : > { %392 = vst [vmem:[#allocation2 + $0x6c] sm:$0x1] %v391_v17  ;;  %v394_v20 = vsel %vm8313_vm2, 0, %v393_v18  ;;  %v397_v21 = vsel %vm8313_vm2, 0, %v396_v19  ;;  %v399_v22 = vld [vmem:[#allocation2 + $0x90] sm:$0x1] }
  0x9a   : > { %v402_v23 = vld [vmem:[#allocation2 + $0x9c] sm:$0x1]  ;;  %395 = vst [vmem:[#allocation2 + $0x78] sm:$0x1] %v394_v20  ;;  %398 = vst [vmem:[#allocation2 + $0x84] sm:$0x1] %v397_v21 }
  0x9b   : > { %v400_v24 = vsel %vm8313_vm2, 0, %v399_v22  ;;  %v403_v25 = vsel %vm8313_vm2, 0, %v402_v23  ;;  %v405_v26 = vld [vmem:[#allocation2 + $0xa8] sm:$0x1]  ;;  %v408_v27 = vld [vmem:[#allocation2 + $0xb4] sm:$0x1] }
  0x9c   : > { %401 = vst [vmem:[#allocation2 + $0x90] sm:$0x1] %v400_v24  ;;  %404 = vst [vmem:[#allocation2 + $0x9c] sm:$0x1] %v403_v25  ;;  %v406_v29 = vsel %vm8313_vm2, 0, %v405_v26  ;;  %v409_v30 = vsel %vm8313_vm2, 0, %v408_v27 }
  0x9d   : > { %v411_v31 = vld [vmem:[#allocation2 + $0xc0] sm:$0x1]  ;;  %v414_v32 = vld [vmem:[#allocation2 + $0xcc] sm:$0x1]  ;;  %407 = vst [vmem:[#allocation2 + $0xa8] sm:$0x1] %v406_v29 }
  0x9e   : > { %410 = vst [vmem:[#allocation2 + $0xb4] sm:$0x1] %v409_v30  ;;  %v412_v33 = vsel %vm8313_vm2, 0, %v411_v31  ;;  %v415_v34 = vsel %vm8313_vm2, 0, %v414_v32  ;;  %v431_v35 = vld [vmem:[#allocation2 + $0x20] sm:$0x1] }
  0x9f   : > { %v434_v36 = vld [vmem:[#allocation2 + $0x2c] sm:$0x1]  ;;  %413 = vst [vmem:[#allocation2 + $0xc0] sm:$0x1] %v412_v33  ;;  %416 = vst [vmem:[#allocation2 + $0xcc] sm:$0x1] %v415_v34 }
  0xa0   : > { %v432_v37 = vsel %vm8343_vm4, 0, %v431_v35  ;;  %v435_v38 = vsel %vm8343_vm4, 0, %v434_v36  ;;  %v437_v39 = vld [vmem:[#allocation2 + $0x38] sm:$0x1]  ;;  %v440_v40 = vld [vmem:[#allocation2 + $0x44] sm:$0x1] }
  0xa1   : > { %433 = vst [vmem:[#allocation2 + $0x20] sm:$0x1] %v432_v37  ;;  %436 = vst [vmem:[#allocation2 + $0x2c] sm:$0x1] %v435_v38  ;;  %v438_v41 = vsel %vm8343_vm4, 0, %v437_v39  ;;  %v441_v42 = vsel %vm8343_vm4, 0, %v440_v40 }
  0xa2   : > { %v443_v43 = vld [vmem:[#allocation2 + $0x50] sm:$0x1]  ;;  %v446_v44 = vld [vmem:[#allocation2 + $0x5c] sm:$0x1]  ;;  %439 = vst [vmem:[#allocation2 + $0x38] sm:$0x1] %v438_v41 }
  0xa3   : > { %442 = vst [vmem:[#allocation2 + $0x44] sm:$0x1] %v441_v42  ;;  %v444_v45 = vsel %vm8343_vm4, 0, %v443_v43  ;;  %v447_v46 = vsel %vm8343_vm4, 0, %v446_v44  ;;  %v449_v47 = vld [vmem:[#allocation2 + $0x68] sm:$0x1] }
  0xa4   : > { %v452_v48 = vld [vmem:[#allocation2 + $0x74] sm:$0x1]  ;;  %445 = vst [vmem:[#allocation2 + $0x50] sm:$0x1] %v444_v45  ;;  %448 = vst [vmem:[#allocation2 + $0x5c] sm:$0x1] %v447_v46 }
  0xa5   : > { %v450_v50 = vsel %vm8343_vm4, 0, %v449_v47  ;;  %v453_v51 = vsel %vm8343_vm4, 0, %v452_v48  ;;  %v455_v52 = vld [vmem:[#allocation2 + $0x80] sm:$0x1]  ;;  %v458_v53 = vld [vmem:[#allocation2 + $0x8c] sm:$0x1] }
  0xa6   : > { %451 = vst [vmem:[#allocation2 + $0x68] sm:$0x1] %v450_v50  ;;  %454 = vst [vmem:[#allocation2 + $0x74] sm:$0x1] %v453_v51  ;;  %v456_v54 = vsel %vm8343_vm4, 0, %v455_v52  ;;  %v459_v55 = vsel %vm8343_vm4, 0, %v458_v53 }
  0xa7   : > { %v461_v56 = vld [vmem:[#allocation2 + $0x98] sm:$0x1]  ;;  %v464_v57 = vld [vmem:[#allocation2 + $0xa4] sm:$0x1]  ;;  %457 = vst [vmem:[#allocation2 + $0x80] sm:$0x1] %v456_v54 }
  0xa8   : > { %460 = vst [vmem:[#allocation2 + $0x8c] sm:$0x1] %v459_v55  ;;  %v462_v58 = vsel %vm8343_vm4, 0, %v461_v56  ;;  %v465_v59 = vsel %vm8343_vm4, 0, %v464_v57  ;;  %v467_v60 = vld [vmem:[#allocation2 + $0xb0] sm:$0x1] }
  0xa9   : > { %v470_v61 = vld [vmem:[#allocation2 + $0xbc] sm:$0x1]  ;;  %463 = vst [vmem:[#allocation2 + $0x98] sm:$0x1] %v462_v58  ;;  %466 = vst [vmem:[#allocation2 + $0xa4] sm:$0x1] %v465_v59 }
  0xaa   : > { %v468_v62 = vsel %vm8343_vm4, 0, %v467_v60  ;;  %v471_v63 = vsel %vm8343_vm4, 0, %v470_v61  ;;  %v473_v0 = vld [vmem:[#allocation2 + $0xc8] sm:$0x1]  ;;  %v476_v1 = vld [vmem:[#allocation2 + $0xd4] sm:$0x1] }
  0xab   : > { %469 = vst [vmem:[#allocation2 + $0xb0] sm:$0x1] %v468_v62  ;;  %472 = vst [vmem:[#allocation2 + $0xbc] sm:$0x1] %v471_v63  ;;  %v474_v3 = vsel %vm8343_vm4, 0, %v473_v0  ;;  %v477_v4 = vsel %vm8343_vm4, 0, %v476_v1 }
  0xac   : > { %v363_v5 = vld [vmem:[#allocation2] sm:$0x1]  ;;  %v366_v6 = vld [vmem:[#allocation2 + $0xc] sm:$0x1]  ;;  %475 = vst [vmem:[#allocation2 + $0xc8] sm:$0x1] %v474_v3 }
  0xad   : > { %478 = vst [vmem:[#allocation2 + $0xd4] sm:$0x1] %v477_v4  ;;  %v364_v8 = vsel %vm8313_vm2, 0, %v363_v5  ;;  %v367_v9 = vsel %vm8313_vm2, 0, %v366_v6  ;;  %v417_v10 = vld [vmem:[#allocation2 + $0xd8] sm:$0x1] }
  0xae   : > { %v420_v11 = vld [vmem:[#allocation2 + $0xe4] sm:$0x1]  ;;  %365 = vst [vmem:[#allocation2] sm:$0x1] %v364_v8  ;;  %368 = vst [vmem:[#allocation2 + $0xc] sm:$0x1] %v367_v9 }
  0xaf   : > { %v418_v12 = vsel %vm8313_vm2, 0, %v417_v10  ;;  %v421_v13 = vsel %vm8313_vm2, 0, %v420_v11  ;;  %v425_v14 = vld [vmem:[#allocation2 + $0x8] sm:$0x1]  ;;  %v428_v15 = vld [vmem:[#allocation2 + $0x14] sm:$0x1] }
  0xb0   : > { %419 = vst [vmem:[#allocation2 + $0xd8] sm:$0x1] %v418_v12  ;;  %422 = vst [vmem:[#allocation2 + $0xe4] sm:$0x1] %v421_v13  ;;  %v426_v16 = vsel %vm8343_vm4, 0, %v425_v14  ;;  %v429_v17 = vsel %vm8343_vm4, 0, %v428_v15 }
  0xb1   : > { %v479_v18 = vld [vmem:[#allocation2 + $0xe0] sm:$0x1]  ;;  %v482_v19 = vld [vmem:[#allocation2 + $0xec] sm:$0x1]  ;;  %427 = vst [vmem:[#allocation2 + $0x8] sm:$0x1] %v426_v16 }
  0xb2   : > { %430 = vst [vmem:[#allocation2 + $0x14] sm:$0x1] %v429_v17  ;;  %v480_v20 = vsel %vm8343_vm4, 0, %v479_v18  ;;  %v483_v21 = vsel %vm8343_vm4, 0, %v482_v19  ;;  %v616_v22 = vshrl.u32 %v6509_v7, 16  ;;  %v619_v23 = vshll.u32 %v6509_v7, 16 }
  0xb3   : > { %481 = vst [vmem:[#allocation2 + $0xe0] sm:$0x1] %v480_v20  ;;  %484 = vst [vmem:[#allocation2 + $0xec] sm:$0x1] %v483_v21  ;;  %v486_v24 = vld [vmem:[%s8293_s13 + $0x8] sm:$0xff]  ;;  %v487_v25 = vld [vmem:[%s8293_s13 + $0x10] sm:$0xff] }
  0xb4   : > { %v618_v26 = vrot.slane %v616_v22, 7  ;;  %v6510_v27 = vpack.c.bf16 %v486_v24, %v486_v24  ;;  %v6511_v29 = vpack.c.bf16 %v487_v25, %v487_v25  ;;  %v488_v30 = vld [vmem:[%s8293_s13 + $0x18] sm:$0xff]  ;;  %v938_v32 = vld [vmem:[#allocation2 + $0x18] sm:$0xf]  ;;  %vm613_vm7 = vsmask.f32 4368 }
  0xb5   : > { %v6512_v33 = vpack.c.bf16 %v488_v30, %v488_v30  ;;  %v489_v34 = vld [vmem:[%s8293_s13 + $0x20] sm:$0xff]  ;;  %v490_v39 = vld [vmem:[%s8293_s13 + $0x28] sm:$0xff]  ;;  %v491_v44 = vld [vmem:[%s8293_s13 + $0x30] sm:$0xff] }
  0xb6   : > { %v621_v35 = vor.u32 %v619_v23, %v618_v26  ;;  %v622_v36 = vrot.slane %v618_v26, 4  ;;  %v624_v37 = vshrl.u32 %v6510_v27, 16  ;;  %v627_v38 = vshll.u32 %v6510_v27, 16  ;;  %v492_v45 = vld [vmem:[%s8293_s13 + $0x38] sm:$0xff]  ;;  %vm8421_vm8 = vmor %vm361_vm1, %vm613_vm7  ;;  %v949_v59 = vld [vmem:[#allocation2 + $0x2c] sm:$0x1] }
  0xb7   : > { %v633_v40 = vshrl.u32 %v6511_v29, 16  ;;  %v636_v41 = vshll.u32 %v6511_v29, 16  ;;  %v641_v42 = vshrl.u32 %v6512_v33, 16  ;;  %v644_v43 = vshll.u32 %v6512_v33, 16  ;;  %v942_v51 = vld [vmem:[#allocation2 + $0x20] sm:$0x1] }
  0xb8   : > { %v939_v46 = vsel %vm8409_vm6, %v621_v35, %v938_v32  ;;  %v626_v47 = vrot.slane %v624_v37, 7  ;;  %v6513_v48 = vpack.c.bf16 %v489_v34, %v489_v34  ;;  %v6514_v49 = vpack.c.bf16 %v490_v39, %v490_v39  ;;  %v945_v53 = vld [vmem:[#allocation2 + $0x24] sm:$0xf]  ;;  %v493_v7 = vld [vmem:[%s8293_s13 + $0x40] sm:$0xff]  ;;  %v952_v11 = vld [vmem:[#allocation2 + $0x30] sm:$0xf] }
  0xb9   : > { %940 = vst [vmem:[#allocation2 + $0x18] sm:$0xf] %v939_v46  ;;  %v635_v52 = vrot.slane %v633_v40, 7  ;;  %v643_v54 = vrot.slane %v641_v42, 7  ;;  %v6515_v55 = vpack.c.bf16 %v491_v44, %v491_v44  ;;  %v6516_v56 = vpack.c.bf16 %v492_v45, %v492_v45  ;;  %v494_v17 = vld [vmem:[%s8293_s13 + $0x48] sm:$0xff]  ;;  %v495_v34 = vld [vmem:[%s8293_s13 + $0x50] sm:$0xff] }
  0xba   : > { %v629_v57 = vor.u32 %v627_v38, %v626_v47  ;;  %v631_v58 = vrot.slane %v626_v47, 4  ;;  %v650_v60 = vshrl.u32 %v6513_v48, 16  ;;  %v653_v61 = vshll.u32 %v6513_v48, 16  ;;  %v956_v18 = vld [vmem:[#allocation2 + $0x38] sm:$0x1]  ;;  %v496_v35 = vld [vmem:[%s8293_s13 + $0x58] sm:$0xff] }
  0xbb   : > { %v638_v62 = vor.u32 %v636_v41, %v635_v52  ;;  %v639_v63 = vrot.slane %v635_v52, 4  ;;  %v646_v0 = vor.u32 %v644_v43, %v643_v54  ;;  %v648_v1 = vrot.slane %v643_v54, 4  ;;  %v959_v27 = vld [vmem:[#allocation2 + $0x3c] sm:$0xf]  ;;  %v963_v40 = vld [vmem:[#allocation2 + $0x44] sm:$0x1] }
  0xbc   : > { %v630_v3 = vsel %vm8421_vm8, %v622_v36, %v629_v57  ;;  %v943_v4 = vsel %vm8313_vm2, %v631_v58, %v942_v51  ;;  %v652_v5 = vrot.slane %v650_v60, 7  ;;  %v658_v6 = vshrl.u32 %v6514_v49, 16  ;;  %v966_v46 = vld [vmem:[#allocation2 + $0x48] sm:$0xf]  ;;  %v498_v52 = vld [vmem:[%s8293_s13 + $0x68] sm:$0xff] }
  0xbd   : > { %941 = vst [vmem:[#allocation2 + $0x1c] sm:$0xf] %v630_v3  ;;  %944 = vst [vmem:[#allocation2 + $0x20] sm:$0x1] %v943_v4  ;;  %v946_v8 = vsel %vm8409_vm6, %v638_v62, %v945_v53  ;;  %v647_v9 = vsel %vm8421_vm8, %v639_v63, %v646_v0  ;;  %v950_v10 = vsel %vm8313_vm2, %v648_v1, %v949_v59  ;;  %v661_v12 = vshll.u32 %v6514_v49, 16  ;;  %v497_v51 = vld [vmem:[%s8293_s13 + $0x60] sm:$0xff] }
  0xbe   : > { %947 = vst [vmem:[#allocation2 + $0x24] sm:$0xf] %v946_v8  ;;  %948 = vst [vmem:[#allocation2 + $0x28] sm:$0xf] %v647_v9  ;;  %v655_v13 = vor.u32 %v653_v61, %v652_v5  ;;  %v656_v14 = vrot.slane %v652_v5, 4  ;;  %v660_v15 = vrot.slane %v658_v6, 7  ;;  %v6517_v22 = vpack.c.bf16 %v493_v7, %v493_v7 }
  0xbf   : > { %951 = vst [vmem:[#allocation2 + $0x2c] sm:$0x1] %v950_v10  ;;  %v667_v16 = vshrl.u32 %v6515_v55, 16  ;;  %v670_v19 = vshll.u32 %v6515_v55, 16  ;;  %v675_v20 = vshrl.u32 %v6516_v56, 16  ;;  %v678_v21 = vshll.u32 %v6516_v56, 16 }
  0xc0   : > { %v953_v23 = vsel %vm8409_vm6, %v655_v13, %v952_v11  ;;  %v663_v24 = vor.u32 %v661_v12, %v660_v15  ;;  %v665_v25 = vrot.slane %v660_v15, 4  ;;  %v684_v30 = vshrl.u32 %v6517_v22, 16  ;;  %v970_v62 = vld [vmem:[#allocation2 + $0x50] sm:$0x1]  ;;  %v973_v6 = vld [vmem:[#allocation2 + $0x54] sm:$0xf] }
  0xc1   : > { %v669_v26 = vrot.slane %v667_v16, 7  ;;  %954 = vst [vmem:[#allocation2 + $0x30] sm:$0xf] %v953_v23  ;;  %v677_v29 = vrot.slane %v675_v20, 7  ;;  %v687_v32 = vshll.u32 %v6517_v22, 16  ;;  %v6518_v33 = vpack.c.bf16 %v494_v17, %v494_v17  ;;  %v499_v8 = vld [vmem:[%s8293_s13 + $0x70] sm:$0xff] }
  0xc2   : > { %v664_v36 = vsel %vm8421_vm8, %v656_v14, %v663_v24  ;;  %v957_v37 = vsel %vm8313_vm2, %v665_v25, %v956_v18  ;;  %v686_v43 = vrot.slane %v684_v30, 7  ;;  %v6519_v48 = vpack.c.bf16 %v495_v34, %v495_v34  ;;  %v500_v13 = vld [vmem:[%s8293_s13 + $0x78] sm:$0xff]  ;;  %v501_v14 = vld [vmem:[%s8293_s13 + $0x80] sm:$0xff] }
  0xc3   : > { %v672_v38 = vor.u32 %v670_v19, %v669_v26  ;;  %v673_v39 = vrot.slane %v669_v26, 4  ;;  %955 = vst [vmem:[#allocation2 + $0x34] sm:$0xf] %v664_v36  ;;  %958 = vst [vmem:[#allocation2 + $0x38] sm:$0x1] %v957_v37  ;;  %v680_v41 = vor.u32 %v678_v21, %v677_v29  ;;  %v682_v42 = vrot.slane %v677_v29, 4 }
  0xc4   : > { %v692_v44 = vshrl.u32 %v6518_v33, 16  ;;  %v695_v47 = vshll.u32 %v6518_v33, 16  ;;  %v6520_v49 = vpack.c.bf16 %v496_v35, %v496_v35  ;;  %v689_v55 = vor.u32 %v687_v32, %v686_v43  ;;  %v977_v19 = vld [vmem:[#allocation2 + $0x5c] sm:$0x1]  ;;  %v980_v25 = vld [vmem:[#allocation2 + $0x60] sm:$0xf] }
  0xc5   : > { %v960_v45 = vsel %vm8409_vm6, %v672_v38, %v959_v27  ;;  %v681_v53 = vsel %vm8421_vm8, %v673_v39, %v680_v41  ;;  %v964_v54 = vsel %vm8313_vm2, %v682_v42, %v963_v40  ;;  %v690_v56 = vrot.slane %v686_v43, 4  ;;  %v984_v35 = vld [vmem:[#allocation2 + $0x68] sm:$0x1]  ;;  %v502_v40 = vld [vmem:[%s8293_s13 + $0x88] sm:$0xff]  ;;  %v503_v41 = vld [vmem:[%s8293_s13 + $0x90] sm:$0xff] }
  0xc6   : > { %961 = vst [vmem:[#allocation2 + $0x3c] sm:$0xf] %v960_v45  ;;  %962 = vst [vmem:[#allocation2 + $0x40] sm:$0xf] %v681_v53  ;;  %v694_v57 = vrot.slane %v692_v44, 7  ;;  %v701_v58 = vshrl.u32 %v6519_v48, 16  ;;  %v967_v61 = vsel %vm8409_vm6, %v689_v55, %v966_v46  ;;  %v6521_v0 = vpack.c.bf16 %v497_v51, %v497_v51 }
  0xc7   : > { %965 = vst [vmem:[#allocation2 + $0x44] sm:$0x1] %v964_v54  ;;  %v704_v59 = vshll.u32 %v6519_v48, 16  ;;  %v709_v60 = vshrl.u32 %v6520_v49, 16  ;;  %v712_v63 = vshll.u32 %v6520_v49, 16  ;;  %v6522_v1 = vpack.c.bf16 %v498_v52, %v498_v52  ;;  %v504_v46 = vld [vmem:[%s8293_s13 + $0x98] sm:$0xff] }
  0xc8   : > { %968 = vst [vmem:[#allocation2 + $0x48] sm:$0xf] %v967_v61  ;;  %v697_v3 = vor.u32 %v695_v47, %v694_v57  ;;  %v699_v4 = vrot.slane %v694_v57, 4  ;;  %v703_v5 = vrot.slane %v701_v58, 7  ;;  %v718_v9 = vshrl.u32 %v6521_v0, 16  ;;  %v505_v47 = vld [vmem:[%s8293_s13 + $0xa0] sm:$0xff] }
  0xc9   : > { %v711_v7 = vrot.slane %v709_v60, 7  ;;  %v721_v10 = vshll.u32 %v6521_v0, 16  ;;  %v726_v11 = vshrl.u32 %v6522_v1, 16  ;;  %v729_v12 = vshll.u32 %v6522_v1, 16  ;;  %v987_v53 = vld [vmem:[#allocation2 + $0x6c] sm:$0xf] }
  0xca   : > { %v698_v15 = vsel %vm8421_vm8, %v690_v56, %v697_v3  ;;  %v971_v16 = vsel %vm8313_vm2, %v699_v4, %v970_v62  ;;  %v706_v17 = vor.u32 %v704_v59, %v703_v5  ;;  %v707_v18 = vrot.slane %v703_v5, 4  ;;  %v991_v60 = vld [vmem:[#allocation2 + $0x74] sm:$0x1]  ;;  %v994_v61 = vld [vmem:[#allocation2 + $0x78] sm:$0xf] }
  0xcb   : > { %969 = vst [vmem:[#allocation2 + $0x4c] sm:$0xf] %v698_v15  ;;  %972 = vst [vmem:[#allocation2 + $0x50] sm:$0x1] %v971_v16  ;;  %v714_v20 = vor.u32 %v712_v63, %v711_v7  ;;  %v716_v21 = vrot.slane %v711_v7, 4  ;;  %v720_v22 = vrot.slane %v718_v9, 7  ;;  %v6523_v26 = vpack.c.bf16 %v499_v8, %v499_v8 }
  0xcc   : > { %v728_v23 = vrot.slane %v726_v11, 7  ;;  %v974_v24 = vsel %vm8409_vm6, %v706_v17, %v973_v6  ;;  %v6524_v27 = vpack.c.bf16 %v500_v13, %v500_v13  ;;  %v6525_v29 = vpack.c.bf16 %v501_v14, %v501_v14  ;;  %v506_v9 = vld [vmem:[%s8293_s13 + $0xa8] sm:$0xff] }
  0xcd   : > { %975 = vst [vmem:[#allocation2 + $0x54] sm:$0xf] %v974_v24  ;;  %v715_v30 = vsel %vm8421_vm8, %v707_v18, %v714_v20  ;;  %v978_v32 = vsel %vm8313_vm2, %v716_v21, %v977_v19  ;;  %v723_v33 = vor.u32 %v721_v10, %v720_v22  ;;  %v724_v34 = vrot.slane %v720_v22, 4  ;;  %v507_v10 = vld [vmem:[%s8293_s13 + $0xb0] sm:$0xff]  ;;  %v998_v19 = vld [vmem:[#allocation2 + $0x80] sm:$0x1] }
  0xce   : > { %976 = vst [vmem:[#allocation2 + $0x58] sm:$0xf] %v715_v30  ;;  %979 = vst [vmem:[#allocation2 + $0x5c] sm:$0x1] %v978_v32  ;;  %v731_v36 = vor.u32 %v729_v12, %v728_v23  ;;  %v733_v37 = vrot.slane %v728_v23, 4  ;;  %v735_v38 = vshrl.u32 %v6523_v26, 16  ;;  %v6526_v56 = vpack.c.bf16 %v502_v40, %v502_v40 }
  0xcf   : > { %v738_v39 = vshll.u32 %v6523_v26, 16  ;;  %v981_v42 = vsel %vm8409_vm6, %v723_v33, %v980_v25  ;;  %v743_v43 = vshrl.u32 %v6524_v27, 16  ;;  %v746_v44 = vshll.u32 %v6524_v27, 16  ;;  %v1001_v20 = vld [vmem:[#allocation2 + $0x84] sm:$0xf] }
  0xd0   : > { %v752_v45 = vshrl.u32 %v6525_v29, 16  ;;  %982 = vst [vmem:[#allocation2 + $0x60] sm:$0xf] %v981_v42  ;;  %v732_v48 = vsel %vm8421_vm8, %v724_v34, %v731_v36  ;;  %v985_v49 = vsel %vm8313_vm2, %v733_v37, %v984_v35  ;;  %v737_v51 = vrot.slane %v735_v38, 7  ;;  %v508_v35 = vld [vmem:[%s8293_s13 + $0xb8] sm:$0xff]  ;;  %v509_v42 = vld [vmem:[%s8293_s13 + $0xc0] sm:$0xff] }
  0xd1   : > { %v755_v52 = vshll.u32 %v6525_v29, 16  ;;  %983 = vst [vmem:[#allocation2 + $0x64] sm:$0xf] %v732_v48  ;;  %986 = vst [vmem:[#allocation2 + $0x68] sm:$0x1] %v985_v49  ;;  %v745_v54 = vrot.slane %v743_v43, 7  ;;  %v6527_v57 = vpack.c.bf16 %v503_v41, %v503_v41  ;;  %v6528_v62 = vpack.c.bf16 %v504_v46, %v504_v46 }
  0xd2   : > { %v754_v55 = vrot.slane %v752_v45, 7  ;;  %v740_v58 = vor.u32 %v738_v39, %v737_v51  ;;  %v741_v59 = vrot.slane %v737_v51, 4  ;;  %v6529_v63 = vpack.c.bf16 %v505_v47, %v505_v47  ;;  %v1005_v39 = vld [vmem:[#allocation2 + $0x8c] sm:$0x1]  ;;  %v1008_v40 = vld [vmem:[#allocation2 + $0x90] sm:$0xf] }
  0xd3   : > { %v748_v0 = vor.u32 %v746_v44, %v745_v54  ;;  %v750_v1 = vrot.slane %v745_v54, 4  ;;  %v760_v6 = vshrl.u32 %v6526_v56, 16  ;;  %v763_v7 = vshll.u32 %v6526_v56, 16  ;;  %v1015_v56 = vld [vmem:[#allocation2 + $0x9c] sm:$0xf] }
  0xd4   : > { %v757_v3 = vor.u32 %v755_v52, %v754_v55  ;;  %v758_v4 = vrot.slane %v754_v55, 4  ;;  %v988_v5 = vsel %vm8409_vm6, %v740_v58, %v987_v53  ;;  %v769_v8 = vshrl.u32 %v6527_v57, 16  ;;  %v1012_v55 = vld [vmem:[#allocation2 + $0x98] sm:$0x1]  ;;  %v510_v58 = vld [vmem:[%s8293_s13 + $0xc8] sm:$0xff] }
  0xd5   : > { %989 = vst [vmem:[#allocation2 + $0x6c] sm:$0xf] %v988_v5  ;;  %v749_v11 = vsel %vm8421_vm8, %v741_v59, %v748_v0  ;;  %v992_v12 = vsel %vm8313_vm2, %v750_v1, %v991_v60  ;;  %v772_v14 = vshll.u32 %v6527_v57, 16  ;;  %v762_v15 = vrot.slane %v760_v6, 7  ;;  %v512_v0 = vld [vmem:[%s8293_s13 + $0xd8] sm:$0xff]  ;;  %v513_v6 = vld [vmem:[%s8293_s13 + $0xe0] sm:$0xff] }
  0xd6   : > { %v995_v13 = vsel %vm8409_vm6, %v757_v3, %v994_v61  ;;  %990 = vst [vmem:[#allocation2 + $0x70] sm:$0xf] %v749_v11  ;;  %993 = vst [vmem:[#allocation2 + $0x74] sm:$0x1] %v992_v12  ;;  %v771_v16 = vrot.slane %v769_v8, 7  ;;  %v777_v17 = vshrl.u32 %v6528_v62, 16  ;;  %v6530_v23 = vpack.c.bf16 %v506_v9, %v506_v9 }
  0xd7   : > { %996 = vst [vmem:[#allocation2 + $0x78] sm:$0xf] %v995_v13  ;;  %v780_v18 = vshll.u32 %v6528_v62, 16  ;;  %v786_v21 = vshrl.u32 %v6529_v63, 16  ;;  %v789_v22 = vshll.u32 %v6529_v63, 16  ;;  %v6531_v24 = vpack.c.bf16 %v507_v10, %v507_v10  ;;  %v511_v63 = vld [vmem:[%s8293_s13 + $0xd0] sm:$0xff] }
  0xd8   : > { %v765_v25 = vor.u32 %v763_v7, %v762_v15  ;;  %v767_v26 = vrot.slane %v762_v15, 4  ;;  %v774_v27 = vor.u32 %v772_v14, %v771_v16  ;;  %v775_v29 = vrot.slane %v771_v16, 4  ;;  %v514_v7 = vld [vmem:[%s8293_s13 + $0xe8] sm:$0xff]  ;;  %v1019_v16 = vld [vmem:[#allocation2 + $0xa4] sm:$0x1] }
  0xd9   : > { %v779_v30 = vrot.slane %v777_v17, 7  ;;  %v788_v32 = vrot.slane %v786_v21, 7  ;;  %v794_v33 = vshrl.u32 %v6530_v23, 16  ;;  %v797_v34 = vshll.u32 %v6530_v23, 16  ;;  %v1022_v17 = vld [vmem:[#allocation2 + $0xa8] sm:$0xf] }
  0xda   : > { %v766_v36 = vsel %vm8421_vm8, %v758_v4, %v765_v25  ;;  %v999_v37 = vsel %vm8313_vm2, %v767_v26, %v998_v19  ;;  %v1002_v38 = vsel %vm8409_vm6, %v774_v27, %v1001_v20  ;;  %v803_v41 = vshrl.u32 %v6531_v24, 16 }
  0xdb   : > { %997 = vst [vmem:[#allocation2 + $0x7c] sm:$0xf] %v766_v36  ;;  %1000 = vst [vmem:[#allocation2 + $0x80] sm:$0x1] %v999_v37  ;;  %v782_v43 = vor.u32 %v780_v18, %v779_v30  ;;  %v784_v44 = vrot.slane %v779_v30, 4  ;;  %v791_v45 = vor.u32 %v789_v22, %v788_v32  ;;  %v792_v46 = vrot.slane %v788_v32, 4 }
  0xdc   : > { %1003 = vst [vmem:[#allocation2 + $0x84] sm:$0xf] %v1002_v38  ;;  %v796_v47 = vrot.slane %v794_v33, 7  ;;  %v805_v48 = vrot.slane %v803_v41, 7  ;;  %v806_v49 = vshll.u32 %v6531_v24, 16  ;;  %v6532_v51 = vpack.c.bf16 %v508_v35, %v508_v35 }
  0xdd   : > { %v783_v52 = vsel %vm8421_vm8, %v775_v29, %v782_v43  ;;  %v1006_v53 = vsel %vm8313_vm2, %v784_v44, %v1005_v39  ;;  %v1009_v54 = vsel %vm8409_vm6, %v791_v45, %v1008_v40  ;;  %v6533_v57 = vpack.c.bf16 %v509_v42, %v509_v42  ;;  %v1026_v35 = vld [vmem:[#allocation2 + $0xb0] sm:$0x1]  ;;  %v1029_v36 = vld [vmem:[#allocation2 + $0xb4] sm:$0xf]  ;;  %v1033_v42 = vld [vmem:[#allocation2 + $0xbc] sm:$0x1] }
  0xde   : > { %1004 = vst [vmem:[#allocation2 + $0x88] sm:$0xf] %v783_v52  ;;  %1007 = vst [vmem:[#allocation2 + $0x8c] sm:$0x1] %v1006_v53  ;;  %v799_v59 = vor.u32 %v797_v34, %v796_v47  ;;  %v801_v60 = vrot.slane %v796_v47, 4  ;;  %v808_v61 = vor.u32 %v806_v49, %v805_v48  ;;  %v809_v62 = vrot.slane %v805_v48, 4 }
  0xdf   : > { %1010 = vst [vmem:[#allocation2 + $0x90] sm:$0xf] %v1009_v54  ;;  %v811_v1 = vshrl.u32 %v6532_v51, 16  ;;  %v814_v3 = vshll.u32 %v6532_v51, 16  ;;  %v820_v4 = vshrl.u32 %v6533_v57, 16  ;;  %v823_v5 = vshll.u32 %v6533_v57, 16 }
  0xe0   : > { %v800_v8 = vsel %vm8421_vm8, %v792_v46, %v799_v59  ;;  %v1013_v9 = vsel %vm8313_vm2, %v801_v60, %v1012_v55  ;;  %v1016_v10 = vsel %vm8409_vm6, %v808_v61, %v1015_v56  ;;  %v6534_v11 = vpack.c.bf16 %v510_v58, %v510_v58  ;;  %v515_v43 = vld [vmem:[%s8293_s13 + $0xf0] sm:$0xff]  ;;  %v516_v44 = vld [vmem:[%s8293_s13 + $0xf8] sm:$0xff]  ;;  %v1050_v49 = vld [vmem:[#allocation3] sm:$0x1] }
  0xe1   : > { %1011 = vst [vmem:[#allocation2 + $0x94] sm:$0xf] %v800_v8  ;;  %1014 = vst [vmem:[#allocation2 + $0x98] sm:$0x1] %v1013_v9  ;;  %v813_v12 = vrot.slane %v811_v1, 7  ;;  %v822_v13 = vrot.slane %v820_v4, 7  ;;  %v6535_v14 = vpack.c.bf16 %v511_v63, %v511_v63  ;;  %v6536_v15 = vpack.c.bf16 %v512_v0, %v512_v0 }
  0xe2   : > { %1017 = vst [vmem:[#allocation2 + $0x9c] sm:$0xf] %v1016_v10  ;;  %v828_v18 = vshrl.u32 %v6534_v11, 16  ;;  %v831_v19 = vshll.u32 %v6534_v11, 16  ;;  %v6537_v20 = vpack.c.bf16 %v513_v6, %v513_v6  ;;  %v6538_v21 = vpack.c.bf16 %v514_v7, %v514_v7  ;;  %v1036_v55 = vld [vmem:[#allocation2 + $0xc0] sm:$0xf] }
  0xe3   : > { %v816_v22 = vor.u32 %v814_v3, %v813_v12  ;;  %v818_v23 = vrot.slane %v813_v12, 4  ;;  %v825_v24 = vor.u32 %v823_v5, %v822_v13  ;;  %v826_v25 = vrot.slane %v822_v13, 4  ;;  %v1053_v56 = vld [vmem:[#allocation3 + $0xc] sm:$0x1]  ;;  %v1040_v61 = vld [vmem:[#allocation2 + $0xc8] sm:$0x1] }
  0xe4   : > { %v830_v26 = vrot.slane %v828_v18, 7  ;;  %v837_v27 = vshrl.u32 %v6535_v14, 16  ;;  %v840_v29 = vshll.u32 %v6535_v14, 16  ;;  %v845_v30 = vshrl.u32 %v6536_v15, 16  ;;  %v1059_v4 = vld [vmem:[#allocation3 + $0x24] sm:$0x1] }
  0xe5   : > { %v817_v32 = vsel %vm8421_vm8, %v809_v62, %v816_v22  ;;  %v1020_v33 = vsel %vm8313_vm2, %v818_v23, %v1019_v16  ;;  %v1023_v34 = vsel %vm8409_vm6, %v825_v24, %v1022_v17  ;;  %v848_v37 = vshll.u32 %v6536_v15, 16  ;;  %v1056_v62 = vld [vmem:[#allocation3 + $0x18] sm:$0x1]  ;;  %v1062_v5 = vld [vmem:[#allocation3 + $0x30] sm:$0x1] }
  0xe6   : > { %1018 = vst [vmem:[#allocation2 + $0xa0] sm:$0xf] %v817_v32  ;;  %1021 = vst [vmem:[#allocation2 + $0xa4] sm:$0x1] %v1020_v33  ;;  %v833_v38 = vor.u32 %v831_v19, %v830_v26  ;;  %v835_v39 = vrot.slane %v830_v26, 4  ;;  %v839_v40 = vrot.slane %v837_v27, 7  ;;  %v6539_v0 = vpack.c.bf16 %v515_v43, %v515_v43 }
  0xe7   : > { %1024 = vst [vmem:[#allocation2 + $0xa8] sm:$0xf] %v1023_v34  ;;  %v847_v41 = vrot.slane %v845_v30, 7  ;;  %v854_v45 = vshrl.u32 %v6537_v20, 16  ;;  %v857_v46 = vshll.u32 %v6537_v20, 16  ;;  %v862_v47 = vshrl.u32 %v6538_v21, 16 }
  0xe8   : > { %v865_v48 = vshll.u32 %v6538_v21, 16  ;;  %v834_v51 = vsel %vm8421_vm8, %v826_v25, %v833_v38  ;;  %v1027_v52 = vsel %vm8313_vm2, %v835_v39, %v1026_v35  ;;  %v842_v53 = vor.u32 %v840_v29, %v839_v40  ;;  %v1065_v6 = vld [vmem:[#allocation3 + $0x3c] sm:$0x1]  ;;  %v1068_v11 = vld [vmem:[#allocation3 + $0x48] sm:$0x1] }
  0xe9   : > { %v843_v54 = vrot.slane %v839_v40, 4  ;;  %1025 = vst [vmem:[#allocation2 + $0xac] sm:$0xf] %v834_v51  ;;  %1028 = vst [vmem:[#allocation2 + $0xb0] sm:$0x1] %v1027_v52  ;;  %v850_v57 = vor.u32 %v848_v37, %v847_v41  ;;  %v852_v58 = vrot.slane %v847_v41, 4  ;;  %v6540_v1 = vpack.c.bf16 %v516_v44, %v516_v44 }
  0xea   : > { %v856_v59 = vrot.slane %v854_v45, 7  ;;  %v864_v60 = vrot.slane %v862_v47, 7  ;;  %v1030_v63 = vsel %vm8409_vm6, %v842_v53, %v1029_v36  ;;  %v1051_v3 = vsel %vm8313_vm2, 0, %v1050_v49  ;;  %v1071_v12 = vld [vmem:[#allocation3 + $0x54] sm:$0x1] }
  0xeb   : > { %1031 = vst [vmem:[#allocation2 + $0xb4] sm:$0xf] %v1030_v63  ;;  %v851_v7 = vsel %vm8421_vm8, %v843_v54, %v850_v57  ;;  %v1034_v8 = vsel %vm8313_vm2, %v852_v58, %v1033_v42  ;;  %1052 = vst [vmem:[#allocation3] sm:$0x1] %v1051_v3  ;;  %v871_v15 = vshrl.u32 %v6539_v0, 16  ;;  %v874_v16 = vshll.u32 %v6539_v0, 16 }
  0xec   : > { %v859_v9 = vor.u32 %v857_v46, %v856_v59  ;;  %v860_v10 = vrot.slane %v856_v59, 4  ;;  %1032 = vst [vmem:[#allocation2 + $0xb8] sm:$0xf] %v851_v7  ;;  %1035 = vst [vmem:[#allocation2 + $0xbc] sm:$0x1] %v1034_v8  ;;  %v867_v13 = vor.u32 %v865_v48, %v864_v60  ;;  %v869_v14 = vrot.slane %v864_v60, 4 }
  0xed   : > { %v1074_v17 = vld [vmem:[#allocation3 + $0x60] sm:$0x1]  ;;  %v1077_v18 = vld [vmem:[#allocation3 + $0x6c] sm:$0x1]  ;;  %v1043_v20 = vld [vmem:[#allocation2 + $0xcc] sm:$0xf] }
  0xee   : > { %v1037_v19 = vsel %vm8409_vm6, %v859_v9, %v1036_v55  ;;  %v879_v21 = vshrl.u32 %v6540_v1, 16  ;;  %v882_v22 = vshll.u32 %v6540_v1, 16  ;;  %v1054_v23 = vsel %vm8313_vm2, 0, %v1053_v56  ;;  %v1080_v24 = vld [vmem:[#allocation3 + $0x8] sm:$0x1] }
  0xef   : > { %v1083_v25 = vld [vmem:[#allocation3 + $0x14] sm:$0x1]  ;;  %v1086_v26 = vld [vmem:[#allocation3 + $0x20] sm:$0x1]  ;;  %1038 = vst [vmem:[#allocation2 + $0xc0] sm:$0xf] %v1037_v19  ;;  %v868_v27 = vsel %vm8421_vm8, %v860_v10, %v867_v13  ;;  %v1041_v29 = vsel %vm8313_vm2, %v869_v14, %v1040_v61 }
  0xf0   : > { %v873_v30 = vrot.slane %v871_v15, 7  ;;  %v1047_v32 = vld [vmem:[#allocation2 + $0xd4] sm:$0x1]  ;;  %1055 = vst [vmem:[#allocation3 + $0xc] sm:$0x1] %v1054_v23  ;;  %v1057_v33 = vsel %vm8313_vm2, 0, %v1056_v62 }
  0xf1   : > { %v1089_v34 = vld [vmem:[#allocation3 + $0x2c] sm:$0x1]  ;;  %v1092_v35 = vld [vmem:[#allocation3 + $0x38] sm:$0x1]  ;;  %1039 = vst [vmem:[#allocation2 + $0xc4] sm:$0xf] %v868_v27 }
  0xf2   : > { %1042 = vst [vmem:[#allocation2 + $0xc8] sm:$0x1] %v1041_v29  ;;  %v881_v36 = vrot.slane %v879_v21, 7  ;;  %1058 = vst [vmem:[#allocation3 + $0x18] sm:$0x1] %v1057_v33  ;;  %v1060_v37 = vsel %vm8313_vm2, 0, %v1059_v4  ;;  %v876_v42 = vor.u32 %v874_v16, %v873_v30 }
  0xf3   : > { %v1063_v38 = vsel %vm8313_vm2, 0, %v1062_v5  ;;  %v1066_v39 = vsel %vm8313_vm2, 0, %v1065_v6  ;;  %v1095_v40 = vld [vmem:[#allocation3 + $0x44] sm:$0x1]  ;;  %v1098_v41 = vld [vmem:[#allocation3 + $0x50] sm:$0x1] }
  0xf4   : > { %v877_v43 = vrot.slane %v873_v30, 4  ;;  %1061 = vst [vmem:[#allocation3 + $0x24] sm:$0x1] %v1060_v37  ;;  %1064 = vst [vmem:[#allocation3 + $0x30] sm:$0x1] %v1063_v38  ;;  %v1069_v44 = vsel %vm8313_vm2, 0, %v1068_v11  ;;  %v884_v47 = vor.u32 %v882_v22, %v881_v36  ;;  %v1044_v53 = vsel %vm8409_vm6, %v876_v42, %v1043_v20 }
  0xf5   : > { %1067 = vst [vmem:[#allocation3 + $0x3c] sm:$0x1] %v1066_v39  ;;  %v1072_v45 = vsel %vm8313_vm2, 0, %v1071_v12  ;;  %v1101_v46 = vld [vmem:[#allocation3 + $0x5c] sm:$0x1]  ;;  %v886_v48 = vrot.slane %v881_v36, 4 }
  0xf6   : > { %1070 = vst [vmem:[#allocation3 + $0x48] sm:$0x1] %v1069_v44  ;;  %1073 = vst [vmem:[#allocation3 + $0x54] sm:$0x1] %v1072_v45  ;;  %v1075_v49 = vsel %vm8313_vm2, 0, %v1074_v17  ;;  %v1078_v51 = vsel %vm8313_vm2, 0, %v1077_v18  ;;  %v885_v58 = vsel %vm8421_vm8, %v877_v43, %v884_v47 }
  0xf7   : > { %v1104_v52 = vld [vmem:[#allocation3 + $0x68] sm:$0x1]  ;;  %1076 = vst [vmem:[#allocation3 + $0x60] sm:$0x1] %v1075_v49  ;;  %1079 = vst [vmem:[#allocation3 + $0x6c] sm:$0x1] %v1078_v51  ;;  %v1048_v31 = vsel %vm8313_vm2, %v886_v48, %v1047_v32 }
  0xf8   : > { %v1081_v54 = vsel %vm8343_vm4, 0, %v1080_v24  ;;  %v1084_v55 = vsel %vm8343_vm4, 0, %v1083_v25  ;;  %v1087_v56 = vsel %vm8343_vm4, 0, %v1086_v26  ;;  %v1107_v57 = vld [vmem:[#allocation3 + $0x74] sm:$0x1]  ;;  %v1090_v59 = vsel %vm8343_vm4, 0, %v1089_v34 }
  0xf9   : > { %1045 = vst [vmem:[#allocation2 + $0xcc] sm:$0xf] %v1044_v53  ;;  %1082 = vst [vmem:[#allocation3 + $0x8] sm:$0x1] %v1081_v54  ;;  %v1093_v60 = vsel %vm8343_vm4, 0, %v1092_v35  ;;  %v1096_v50 = vsel %vm8343_vm4, 0, %v1095_v40 }
  0xfa   : > { %1085 = vst [vmem:[#allocation3 + $0x14] sm:$0x1] %v1084_v55  ;;  %1088 = vst [vmem:[#allocation3 + $0x20] sm:$0x1] %v1087_v56  ;;  %v1099_v2 = vsel %vm8343_vm4, 0, %v1098_v41  ;;  %v1102_v61 = vsel %vm8343_vm4, 0, %v1101_v46 }
  0xfb   : > { %1046 = vst [vmem:[#allocation2 + $0xd0] sm:$0xf] %v885_v58  ;;  %1049 = vst [vmem:[#allocation2 + $0xd4] sm:$0x1] %v1048_v31  ;;  %v1105_v62 = vsel %vm8343_vm4, 0, %v1104_v52  ;;  %v1108_v63 = vsel %vm8343_vm4, 0, %v1107_v57 }
  0xfc   : > { %1091 = vst [vmem:[#allocation3 + $0x2c] sm:$0x1] %v1090_v59  ;;  %1094 = vst [vmem:[#allocation3 + $0x38] sm:$0x1] %v1093_v60 }
  0xfd   : > { %1097 = vst [vmem:[#allocation3 + $0x44] sm:$0x1] %v1096_v50  ;;  %1100 = vst [vmem:[#allocation3 + $0x50] sm:$0x1] %v1099_v2 }
  0xfe   : > { %1103 = vst [vmem:[#allocation3 + $0x5c] sm:$0x1] %v1102_v61  ;;  %1106 = vst [vmem:[#allocation3 + $0x68] sm:$0x1] %v1105_v62 }
  0xff   : > { %1109 = vst [vmem:[#allocation3 + $0x74] sm:$0x1] %v1108_v63 }
 0x100 PF: > { %v7358_v0 = vld [vmem:[#allocation7 + $0x40] sm:$0xff]   ;;  %v7362_v5 = vld [vmem:[#allocation7 + $0x48] sm:$0xff]   ;;  %v7366_v9 = vld [vmem:[#allocation7 + $0x50] sm:$0xff]   ;;  %s6541_s14 = smul.u32 96, %s8004_s30  ;;  %vm1492_vm9 = vcmask 1046528   ;;  %vm3711_vm11 = vcmask 1043456  }
 0x101   : > { %v7359_v1 = vld [vmem:[#allocation7 + $0xc0] sm:$0xff]   ;;  %6564 = vmatprep.subr.bf16.mxu0 %v7358_v0  ;;  %v7363_v6 = vld [vmem:[#allocation7 + $0xc8] sm:$0xff]   ;;  %v7367_v28 = vld [vmem:[#allocation7 + $0xd0] sm:$0xff]   ;;  %vm1331_vm10 = vsmask.f32 7424  ;;  %vm3718_vm14 = vcmask 1040384  }
 0x102   : > { %v7360_v3 = vld [vmem:[#allocation7] sm:$0xff]   ;;  %6640 = vmatprep.subr.bf16.mxu1 %v7359_v1  ;;  %v7364_v7 = vld [vmem:[#allocation7 + $0x8] sm:$0xff]   ;;  %v7368_v10 = vld [vmem:[#allocation7 + $0x10] sm:$0xff]   ;;  %s8584_s16 = scalar_lea.vmem [#allocation2], %s6541_s14  ;;  %vm3712_vm12 = vsmask.f32 7938 }
 0x103   : > { %v7361_v4 = vld [vmem:[#allocation7 + $0x80] sm:$0xff]   ;;  %6565 = vmatpush3.bf16.msra.mxu0 %v7360_v3  ;;  %v7365_v8 = vld [vmem:[#allocation7 + $0x88] sm:$0xff]   ;;  %v7369_v11 = vld [vmem:[#allocation7 + $0x90] sm:$0xff]   ;;  %vm3508_vm13 = vsmask.f32 256 }
 0x104   : > { %6641 = vmatpush3.bf16.msra.mxu1 %v7361_v4  ;;  %6566 = vmatprep.subr.bf16.mxu0 %v7362_v5  ;;  %v7370_v12 = vld [vmem:[#allocation7 + $0x58] sm:$0xff]   ;;  %v7374_v16 = vld [vmem:[#allocation7 + $0x60] sm:$0xff]   ;;  %v7378_v20 = vld [vmem:[#allocation7 + $0x68] sm:$0xff]   ;;  %vm3509_vm15 = vsmask.f32 4368 }
 0x105   : > { %6642 = vmatprep.subr.bf16.mxu1 %v7363_v6  ;;  %v7371_v13 = vld [vmem:[#allocation7 + $0xd8] sm:$0xff]   ;;  %v7375_v17 = vld [vmem:[#allocation7 + $0xe0] sm:$0xff]   ;;  %v7379_v21 = vld [vmem:[#allocation7 + $0xe8] sm:$0xff]  }
 0x106   : > { %v7372_v14 = vld [vmem:[#allocation7 + $0x18] sm:$0xff]   ;;  %v7376_v18 = vld [vmem:[#allocation7 + $0x20] sm:$0xff]   ;;  %v7380_v22 = vld [vmem:[#allocation7 + $0x28] sm:$0xff]  }
 0x107   : > { %6567 = vmatpush3.bf16.msra.mxu0 %v7364_v7  ;;  %v7373_v15 = vld [vmem:[#allocation7 + $0x98] sm:$0xff]   ;;  %v7377_v19 = vld [vmem:[#allocation7 + $0xa0] sm:$0xff]   ;;  %v7381_v23 = vld [vmem:[#allocation7 + $0xa8] sm:$0xff]  }
 0x108   : > { %6643 = vmatpush3.bf16.msra.mxu1 %v7365_v8  ;;  %6568 = vmatprep.subr.bf16.mxu0 %v7366_v9  ;;  %v7382_v24 = vld [vmem:[#allocation7 + $0x70] sm:$0xff]   ;;  %v7386_v29 = vld [vmem:[#allocation7 + $0x78] sm:$0xff]   ;;  %v7391_v37 = vld [vmem:[%s8584_s16 + $0x8] ss:$0 sps:$4 sm:$0x11]  }
 0x109   : > { %6644 = vmatprep.subr.bf16.mxu1 %v7367_v28  ;;  %v7383_v25 = vld [vmem:[#allocation7 + $0xf0] sm:$0xff]   ;;  %v7387_v30 = vld [vmem:[#allocation7 + $0xf8] sm:$0xff]   ;;  %v7395_v38 = vld [vmem:[#allocation7 + $0x140] sm:$0xff]   ;;  %v1340_v43 = vshll.u32 %v7391_v37, 16  ;;  %v1494_v47 = vrot.slane %v7391_v37, 1 }
 0x10a   : > { %v7384_v26 = vld [vmem:[#allocation7 + $0x30] sm:$0xff]   ;;  %v7388_v32 = vld [vmem:[#allocation7 + $0x38] sm:$0xff]   ;;  %v6050_v39 = vld [vmem:[%s8584_s16 + $0xc] sm:$0xf] }
 0x10b   : > { %6569 = vmatpush3.bf16.msra.mxu0 %v7368_v10  ;;  %v7385_v27 = vld [vmem:[#allocation7 + $0xb0] sm:$0xff]   ;;  %v7389_v33 = vld [vmem:[#allocation7 + $0xb8] sm:$0xff]   ;;  %v8591_v40 = vld [vmem:[%s8584_s16 + $0x10] sm:$0xf]  ;;  %v1342_v49 = vrot.slane %v1340_v43, 1 }
 0x10c   : > { %6645 = vmatpush3.bf16.msra.mxu1 %v7369_v11  ;;  %6570 = vmatprep.subr.bf16.mxu0 %v7370_v12  ;;  %v1113_v34 = vld [vmem:[%s8584_s16] sm:$0xf]  ;;  %v1114_v35 = vld [vmem:[%s8584_s16 + $0x4] sm:$0xf]  ;;  %v8594_v44 = vcombine.low %v6050_v39, %v8591_v40  ;;  %v1115_v52 = vld [vmem:[%s8584_s16 + $0xc] sm:$0xf] }
 0x10d   : > { %6646 = vmatprep.subr.bf16.mxu1 %v7371_v13  ;;  %v6132_v36 = vcombine.low %v1113_v34, %v1114_v35  ;;  %v1143_v45 = vld [vmem:[%s8584_s16] sm:$0xe]  ;;  %v1116_v54 = vld [vmem:[%s8584_s16 + $0x10] sm:$0xf]  ;;  %v7396_v56 = vld [vmem:[#allocation7 + $0x100] sm:$0xff]  }
 0x10e   : > { %v6152_v46 = vcombine.low %v1143_v45, %v1114_v35  ;;  %2834 = vmatprep.mubr.bf16.mxu1 %v8594_v44  ;;  %v6133_v57 = vcombine.low %v1115_v52, %v1116_v54  ;;  %v7398_v58 = vld [vmem:[%s8584_s16 + $0x14] ss:$0 sps:$4 sm:$0x11]   ;;  %v6052_v31 = vld [vmem:[%s8584_s16 + $0x18] sm:$0xf]  ;;  %v7423_v7 = vld [vmem:[#allocation7 + $0x1c0] sm:$0xff]  }
 0x10f   : > { %6571 = vmatpush3.bf16.msra.mxu0 %v7372_v14  ;;  %v1333_v41 = vshrl.u32 %v6132_v36, 16  ;;  %v1335_v42 = vshll.u32 %v6132_v36, 16  ;;  %v8605_v60 = vld [vmem:[%s8584_s16 + $0x1c] sm:$0xf]  ;;  %v1144_v50 = vld [vmem:[%s8584_s16 + $0xc] sm:$0xe]  ;;  %vm9275_vm0 = vmand %vm3711_vm11, %vm3712_vm12 }
 0x110   : > { %6647 = vmatpush3.bf16.msra.mxu1 %v7373_v15  ;;  %6572 = vmatprep.subr.bf16.mxu0 %v7374_v16  ;;  %v1493_v51 = vrot.slane %v6152_v46, 1  ;;  %v7402_v2 = vld [vmem:[#allocation7 + $0x148] sm:$0xff]   ;;  %v1345_v61 = vshrl.u32 %v6133_v57, 16  ;;  %v1347_v62 = vshll.u32 %v6133_v57, 16  ;;  %v1352_v63 = vshll.u32 %v7398_v58, 16  ;;  %v7424_v10 = vld [vmem:[#allocation7 + $0x180] sm:$0xff]   ;;  %vm9281_vm1 = vmand %vm3718_vm14, %vm3508_vm13 }
 0x111   : > { %6648 = vmatprep.subr.bf16.mxu1 %v7375_v17  ;;  %v1337_v48 = vrot.slane %v1335_v42, 1  ;;  %v8609_v0 = vcombine.low %v6052_v31, %v8605_v60  ;;  %v6153_v1 = vcombine.low %v1144_v50, %v1116_v54  ;;  %v1497_v3 = vrot.slane %v7398_v58, 1  ;;  %v7403_v6 = vld [vmem:[#allocation7 + $0x108] sm:$0xff]   ;;  %v1117_v9 = vld [vmem:[%s8584_s16 + $0x18] sm:$0xf]  ;;  %v7430_v46 = vld [vmem:[#allocation7 + $0x160] sm:$0xff]  }
 0x112   : > { %v1495_v55 = vsel %vm1492_vm9, %v1493_v51, %v1494_v47  ;;  %v1349_v4 = vrot.slane %v1347_v62, 1  ;;  %v1354_v5 = vrot.slane %v1352_v63, 1  ;;  %v1118_v28 = vld [vmem:[%s8584_s16 + $0x1c] sm:$0xf]  ;;  %v6054_v16 = vld [vmem:[%s8584_s16 + $0x24] sm:$0xf]  ;;  %vm9288_vm2 = vmor %vm3508_vm13, %vm3509_vm15 }
 0x113   : > { %6573 = vmatpush3.bf16.msra.mxu0 %v7376_v18  ;;  %v1338_v53 = vor.u32 %v1337_v48, %v1333_v41  ;;  %v1496_v8 = vrot.slane %v6153_v1, 1  ;;  %v8614_v12 = vcombine.low %v1117_v9, %v1118_v28  ;;  %v7405_v13 = vld [vmem:[%s8584_s16 + $0x20] ss:$0 sps:$4 sm:$0x11]   ;;  %v7409_v14 = vld [vmem:[#allocation7 + $0x150] sm:$0xff]   ;;  %v7437_v41 = vld [vmem:[#allocation7 + $0x188] sm:$0xff]  }
 0x114   : > { %6649 = vmatpush3.bf16.msra.mxu1 %v7377_v19  ;;  %6574 = vmatprep.subr.bf16.mxu0 %v7378_v20  ;;  %v1350_v11 = vor.u32 %v1349_v4, %v1345_v61  ;;  %v8620_v17 = vld [vmem:[%s8584_s16 + $0x28] sm:$0xf]  ;;  %v7410_v18 = vld [vmem:[#allocation7 + $0x110] sm:$0xff]   ;;  %v1119_v34 = vld [vmem:[%s8584_s16 + $0x24] sm:$0xf] }
 0x115   : > { %6650 = vmatprep.subr.bf16.mxu1 %v7379_v21  ;;  %v1343_v59 = vsel %vm1331_vm10, %v1338_v53, %v1342_v49  ;;  %v1498_v15 = vsel %vm1492_vm9, %v1496_v8, %v1497_v3  ;;  %v1357_v20 = vshrl.u32 %v8614_v12, 16  ;;  %v1359_v21 = vshll.u32 %v8614_v12, 16  ;;  %v1120_v35 = vld [vmem:[%s8584_s16 + $0x28] sm:$0xf]  ;;  %v6056_v43 = vld [vmem:[%s8584_s16 + $0x30] sm:$0xf] }
 0x116   : > { %2721 = vmatprep.mubr.bf16.mxu0 %v1343_v59  ;;  %v1355_v19 = vsel %vm1331_vm10, %v1350_v11, %v1354_v5  ;;  %v7412_v39 = vld [vmem:[%s8584_s16 + $0x2c] ss:$0 sps:$4 sm:$0x11]   ;;  %v8638_v45 = vld [vmem:[%s8584_s16 + $0x34] sm:$0xf]  ;;  %v7446_v3 = vld [vmem:[#allocation7 + $0x1d0] sm:$0xff]  }
 0x117   : > { %6575 = vmatpush3.bf16.msra.mxu0 %v7380_v22  ;;  %v1364_v22 = vshll.u32 %v7405_v13, 16  ;;  %v1376_v51 = vshll.u32 %v7412_v39, 16  ;;  %v1146_v52 = vld [vmem:[%s8584_s16 + $0x24] sm:$0xe]  ;;  %v8645_v53 = vcombine.low %v6056_v43, %v8638_v45  ;;  %v1121_v58 = vld [vmem:[%s8584_s16 + $0x30] sm:$0xf] }
 0x118   : > { %6651 = vmatpush3.bf16.msra.mxu1 %v7381_v23  ;;  %6576 = vmatprep.subr.bf16.mxu0 %v7382_v24  ;;  %v1145_v23 = vld [vmem:[%s8584_s16 + $0x18] sm:$0xe]  ;;  %v7416_v24 = vld [vmem:[#allocation7 + $0x158] sm:$0xff]   ;;  %v6155_v54 = vcombine.low %v1146_v52, %v1120_v35  ;;  %v1122_v31 = vld [vmem:[%s8584_s16 + $0x34] sm:$0xf]  ;;  %v1503_v50 = vrot.slane %v7412_v39, 1 }
 0x119   : > { %6652 = vmatprep.subr.bf16.mxu1 %v7383_v25  ;;  %v8627_v25 = vcombine.low %v6054_v16, %v8620_v17  ;;  %v7439_v61 = vld [vmem:[#allocation7 + $0x168] sm:$0xff]   ;;  %v7418_v63 = vld [vmem:[%s8584_s16 + $0x38] ss:$0 sps:$4 sm:$0x11]   ;;  %v6058_v1 = vld [vmem:[%s8584_s16 + $0x3c] sm:$0xf] }
 0x11a   : > { %v1502_v59 = vrot.slane %v6155_v54, 1  ;;  %v1388_v8 = vshll.u32 %v7418_v63, 16  ;;  %v1147_v9 = vld [vmem:[%s8584_s16 + $0x30] sm:$0xe]  ;;  %v7458_v43 = vld [vmem:[#allocation7 + $0x1a0] sm:$0xff]  }
 0x11b   : > { %6577 = vmatpush3.bf16.msra.mxu0 %v7384_v26  ;;  %v6154_v26 = vcombine.low %v1145_v23, %v1118_v28  ;;  %v7440_v28 = vld [vmem:[#allocation7 + $0x128] sm:$0xff]   ;;  %v6156_v11 = vcombine.low %v1147_v9, %v1122_v31  ;;  %v7449_v23 = vld [vmem:[#allocation7 + $0x130] sm:$0xff]   ;;  %v1126_v52 = vld [vmem:[%s8584_s16 + $0x4c] sm:$0xf] }
 0x11c   : > { %6653 = vmatpush3.bf16.msra.mxu1 %v7385_v27  ;;  %6578 = vmatprep.subr.bf16.mxu0 %v7386_v29  ;;  %v1500_v27 = vrot.slane %v7405_v13, 1  ;;  %v7432_v29 = vld [vmem:[#allocation7 + $0x1c8] sm:$0xff]   ;;  %v1390_v13 = vrot.slane %v1388_v8, 1 }
 0x11d   : > { %6654 = vmatprep.subr.bf16.mxu1 %v7387_v30  ;;  %v1361_v30 = vrot.slane %v1359_v21, 1  ;;  %v8693_v54 = vld [vmem:[%s8584_s16 + $0x50] ss:$0 sps:$4 sm:$0x11]  }
 0x11f   : > { %6579 = vmatpush3.bf16.msra.mxu0 %v7388_v32  ;;  %v1366_v32 = vrot.slane %v1364_v22, 1  ;;  %v1362_v37 = vor.u32 %v1361_v30, %v1357_v20  ;;  %v7448_v20 = vld [vmem:[#allocation7 + $0x170] sm:$0xff]   ;;  %v8671_v22 = vld [vmem:[%s8584_s16 + $0x44] ss:$0 sps:$4 sm:$0x11]  }
 0x120   : > { %6655 = vmatpush3.bf16.msra.mxu1 %v7389_v33  ;;  %6716 = vmatprep.subr.bf16.mxu0 %v7395_v38  ;;  %v1499_v33 = vrot.slane %v6154_v26, 1  ;;  %v8632_v38 = vcombine.low %v1119_v34, %v1120_v35  ;;  %v1505_v26 = vrot.slane %v6156_v11, 1  ;;  %v8676_v30 = vld [vmem:[%s8584_s16 + $0x4c] sm:$0xf]  ;;  %v1400_v34 = vshll.u32 %v8671_v22, 16  ;;  %v7468_v11 = vld [vmem:[#allocation7 + $0x1f0] sm:$0xff]  }
 0x121   : > { %6792 = vmatprep.subr.bf16.mxu1 %v7423_v7  ;;  %v1367_v47 = vsel %vm1331_vm10, %v1362_v37, %v1366_v32  ;;  %v1148_v35 = vld [vmem:[%s8584_s16 + $0x3c] sm:$0xe]  ;;  %v7455_v37 = vld [vmem:[#allocation7 + $0x198] sm:$0xff]  }
 0x122   : > { %2722 = vmatmul.mubr.bf16.vlgmr.msra.gmra.mrb[0].mxu0 %v6132_v36  ;;  %v7421_v36 = vld [vmem:[#allocation7 + $0x118] sm:$0xff]   ;;  %v1501_v42 = vsel %vm1492_vm9, %v1499_v33, %v1500_v27  ;;  %v1369_v48 = vshrl.u32 %v8632_v38, 16  ;;  %v1371_v49 = vshll.u32 %v8632_v38, 16  ;;  %v1506_v27 = vrot.slane %v7418_v63, 1  ;;  %v1149_v63 = vld [vmem:[%s8584_s16 + $0x48] sm:$0xe] }
 0x123   : > { %2835 = vmatmul.mubr.bf16.vlgmr.msra.gmra.mrb[0].mxu1 %v1495_v55  ;;  %6717 = vmatpush3.bf16.msra.mxu0 %v7396_v56  ;;  %v7431_v55 = vld [vmem:[#allocation7 + $0x120] sm:$0xff]  }
 0x124   : > { %2842 = vmatprep.mubr.bf16.mxu1 %v8609_v0  ;;  %6718 = vmatprep.subr.bf16.mxu0 %v7402_v2  ;;  %v1373_v56 = vrot.slane %v1371_v49, 1  ;;  %v8649_v2 = vcombine.low %v1121_v58, %v1122_v31 }
 0x125   : > { %6793 = vmatpush3.bf16.msra.mxu1 %v7424_v10  ;;  %2729 = vmatprep.mubr.bf16.mxu0 %v1355_v19  ;;  %v1124_v19 = vld [vmem:[%s8584_s16 + $0x40] sm:$0xf] }
 0x126   : > { %6794 = vmatprep.subr.bf16.mxu1 %v7432_v29  ;;  %v1374_v62 = vor.u32 %v1373_v56, %v1369_v48  ;;  %v1381_v4 = vshrl.u32 %v8649_v2, 16  ;;  %v1383_v5 = vshll.u32 %v8649_v2, 16  ;;  %v6060_v29 = vld [vmem:[%s8584_s16 + $0x48] sm:$0xf]  ;;  %v6157_v49 = vcombine.low %v1148_v35, %v1124_v19 }
 0x127   : > { %6719 = vmatpush3.bf16.msra.mxu0 %v7403_v6  ;;  %v8658_v6 = vld [vmem:[%s8584_s16 + $0x40] sm:$0xf]  ;;  %v8686_v48 = vcombine.low %v6060_v29, %v8676_v30  ;;  %v1509_v56 = vrot.slane %v8671_v22, 1  ;;  %v1150_v29 = vld [vmem:[%s8584_s16 + $0x54] sm:$0xe] }
 0x128   : > { %6720 = vmatprep.subr.bf16.mxu0 %v7409_v14  ;;  %v1385_v10 = vrot.slane %v1383_v5, 1  ;;  %v8664_v14 = vcombine.low %v6058_v1, %v8658_v6  ;;  %v7465_v1 = vld [vmem:[#allocation7 + $0x138] sm:$0xff]   ;;  %v7466_v5 = vld [vmem:[#allocation7 + $0x1a8] sm:$0xff]  }
 0x129   : > { %6795 = vmatpush3.bf16.msra.mxu1 %v7437_v41  ;;  %v7457_v41 = vld [vmem:[#allocation7 + $0x1e0] sm:$0xff]  }
 0x12a   : > { %2730 = vmatmul.mubr.bf16.gmra.mrb[4].mxu0 %v6133_v57  ;;  %v1378_v57 = vrot.slane %v1376_v51, 1  ;;  %6796 = vmatprep.subr.bf16.mxu1 %v7446_v3  ;;  %v1386_v16 = vor.u32 %v1385_v10, %v1381_v4  ;;  %v1125_v51 = vld [vmem:[%s8584_s16 + $0x48] sm:$0xf]  ;;  %v8705_v4 = vld [vmem:[%s8584_s16 + $0x58] sm:$0xf] }
 0x12b   : > { %2843 = vmatmul.mubr.bf16.gmra.mrb[4].mxu1 %v1498_v15  ;;  %6721 = vmatpush3.bf16.msra.mxu0 %v7410_v18  ;;  %v7447_v15 = vld [vmem:[#allocation7 + $0x190] sm:$0xff]  }
 0x12c   : > { %2850 = vmatprep.mubr.bf16.mxu1 %v8627_v25  ;;  %6722 = vmatprep.subr.bf16.mxu0 %v7416_v24  ;;  %v1379_v7 = vsel %vm1331_vm10, %v1374_v62, %v1378_v57  ;;  %v1123_v18 = vld [vmem:[%s8584_s16 + $0x3c] sm:$0xf]  ;;  %v1391_v24 = vsel %vm1331_vm10, %v1386_v16, %v1390_v13  ;;  %v1508_v62 = vrot.slane %v6157_v49, 1  ;;  %v1128_v10 = vld [vmem:[%s8584_s16 + $0x58] sm:$0xf] }
 0x12d   : > { %2737 = vmatprep.mubr.bf16.mxu0 %v1367_v47  ;;  %v8668_v21 = vcombine.low %v1123_v18, %v1124_v19  ;;  %6797 = vmatpush3.bf16.msra.mxu1 %v7447_v15  ;;  %v7442_v15 = vld [vmem:[%s8584_s16 + $0x5c] ss:$0 sps:$4 sm:$0x11]   ;;  %v1512_v18 = vrot.slane %v8693_v54, 1 }
 0x12e   : > { %v7469_v16 = vld [vmem:[#allocation7 + $0x1b0] sm:$0xff]  }
 0x12f   : > { %6723 = vmatpush3.bf16.msra.mxu0 %v7421_v36  ;;  %v1393_v32 = vshrl.u32 %v8668_v21, 16  ;;  %v1395_v33 = vshll.u32 %v8668_v21, 16  ;;  %v7450_v36 = vld [vmem:[#allocation7 + $0x1d8] sm:$0xff]  }
 0x130   : > { %6724 = vmatprep.subr.bf16.mxu0 %v7430_v46  ;;  %6798 = vmatprep.subr.bf16.mxu1 %v7450_v36  ;;  %v1507_v46 = vsel %vm1492_vm9, %v1505_v26, %v1506_v27  ;;  %v6064_v27 = vld [vmem:[%s8584_s16 + $0x60] sm:$0xf]  ;;  %v8727_v36 = vld [vmem:[#allocation7 + $0x200] sm:$0xff]  }
 0x131   : > { %v1397_v39 = vrot.slane %v1395_v33, 1  ;;  %6799 = vmatpush3.bf16.msra.mxu1 %v7455_v37  ;;  %v8724_v33 = vld [vmem:[%s8584_s16 + $0x64] sm:$0xf]  ;;  %v6159_v37 = vcombine.low %v1150_v29, %v1128_v10  ;;  %v7471_v29 = vld [vmem:[%s8584_s16 + $0x14] ss:$0 sps:$4 sm:$0x11]  }
 0x132   : > { %2738 = vmatmul.mubr.bf16.gmra.mrb[8].mxu0 %v8614_v12  ;;  %v1504_v12 = vsel %vm1492_vm9, %v1502_v59, %v1503_v50  ;;  %6800 = vmatprep.subr.bf16.mxu1 %v7457_v41  ;;  %v1412_v59 = vshll.u32 %v8693_v54, 16  ;;  %v6062_v50 = vld [vmem:[%s8584_s16 + $0x54] sm:$0xf]  ;;  %v1129_v41 = vld [vmem:[%s8584_s16 + $0x60] sm:$0xf] }
 0x133   : > { %2851 = vmatmul.mubr.bf16.gmra.mrb[8].mxu1 %v1501_v42  ;;  %6725 = vmatpush3.bf16.msra.mxu0 %v7431_v55  ;;  %v1402_v42 = vrot.slane %v1400_v34, 1  ;;  %v1398_v47 = vor.u32 %v1397_v39, %v1393_v32  ;;  %v7459_v55 = vld [vmem:[#allocation7 + $0x178] sm:$0xff]   ;;  %v1514_v49 = vrot.slane %v6159_v37, 1  ;;  %v8774_v37 = vld [vmem:[%s8584_s16 + $0x1c] sm:$0xf] }
 0x134   : > { %2858 = vmatprep.mubr.bf16.mxu1 %v8645_v53  ;;  %2745 = vmatprep.mubr.bf16.mxu0 %v1379_v7  ;;  %v6158_v7 = vcombine.low %v1149_v63, %v1126_v52  ;;  %v1414_v9 = vrot.slane %v1412_v59, 1  ;;  %v7472_v34 = vld [vmem:[#allocation7 + $0x1b8] sm:$0xff]   ;;  %v1131_v63 = vld [vmem:[%s8584_s16 + $0x6c] sm:$0xf] }
 0x135   : > { %6726 = vmatprep.subr.bf16.mxu0 %v7439_v61  ;;  %v1403_v57 = vsel %vm1331_vm10, %v1398_v47, %v1402_v42  ;;  %v7460_v61 = vld [vmem:[#allocation7 + $0x1e8] sm:$0xff]   ;;  %6801 = vmatpush3.bf16.msra.mxu1 %v7458_v43  ;;  %v8733_v43 = vcombine.low %v6064_v27, %v8724_v33  ;;  %v7452_v47 = vld [vmem:[%s8584_s16 + $0x68] ss:$0 sps:$4 sm:$0x11]  }
 0x136   : > { %6802 = vmatprep.subr.bf16.mxu1 %v7460_v61  ;;  %v1511_v19 = vrot.slane %v6158_v7, 1 }
 0x137   : > { %6727 = vmatpush3.bf16.msra.mxu0 %v7440_v28  ;;  %v1127_v28 = vld [vmem:[%s8584_s16 + $0x54] sm:$0xf] }
 0x138   : > { %6728 = vmatprep.subr.bf16.mxu0 %v7448_v20  ;;  %v8713_v13 = vcombine.low %v1127_v28, %v1128_v10  ;;  %v1513_v42 = vsel %vm1492_vm9, %v1511_v19, %v1512_v18  ;;  %v1152_v18 = vld [vmem:[%s8584_s16 + $0x6c] sm:$0xe] }
 0x139   : > { %6803 = vmatpush3.bf16.msra.mxu1 %v7466_v5  ;;  %v1132_v5 = vld [vmem:[%s8584_s16 + $0x70] sm:$0xf]  ;;  %v6080_v19 = vld [vmem:[%s8584_s16 + $0xc] sm:$0xe] }
 0x13a   : > { %2746 = vmatmul.mubr.bf16.gmra.mrb[12].mxu0 %v8632_v38  ;;  %v8690_v38 = vcombine.low %v1125_v51, %v1126_v52  ;;  %6804 = vmatprep.subr.bf16.mxu1 %v7468_v11  ;;  %v1417_v20 = vshrl.u32 %v8713_v13, 16  ;;  %v1419_v22 = vshll.u32 %v8713_v13, 16  ;;  %v1515_v51 = vrot.slane %v7442_v15, 1 }
 0x13b   : > { %2859 = vmatmul.mubr.bf16.gmra.mrb[12].mxu1 %v1504_v12  ;;  %2753 = vmatprep.mubr.bf16.mxu0 %v1391_v24  ;;  %v1510_v12 = vsel %vm1492_vm9, %v1508_v62, %v1509_v56  ;;  %v7470_v24 = vld [vmem:[#allocation7 + $0x1f8] sm:$0xff]   ;;  %v1436_v56 = vshll.u32 %v7452_v47, 16  ;;  %v8751_v7 = vcombine.low %v1131_v63, %v1132_v5  ;;  %v6161_v27 = vcombine.low %v1152_v18, %v1132_v5 }
 0x13c   : > { %2866 = vmatprep.mubr.bf16.mxu1 %v8664_v14  ;;  %6729 = vmatpush3.bf16.msra.mxu0 %v7449_v23  ;;  %v1405_v58 = vshrl.u32 %v8690_v38, 16  ;;  %v1407_v31 = vshll.u32 %v8690_v38, 16  ;;  %v1424_v23 = vshll.u32 %v7442_v15, 16  ;;  %v1421_v32 = vrot.slane %v1419_v22, 1  ;;  %v6068_v15 = vld [vmem:[%s8584_s16 + $0x78] sm:$0xf] }
 0x13d   : > { %6730 = vmatprep.subr.bf16.mxu0 %v7459_v55  ;;  %6805 = vmatpush3.bf16.msra.mxu1 %v7469_v16  ;;  %v1441_v10 = vshrl.u32 %v8751_v7, 16  ;;  %v1443_v11 = vshll.u32 %v8751_v7, 16  ;;  %v8760_v16 = vld [vmem:[%s8584_s16 + $0x7c] sm:$0xf] }
 0x13e   : > { %v1409_v3 = vrot.slane %v1407_v31, 1  ;;  %v1426_v35 = vrot.slane %v1424_v23, 1  ;;  %6806 = vmatprep.subr.bf16.mxu1 %v7470_v24  ;;  %v1422_v39 = vor.u32 %v1421_v32, %v1417_v20  ;;  %v8742_v31 = vld [vmem:[%s8584_s16 + $0x70] sm:$0xf]  ;;  %v1626_v32 = vshll.u32 %v8594_v44, 16 }
 0x13f   : > { %v1445_v20 = vrot.slane %v1443_v11, 1 }
 0x140   : > { %6731 = vmatpush3.bf16.msra.mxu0 %v7465_v1  ;;  %v1410_v8 = vor.u32 %v1409_v3, %v1405_v58  ;;  %v1427_v52 = vsel %vm1331_vm10, %v1422_v39, %v1426_v35  ;;  %v1151_v58 = vld [vmem:[%s8584_s16 + $0x60] sm:$0xe]  ;;  %v1516_v1 = vsel %vm1492_vm9, %v1514_v49, %v1515_v51  ;;  %v6092_v35 = vld [vmem:[%s8584_s16 + $0x18] sm:$0xf] }
 0x141   : > { %7158 = vmatprep.subr.bf16.mxu0 %v8727_v36  ;;  %6807 = vmatpush3.bf16.msra.mxu1 %v7472_v34  ;;  %v1446_v22 = vor.u32 %v1445_v20, %v1441_v10  ;;  %v6182_v34 = vcombine.low %v6080_v19, %v8591_v40  ;;  %v6192_v39 = vcombine.low %v6092_v35, %v8774_v37  ;;  %v8811_v20 = vld [vmem:[%s8584_s16 + $0x38] ss:$0 sps:$4 sm:$0x11]   ;;  %v8818_v35 = vld [vmem:[%s8584_s16 + $0x40] sm:$0xf] }
 0x142   : > { %2754 = vmatmul.mubr.bf16.gmra.mrb[16].mxu0 %v8649_v2  ;;  %v8711_v2 = vcombine.low %v6062_v50, %v8705_v4  ;;  %v1415_v26 = vsel %vm1331_vm10, %v1410_v8, %v1414_v9  ;;  %v1438_v50 = vrot.slane %v1436_v56, 1  ;;  %v7462_v8 = vld [vmem:[%s8584_s16 + $0x74] ss:$0 sps:$4 sm:$0x11]   ;;  %v1518_v9 = vrot.slane %v7452_v47, 1 }
 0x143   : > { %2867 = vmatmul.mubr.bf16.gmra.mrb[16].mxu1 %v1507_v46  ;;  %2761 = vmatprep.mubr.bf16.mxu0 %v1403_v57  ;;  %v1130_v46 = vld [vmem:[%s8584_s16 + $0x64] sm:$0xf]  ;;  %v6066_v57 = vld [vmem:[%s8584_s16 + $0x6c] sm:$0xf]  ;;  %v1624_v47 = vshrl.u32 %v8594_v44, 16  ;;  %v1914_v40 = vshrl.u32 %v6192_v39, 16 }
 0x144   : > { %2874 = vmatprep.mubr.bf16.mxu1 %v8686_v48  ;;  %v6160_v61 = vcombine.low %v1151_v58, %v1130_v46  ;;  %v8748_v3 = vcombine.low %v6066_v57, %v8742_v31  ;;  %v1916_v49 = vshll.u32 %v6192_v39, 16  ;;  %v8786_v56 = vld [vmem:[%s8584_s16 + $0x28] sm:$0xf]  ;;  %v1784_v57 = vrot.slane %v7471_v29, 1 }
 0x145   : > { %v8792_v44 = vld [vmem:[%s8584_s16 + $0x2c] ss:$0 sps:$4 sm:$0x11]  }
 0x146   : > { %v1918_v58 = vrot.slane %v1916_v49, 1  ;;  %v1933_v5 = vshll.u32 %v8792_v44, 16 }
 0x148   : > { %v1935_v18 = vrot.slane %v1933_v5, 1  ;;  %v8840_v5 = vld [vmem:[%s8584_s16 + $0x4c] sm:$0xf] }
 0x14a   : > { %2762 = vmatmul.mubr.bf16.gmra.mrb[20].mxu0 %v8668_v21  ;;  %v6140_v21 = vcombine.low %v1129_v41, %v1130_v46  ;;  %v8779_v41 = vld [vmem:[%s8584_s16 + $0x20] ss:$0 sps:$4 sm:$0x11]   ;;  %v1521_v46 = vrot.slane %v7462_v8, 1 }
 0x14b   : > { %2875 = vmatmul.mubr.bf16.gmra.mrb[20].mxu1 %v1510_v12  ;;  %2769 = vmatprep.mubr.bf16.mxu0 %v1415_v26  ;;  %v1448_v12 = vshll.u32 %v7462_v8, 16  ;;  %v8767_v26 = vcombine.low %v6068_v15, %v8760_v16  ;;  %v1921_v51 = vshll.u32 %v8779_v41, 16  ;;  %v1631_v8 = vshll.u32 %v7471_v29, 16  ;;  %v8805_v15 = vld [vmem:[%s8584_s16 + $0x34] sm:$0xf] }
 0x14c   : > { %2882 = vmatprep.mubr.bf16.mxu1 %v8711_v2  ;;  %v1429_v54 = vshrl.u32 %v6140_v21, 16  ;;  %v1431_v55 = vshll.u32 %v6140_v21, 16 }
 0x14d   : > { %v1450_v23 = vrot.slane %v1448_v12, 1 }
 0x14e   : > { %v1433_v59 = vrot.slane %v1431_v55, 1  ;;  %v1783_v55 = vrot.slane %v6182_v34, 1  ;;  %v6098_v34 = vld [vmem:[%s8584_s16 + $0x3c] sm:$0xf] }
 0x150   : > { %v1434_v62 = vor.u32 %v1433_v59, %v1429_v54  ;;  %v1628_v54 = vrot.slane %v1626_v32, 1  ;;  %v1923_v59 = vrot.slane %v1921_v51, 1  ;;  %v1785_v10 = vsel %vm1492_vm9, %v1783_v55, %v1784_v57 }
 0x152   : > { %2770 = vmatmul.mubr.bf16.gmra.mrb[24].mxu0 %v8690_v38  ;;  %v1517_v38 = vrot.slane %v6160_v61, 1  ;;  %v1439_v28 = vsel %vm1331_vm10, %v1434_v62, %v1438_v50  ;;  %v1919_v62 = vor.u32 %v1918_v58, %v1914_v40  ;;  %v7479_v58 = vld [vmem:[#allocation7 + $0x208] sm:$0xff]  }
 0x153   : > { %2883 = vmatmul.mubr.bf16.gmra.mrb[24].mxu1 %v1513_v42  ;;  %2777 = vmatprep.mubr.bf16.mxu0 %v1427_v52  ;;  %v1520_v42 = vrot.slane %v6161_v27, 1  ;;  %v6094_v52 = vld [vmem:[%s8584_s16 + $0x24] sm:$0xf] }
 0x154   : > { %2890 = vmatprep.mubr.bf16.mxu1 %v8733_v43  ;;  %v1519_v24 = vsel %vm1492_vm9, %v1517_v38, %v1518_v9  ;;  %v8789_v50 = vcombine.low %v6094_v52, %v8786_v56  ;;  %v7476_v38 = vld [vmem:[%s8584_s16 + $0x20] ss:$0 sps:$4 sm:$0x11]   ;;  %v6096_v9 = vld [vmem:[%s8584_s16 + $0x30] sm:$0xf]  ;;  %v1924_v11 = vsel %vm1331_vm10, %v1919_v62, %v1923_v59  ;;  %v1636_v52 = vshrl.u32 %v8609_v0, 16 }
 0x155   : > { %v1522_v61 = vsel %vm1492_vm9, %v1520_v42, %v1521_v46  ;;  %v8808_v19 = vcombine.low %v6096_v9, %v8805_v15  ;;  %v1787_v32 = vrot.slane %v7476_v38, 1  ;;  %v1643_v42 = vshll.u32 %v7476_v38, 16  ;;  %v7480_v59 = vld [vmem:[%s8584_s16 + $0x2c] ss:$0 sps:$4 sm:$0x11]   ;;  %v7483_v9 = vld [vmem:[#allocation7 + $0x210] sm:$0xff]  }
 0x156   : > { %v1926_v63 = vshrl.u32 %v8789_v50, 16  ;;  %v1945_v46 = vshll.u32 %v8811_v20, 16  ;;  %v1790_v38 = vrot.slane %v7480_v59, 1 }
 0x157   : > { %v1940_v27 = vshll.u32 %v8808_v19, 16  ;;  %v1938_v40 = vshrl.u32 %v8808_v19, 16 }
 0x158   : > { %v1947_v62 = vrot.slane %v1945_v46, 1  ;;  %v8858_v46 = vld [vmem:[%s8584_s16 + $0x50] ss:$0 sps:$4 sm:$0x11]  }
 0x159   : > { %v1942_v49 = vrot.slane %v1940_v27, 1 }
 0x15a   : > { %2778 = vmatmul.mubr.bf16.gmra.mrb[28].mxu0 %v8713_v13  ;;  %v1451_v13 = vsel %vm1331_vm10, %v1446_v22, %v1450_v23  ;;  %v1638_v22 = vshll.u32 %v8609_v0, 16  ;;  %v1629_v23 = vor.u32 %v1628_v54, %v1624_v47  ;;  %v8825_v47 = vcombine.low %v6098_v34, %v8818_v35  ;;  %v7484_v34 = vld [vmem:[%s8584_s16 + $0x38] ss:$0 sps:$4 sm:$0x11]  }
 0x15b   : > { %2891 = vmatmul.mubr.bf16.gmra.mrb[28].mxu1 %v1516_v1  ;;  %2785 = vmatprep.mubr.bf16.mxu0 %v1439_v28  ;;  %v1928_v1 = vshll.u32 %v8789_v50, 16 }
 0x15c   : > { %2898 = vmatprep.mubr.bf16.mxu1 %v8748_v3  ;;  %v1640_v54 = vrot.slane %v1638_v22, 1  ;;  %v1952_v0 = vshll.u32 %v8825_v47, 16  ;;  %v1648_v22 = vshrl.u32 %v8627_v25, 16 }
 0x15d   : > { %v1930_v12 = vrot.slane %v1928_v1, 1  ;;  %v8834_v1 = vld [vmem:[%s8584_s16 + $0x44] ss:$0 sps:$4 sm:$0x11]  }
 0x162   : > { %2786 = vmatmul.mubr.bf16.gmra.mrb[32].mxu0 %v6140_v21  ;;  %v6081_v21 = vld [vmem:[%s8584_s16 + $0x18] sm:$0xe] }
 0x163   : > { %2899 = vmatmul.mubr.bf16.gmra.mrb[32].mxu1 %v1519_v24  ;;  %2793 = vmatprep.mubr.bf16.mxu0 %v1451_v13  ;;  %v6183_v28 = vcombine.low %v6081_v21, %v8605_v60  ;;  %v1931_v60 = vor.u32 %v1930_v12, %v1926_v63  ;;  %v1633_v24 = vrot.slane %v1631_v8, 1  ;;  %v6082_v13 = vld [vmem:[%s8584_s16 + $0x24] sm:$0xe]  ;;  %v1650_v21 = vshll.u32 %v8627_v25, 16 }
 0x164   : > { %2906 = vmatprep.mubr.bf16.mxu1 %v8767_v26  ;;  %v6184_v55 = vcombine.low %v6082_v13, %v8620_v17  ;;  %v1943_v63 = vor.u32 %v1942_v49, %v1938_v40  ;;  %v1641_v17 = vor.u32 %v1640_v54, %v1636_v52  ;;  %v1954_v12 = vrot.slane %v1952_v0, 1  ;;  %v7487_v13 = vld [vmem:[#allocation7 + $0x218] sm:$0xff]   ;;  %v6102_v49 = vld [vmem:[%s8584_s16 + $0x54] sm:$0xf] }
 0x165   : > { %v1786_v29 = vrot.slane %v6183_v28, 1  ;;  %v1634_v51 = vsel %vm1331_vm10, %v1629_v23, %v1633_v24  ;;  %v6083_v28 = vld [vmem:[%s8584_s16 + $0x30] sm:$0xe]  ;;  %v1652_v23 = vrot.slane %v1650_v21, 1  ;;  %v1655_v24 = vshll.u32 %v7480_v59, 16 }
 0x166   : > { %v1789_v8 = vrot.slane %v6184_v55, 1  ;;  %v6185_v27 = vcombine.low %v6083_v28, %v8638_v45  ;;  %v8863_v45 = vld [vmem:[%s8584_s16 + $0x58] sm:$0xf]  ;;  %v1793_v54 = vrot.slane %v7484_v34, 1  ;;  %v7492_v55 = vld [vmem:[#allocation7 + $0x220] sm:$0xff]   ;;  %v1969_v59 = vshll.u32 %v8858_v46, 16 }
 0x167   : > { %v1788_v57 = vsel %vm1492_vm9, %v1786_v29, %v1787_v32  ;;  %v6084_v29 = vld [vmem:[%s8584_s16 + $0x3c] sm:$0xe]  ;;  %v8869_v21 = vcombine.low %v6102_v49, %v8863_v45  ;;  %v8881_v28 = vld [vmem:[%s8584_s16 + $0x5c] ss:$0 sps:$4 sm:$0x11]  }
 0x168   : > { %v1791_v32 = vsel %vm1492_vm9, %v1789_v8, %v1790_v38  ;;  %v1792_v52 = vrot.slane %v6185_v27, 1  ;;  %v7488_v8 = vld [vmem:[%s8584_s16 + $0x44] ss:$0 sps:$4 sm:$0x11]   ;;  %v6085_v38 = vld [vmem:[%s8584_s16 + $0x48] sm:$0xe] }
 0x169   : > { %v1974_v49 = vshrl.u32 %v8869_v21, 16 }
 0x16a   : > { %2794 = vmatmul.mubr.bf16.gmra.mrb[36].mxu0 %v8751_v7  ;;  %v1936_v7 = vsel %vm1331_vm10, %v1931_v60, %v1935_v18  ;;  %v1957_v18 = vshll.u32 %v8834_v1, 16 }
 0x16b   : > { %2907 = vmatmul.mubr.bf16.gmra.mrb[36].mxu1 %v1522_v61  ;;  %2947 = vmatprep.mubr.bf16.mxu0 %v1785_v10  ;;  %v1645_v61 = vrot.slane %v1643_v42, 1  ;;  %v1950_v10 = vshrl.u32 %v8825_v47, 16  ;;  %v1662_v42 = vshll.u32 %v8645_v53, 16 }
 0x16c   : > { %3060 = vmatprep.mubr.bf16.mxu1 %v1924_v11  ;;  %v1948_v11 = vsel %vm1331_vm10, %v1943_v63, %v1947_v62 }
 0x16d   : > { %v1646_v60 = vsel %vm1331_vm10, %v1641_v17, %v1645_v61  ;;  %v1955_v25 = vor.u32 %v1954_v12, %v1950_v10  ;;  %v1664_v61 = vrot.slane %v1662_v42, 1  ;;  %v1674_v17 = vshll.u32 %v8664_v14, 16  ;;  %v7498_v10 = vld [vmem:[#allocation7 + $0x228] sm:$0xff]  }
 0x16e   : > { %v1976_v12 = vshll.u32 %v8869_v21, 16  ;;  %v8891_v42 = vld [vmem:[%s8584_s16 + $0x50] ss:$0 sps:$4 sm:$0x11]  }
 0x172   : > { %2948 = vmatmul.mubr.bf16.vlgmr.msra.gmra.mrb[40].mxu0 %v1634_v51  ;;  %v1657_v51 = vrot.slane %v1655_v24, 1  ;;  %v6086_v24 = vld [vmem:[%s8584_s16 + $0x54] sm:$0xe] }
 0x173   : > { %3061 = vmatmul.mubr.bf16.vlgmr.msra.gmra.mrb[40].mxu1 %v6192_v39  ;;  %7159 = vmatpush3.bf16.msra.mxu0 %v8727_v36  ;;  %v6100_v39 = vld [vmem:[%s8584_s16 + $0x48] sm:$0xf] }
 0x174   : > { %3068 = vmatprep.mubr.bf16.mxu1 %v1936_v7  ;;  %2955 = vmatprep.mubr.bf16.mxu0 %v1788_v57  ;;  %v8847_v36 = vcombine.low %v6100_v39, %v8840_v5  ;;  %v1959_v7 = vrot.slane %v1957_v18, 1  ;;  %v6186_v57 = vcombine.low %v6084_v29, %v8658_v6  ;;  %v1686_v6 = vshll.u32 %v8686_v48, 16  ;;  %v6104_v18 = vld [vmem:[%s8584_s16 + $0x60] sm:$0xf] }
 0x175   : > { %7160 = vmatprep.subr.bf16.mxu0 %v7479_v58  ;;  %v1667_v39 = vshll.u32 %v7484_v34, 16  ;;  %v1672_v29 = vshrl.u32 %v8664_v14, 16  ;;  %v1796_v34 = vrot.slane %v7488_v8, 1 }
 0x176   : > { %v1964_v40 = vshll.u32 %v8847_v36, 16  ;;  %v1960_v62 = vsel %vm1331_vm10, %v1955_v25, %v1959_v7  ;;  %v1962_v63 = vshrl.u32 %v8847_v36, 16  ;;  %v1795_v27 = vrot.slane %v6186_v57, 1  ;;  %v7502_v7 = vld [vmem:[#allocation7 + $0x230] sm:$0xff]  }
 0x177   : > { %7161 = vmatpush3.bf16.msra.mxu0 %v7479_v58  ;;  %v1660_v58 = vshrl.u32 %v8645_v53, 16 }
 0x178   : > { %7162 = vmatprep.subr.bf16.mxu0 %v7483_v9  ;;  %v1966_v0 = vrot.slane %v1964_v40, 1  ;;  %v6187_v40 = vcombine.low %v6085_v38, %v8676_v30  ;;  %v1797_v30 = vsel %vm1492_vm9, %v1795_v27, %v1796_v34  ;;  %v6124_v27 = vld [vmem:[%s8584_s16 + $0x30] sm:$0xe] }
 0x17a   : > { %2956 = vmatmul.mubr.bf16.gmra.mrb[44].mxu0 %v1646_v60  ;;  %v8886_v60 = vld [vmem:[%s8584_s16 + $0x64] sm:$0xf] }
 0x17b   : > { %3069 = vmatmul.mubr.bf16.gmra.mrb[44].mxu1 %v8789_v50  ;;  %2963 = vmatprep.mubr.bf16.mxu0 %v1791_v32  ;;  %v1653_v50 = vor.u32 %v1652_v23, %v1648_v22  ;;  %v1665_v22 = vor.u32 %v1664_v61, %v1660_v58  ;;  %v1967_v23 = vor.u32 %v1966_v0, %v1962_v63  ;;  %v1676_v32 = vrot.slane %v1674_v17, 1 }
 0x17c   : > { %3076 = vmatprep.mubr.bf16.mxu1 %v1948_v11  ;;  %7163 = vmatpush3.bf16.msra.mxu0 %v7483_v9  ;;  %v1794_v9 = vsel %vm1492_vm9, %v1792_v52, %v1793_v54  ;;  %v1971_v11 = vrot.slane %v1969_v59, 1  ;;  %v8894_v25 = vcombine.low %v6104_v18, %v8886_v60  ;;  %v1978_v52 = vrot.slane %v1976_v12, 1  ;;  %v6122_v12 = vld [vmem:[%s8584_s16 + $0x18] sm:$0xe] }
 0x17d   : > { %7164 = vmatprep.subr.bf16.mxu0 %v7487_v13  ;;  %v1658_v53 = vsel %vm1331_vm10, %v1653_v50, %v1657_v51  ;;  %v8899_v50 = vld [vmem:[%s8584_s16 + $0x68] ss:$0 sps:$4 sm:$0x11]   ;;  %v6188_v51 = vcombine.low %v6086_v24, %v8705_v4  ;;  %v1981_v54 = vshll.u32 %v8881_v28, 16  ;;  %v1677_v57 = vor.u32 %v1676_v32, %v1672_v29 }
 0x17e   : > { %v1972_v14 = vsel %vm1331_vm10, %v1967_v23, %v1971_v11  ;;  %v1684_v58 = vshrl.u32 %v8686_v48, 16  ;;  %v1688_v61 = vrot.slane %v1686_v6, 1  ;;  %v1988_v4 = vshll.u32 %v8894_v25, 16  ;;  %v6106_v6 = vld [vmem:[%s8584_s16 + $0x6c] sm:$0xf] }
 0x17f   : > { %v1698_v63 = vshll.u32 %v8711_v2, 16  ;;  %v1798_v0 = vrot.slane %v6187_v40, 1  ;;  %v1799_v48 = vrot.slane %v8891_v42, 1  ;;  %v1979_v17 = vor.u32 %v1978_v52, %v1974_v49  ;;  %v6126_v49 = vld [vmem:[%s8584_s16 + $0x48] sm:$0xe] }
 0x180   : > { %7165 = vmatpush3.bf16.msra.mxu0 %v7487_v13  ;;  %v1679_v13 = vshll.u32 %v7488_v8, 16  ;;  %v8916_v8 = vld [vmem:[%s8584_s16 + $0x70] sm:$0xf]  ;;  %v1990_v11 = vrot.slane %v1988_v4, 1  ;;  %v6212_v23 = vcombine.low %v6122_v12, %v8774_v37  ;;  %v2074_v24 = vrot.slane %v8779_v41, 1 }
 0x181   : > { %7166 = vmatprep.subr.bf16.mxu0 %v7492_v55  ;;  %v1800_v18 = vsel %vm1492_vm9, %v1798_v0, %v1799_v48  ;;  %v8929_v34 = vcombine.low %v6106_v6, %v8916_v8  ;;  %v6214_v37 = vcombine.low %v6124_v27, %v8805_v15  ;;  %v2080_v41 = vrot.slane %v8811_v20, 1  ;;  %v7499_v27 = vld [vmem:[%s8584_s16 + $0x68] ss:$0 sps:$4 sm:$0x11]  }
 0x182   : > { %2964 = vmatmul.mubr.bf16.gmra.mrb[48].mxu0 %v1658_v53  ;;  %v1681_v59 = vrot.slane %v1679_v13, 1  ;;  %v8911_v53 = vrot.slane %v6188_v51, 1  ;;  %v2077_v13 = vrot.slane %v8792_v44, 1  ;;  %v2073_v40 = vrot.slane %v6212_v23, 1  ;;  %v6127_v51 = vld [vmem:[%s8584_s16 + $0x54] sm:$0xe] }
 0x183   : > { %3077 = vmatmul.mubr.bf16.gmra.mrb[48].mxu1 %v8808_v19  ;;  %2971 = vmatprep.mubr.bf16.mxu0 %v1794_v9  ;;  %v1669_v19 = vrot.slane %v1667_v39, 1  ;;  %v1993_v39 = vshll.u32 %v8899_v50, 16  ;;  %v1689_v9 = vor.u32 %v1688_v61, %v1684_v58  ;;  %v2083_v44 = vrot.slane %v8834_v1, 1  ;;  %v8954_v61 = vld [vmem:[%s8584_s16 + $0x7c] sm:$0xf] }
 0x184   : > { %3084 = vmatprep.mubr.bf16.mxu1 %v1960_v62  ;;  %7167 = vmatpush3.bf16.msra.mxu0 %v7492_v55  ;;  %v7506_v62 = vld [vmem:[#allocation7 + $0x238] sm:$0xff]   ;;  %v1682_v38 = vsel %vm1331_vm10, %v1677_v57, %v1681_v59  ;;  %v2079_v20 = vrot.slane %v6214_v37, 1  ;;  %v2086_v57 = vrot.slane %v8858_v46, 1  ;;  %v6217_v1 = vcombine.low %v6127_v51, %v8863_v45  ;;  %v6108_v59 = vld [vmem:[%s8584_s16 + $0x78] sm:$0xf] }
 0x185   : > { %7168 = vmatprep.subr.bf16.mxu0 %v7498_v10  ;;  %v1670_v55 = vsel %vm1331_vm10, %v1665_v22, %v1669_v19  ;;  %v1691_v22 = vshll.u32 %v8891_v42, 16  ;;  %v6123_v19 = vld [vmem:[%s8584_s16 + $0x24] sm:$0xe]  ;;  %v1995_v32 = vrot.slane %v1993_v39, 1  ;;  %v1998_v6 = vshrl.u32 %v8929_v34, 16 }
 0x186   : > { %v6213_v42 = vcombine.low %v6123_v19, %v8786_v56  ;;  %v8944_v56 = vsel %vm1492_vm9, %v2073_v40, %v2074_v24  ;;  %v8960_v46 = vsel %vm1492_vm9, %v2079_v20, %v2080_v41  ;;  %v2088_v45 = vrot.slane %v6217_v1, 1 }
 0x187   : > { %v1805_v40 = vrot.slane %v7499_v27, 1 }
 0x188   : > { %7169 = vmatpush3.bf16.msra.mxu0 %v7498_v10  ;;  %v1986_v10 = vshrl.u32 %v8894_v25, 16  ;;  %v2076_v15 = vrot.slane %v6213_v42, 1  ;;  %v6088_v42 = vld [vmem:[%s8584_s16 + $0x6c] sm:$0xe] }
 0x189   : > { %7170 = vmatprep.subr.bf16.mxu0 %v7502_v7 }
 0x18a   : > { %2972 = vmatmul.mubr.bf16.gmra.mrb[52].mxu0 %v1670_v55  ;;  %v1991_v52 = vor.u32 %v1990_v11, %v1986_v10  ;;  %v6216_v55 = vcombine.low %v6126_v49, %v8840_v5  ;;  %v1693_v5 = vrot.slane %v1691_v22, 1  ;;  %v8957_v4 = vsel %vm1492_vm9, %v2076_v15, %v2077_v13 }
 0x18b   : > { %3085 = vmatmul.mubr.bf16.gmra.mrb[52].mxu1 %v8825_v47  ;;  %v1983_v47 = vrot.slane %v1981_v54, 1  ;;  %2979 = vmatprep.mubr.bf16.mxu0 %v1797_v30  ;;  %v1700_v22 = vrot.slane %v1698_v63, 1  ;;  %v1710_v63 = vshll.u32 %v8733_v43, 16  ;;  %v6190_v15 = vcombine.low %v6088_v42, %v8742_v31 }
 0x18c   : > { %3092 = vmatprep.mubr.bf16.mxu1 %v1972_v14  ;;  %7171 = vmatpush3.bf16.msra.mxu0 %v7502_v7  ;;  %v6125_v7 = vld [vmem:[%s8584_s16 + $0x3c] sm:$0xe]  ;;  %v7495_v14 = vld [vmem:[%s8584_s16 + $0x5c] ss:$0 sps:$4 sm:$0x11]   ;;  %v2085_v30 = vrot.slane %v6216_v55, 1  ;;  %v1996_v39 = vsel %vm1331_vm10, %v1991_v52, %v1995_v32  ;;  %v1694_v12 = vsel %vm1331_vm10, %v1689_v9, %v1693_v5 }
 0x18d   : > { %7172 = vmatprep.subr.bf16.mxu0 %v7506_v62  ;;  %v1984_v29 = vsel %vm1331_vm10, %v1979_v17, %v1983_v47  ;;  %v6215_v54 = vcombine.low %v6125_v7, %v8818_v35  ;;  %v2000_v35 = vshll.u32 %v8929_v34, 16  ;;  %v1802_v0 = vrot.slane %v7495_v14, 1  ;;  %v6087_v47 = vld [vmem:[%s8584_s16 + $0x60] sm:$0xe]  ;;  %v6110_v7 = vld [vmem:[%s8584_s16 + $0x84] sm:$0xf] }
 0x18e   : > { %v8967_v17 = vsel %vm1492_vm9, %v2085_v30, %v2086_v57  ;;  %v1703_v23 = vshll.u32 %v7495_v14, 16  ;;  %v6189_v24 = vcombine.low %v6087_v47, %v8724_v33  ;;  %v8989_v32 = vld [vmem:[%s8584_s16 + $0x80] ss:$0 sps:$4 sm:$0x11]   ;;  %v1715_v55 = vshll.u32 %v7499_v27, 16 }
 0x18f   : > { %v2082_v58 = vrot.slane %v6215_v54, 1  ;;  %v1803_v19 = vsel %vm1492_vm9, %v8911_v53, %v1802_v0  ;;  %v2017_v51 = vshll.u32 %v8989_v32, 16  ;;  %v1708_v54 = vshrl.u32 %v8733_v43, 16  ;;  %v7503_v57 = vld [vmem:[%s8584_s16 + $0x74] ss:$0 sps:$4 sm:$0x11]  }
 0x190   : > { %7173 = vmatpush3.bf16.msra.mxu0 %v7506_v62  ;;  %v2089_v62 = vrot.slane %v8881_v28, 1  ;;  %v8974_v28 = vcombine.low %v6108_v59, %v8954_v61  ;;  %v1705_v33 = vrot.slane %v1703_v23, 1  ;;  %v1804_v53 = vrot.slane %v6189_v24, 1  ;;  %v9009_v30 = vld [vmem:[%s8584_s16 + $0x8c] ss:$0 sps:$4 sm:$0x11]  }
 0x191   : > { %v8964_v48 = vsel %vm1492_vm9, %v2082_v58, %v2083_v44  ;;  %v1712_v44 = vrot.slane %v1710_v63, 1  ;;  %v2019_v58 = vrot.slane %v2017_v51, 1  ;;  %v1722_v5 = vshll.u32 %v8748_v3, 16  ;;  %v6089_v0 = vld [vmem:[%s8584_s16 + $0x78] sm:$0xe] }
 0x192   : > { %2980 = vmatmul.mubr.bf16.gmra.mrb[56].mxu0 %v1682_v38  ;;  %v2002_v38 = vrot.slane %v2000_v35, 1  ;;  %v8977_v11 = vsel %vm1492_vm9, %v2088_v45, %v2089_v62  ;;  %v2010_v37 = vshrl.u32 %v8974_v28, 16  ;;  %v1806_v20 = vsel %vm1492_vm9, %v1804_v53, %v1805_v40  ;;  %v7507_v23 = vld [vmem:[%s8584_s16 + $0x80] ss:$0 sps:$4 sm:$0x11]  }
 0x193   : > { %3093 = vmatmul.mubr.bf16.gmra.mrb[56].mxu1 %v8847_v36  ;;  %v8948_v36 = vld [vmem:[%s8584_s16 + $0x74] ss:$0 sps:$4 sm:$0x11]   ;;  %2987 = vmatprep.mubr.bf16.mxu0 %v1800_v18  ;;  %v1696_v18 = vshrl.u32 %v8711_v2, 16  ;;  %v2012_v2 = vshll.u32 %v8974_v28, 16  ;;  %v1713_v43 = vor.u32 %v1712_v44, %v1708_v54  ;;  %v1717_v59 = vrot.slane %v1715_v55, 1 }
 0x194   : > { %3100 = vmatprep.mubr.bf16.mxu1 %v1984_v29  ;;  %v2005_v10 = vshll.u32 %v8948_v36, 16  ;;  %v2003_v9 = vor.u32 %v2002_v38, %v1998_v6  ;;  %v1807_v31 = vrot.slane %v6190_v15, 1  ;;  %v1808_v62 = vrot.slane %v7503_v57, 1  ;;  %v6130_v51 = vld [vmem:[%s8584_s16 + $0x78] sm:$0xe] }
 0x195   : > { %v1701_v13 = vor.u32 %v1700_v22, %v1696_v18  ;;  %v2014_v49 = vrot.slane %v2012_v2, 1  ;;  %v1718_v6 = vsel %vm1331_vm10, %v1713_v43, %v1717_v59  ;;  %v1720_v38 = vshrl.u32 %v8748_v3, 16 }
 0x196   : > { %v2007_v29 = vrot.slane %v2005_v10, 1  ;;  %v1724_v10 = vrot.slane %v1722_v5, 1  ;;  %v6191_v18 = vcombine.low %v6089_v0, %v8760_v16  ;;  %v1809_v22 = vsel %vm1492_vm9, %v1807_v31, %v1808_v62 }
 0x197   : > { %v1706_v52 = vsel %vm1331_vm10, %v1701_v13, %v1705_v33  ;;  %v2015_v35 = vor.u32 %v2014_v49, %v2010_v37  ;;  %v1734_v27 = vshll.u32 %v8767_v26, 16  ;;  %v1811_v3 = vrot.slane %v7507_v23, 1  ;;  %v6129_v49 = vld [vmem:[%s8584_s16 + $0x6c] sm:$0xe] }
 0x198   : > { %v2008_v41 = vsel %vm1331_vm10, %v2003_v9, %v2007_v29  ;;  %v1725_v9 = vor.u32 %v1724_v10, %v1720_v38  ;;  %v1810_v2 = vrot.slane %v6191_v18, 1  ;;  %v1739_v33 = vshll.u32 %v7507_v23, 16 }
 0x199   : > { %v1736_v13 = vrot.slane %v1734_v27, 1 }
 0x19a   : > { %2988 = vmatmul.mubr.bf16.gmra.mrb[60].mxu0 %v1694_v12  ;;  %v1727_v12 = vshll.u32 %v7503_v57, 16  ;;  %v1741_v40 = vrot.slane %v1739_v33, 1 }
 0x19b   : > { %3101 = vmatmul.mubr.bf16.gmra.mrb[60].mxu1 %v8869_v21  ;;  %2995 = vmatprep.mubr.bf16.mxu0 %v1803_v19  ;;  %v8995_v21 = vld [vmem:[%s8584_s16 + $0x88] sm:$0xf] }
 0x19c   : > { %3108 = vmatprep.mubr.bf16.mxu1 %v1996_v39  ;;  %v6201_v14 = vcombine.low %v6110_v7, %v8995_v21  ;;  %v2029_v39 = vshll.u32 %v9009_v30, 16  ;;  %v1729_v29 = vrot.slane %v1727_v12, 1  ;;  %v1812_v7 = vsel %vm1492_vm9, %v1810_v2, %v1811_v3 }
 0x19e   : > { %v2024_v1 = vshll.u32 %v6201_v14, 16  ;;  %v2022_v45 = vshrl.u32 %v6201_v14, 16  ;;  %v2031_v19 = vrot.slane %v2029_v39, 1  ;;  %v1730_v16 = vsel %vm1331_vm10, %v1725_v9, %v1729_v29 }
 0x1a0   : > { %v2026_v47 = vrot.slane %v2024_v1, 1 }
 0x1a2   : > { %2996 = vmatmul.mubr.bf16.gmra.mrb[64].mxu0 %v1706_v52  ;;  %v2027_v24 = vor.u32 %v2026_v47, %v2022_v45  ;;  %v6131_v52 = vld [vmem:[%s8584_s16 + $0x84] sm:$0xe] }
 0x1a3   : > { %3109 = vmatmul.mubr.bf16.gmra.mrb[64].mxu1 %v8894_v25  ;;  %3003 = vmatprep.mubr.bf16.mxu0 %v1806_v20  ;;  %v2020_v25 = vsel %vm1331_vm10, %v2015_v35, %v2019_v58  ;;  %v6221_v54 = vcombine.low %v6131_v52, %v8995_v21 }
 0x1a4   : > { %3116 = vmatprep.mubr.bf16.mxu1 %v2008_v41  ;;  %v2032_v63 = vsel %vm1331_vm10, %v2027_v24, %v2031_v19  ;;  %v2092_v41 = vrot.slane %v8899_v50, 1 }
 0x1a5   : > { %v2100_v44 = vrot.slane %v6221_v54, 1 }
 0x1aa   : > { %3004 = vmatmul.mubr.bf16.gmra.mrb[68].mxu0 %v1718_v6 }
 0x1ab   : > { %3117 = vmatmul.mubr.bf16.gmra.mrb[68].mxu1 %v8929_v34  ;;  %3011 = vmatprep.mubr.bf16.mxu0 %v1809_v22  ;;  %v1732_v34 = vshrl.u32 %v8767_v26, 16  ;;  %v6128_v26 = vld [vmem:[%s8584_s16 + $0x60] sm:$0xe] }
 0x1ac   : > { %3124 = vmatprep.mubr.bf16.mxu1 %v2020_v25 }
 0x1ad   : > { %v1737_v53 = vor.u32 %v1736_v13, %v1732_v34 }
 0x1af   : > { %v1742_v42 = vsel %vm1331_vm10, %v1737_v53, %v1741_v40 }
 0x1b2   : > { %3012 = vmatmul.mubr.bf16.gmra.mrb[72].mxu0 %v1730_v16 }
 0x1b3   : > { %3125 = vmatmul.mubr.bf16.gmra.mrb[72].mxu1 %v8974_v28  ;;  %3019 = vmatprep.mubr.bf16.mxu0 %v1812_v7  ;;  %v6218_v28 = vcombine.low %v6128_v26, %v8886_v60 }
 0x1b4   : > { %3132 = vmatprep.mubr.bf16.mxu1 %v2032_v63 }
 0x1b5   : > { %v2091_v37 = vrot.slane %v6218_v28, 1 }
 0x1ba   : > { %3020 = vmatmul.mubr.bf16.gmra.mrb[76].mxu0 %v1742_v42 }
 0x1bb   : > { %3133 = vmatmul.mubr.bf16.gmra.mrb[76].mxu1 %v6201_v14  ;;  %7174 = vmatprep.mubr.bf16.mxu0 %v8944_v56  ;;  %v6219_v14 = vcombine.low %v6129_v49, %v8916_v8  ;;  %v2093_v56 = vsel %vm1492_vm9, %v2091_v37, %v2092_v41 }
 0x1bd   : > { %v2094_v60 = vrot.slane %v6219_v14, 1 }
 0x1c2   : > { %7175 = vmatmul.mubr.bf16.vlgmr.msra.gmra.mrb[80].mxu0 %v8957_v4  ;;  %v6220_v4 = vcombine.low %v6130_v51, %v8954_v61  ;;  %v2101_v61 = vrot.slane %v9009_v30, 1 }
 0x1c3   : > { %7178 = vmatprep.mubr.bf16.mxu0 %v8960_v46  ;;  %v2095_v46 = vrot.slane %v8948_v36, 1 }
 0x1c5   : > { %v2096_v50 = vsel %vm1492_vm9, %v2094_v60, %v2095_v46 }
 0x1ca   : > { %7179 = vmatmul.mubr.bf16.gmra.mrb[84].mxu0 %v8964_v48  ;;  %v2097_v48 = vrot.slane %v6220_v4, 1 }
 0x1cb   : > { %7182 = vmatprep.mubr.bf16.mxu0 %v8967_v17  ;;  %v2098_v17 = vrot.slane %v8989_v32, 1 }
 0x1cd   : > { %v2099_v8 = vsel %vm1492_vm9, %v2097_v48, %v2098_v17 }
 0x1d2   : > { %7183 = vmatmul.mubr.bf16.gmra.mrb[88].mxu0 %v8977_v11  ;;  %v2102_v11 = vsel %vm1492_vm9, %v2100_v44, %v2101_v61 }
 0x1d3   : > { %7186 = vmatprep.mubr.bf16.mxu0 %v2093_v56 }
 0x1da   : > { %7187 = vmatmul.mubr.bf16.gmra.mrb[92].mxu0 %v2096_v50 }
 0x1db   : > { %7190 = vmatprep.mubr.bf16.mxu0 %v2099_v8 }
 0x1e2   : > { %7191 = vmatmul.mubr.bf16.gmra.mrb[96].mxu0 %v2102_v11 }
 0x1f5   : > { %v6580_v15 = vpop.f32.mrb[0].mxu0 }
 0x1f6   : > { %v6656_v55 = vpop.f32.mrb[0].mxu1  ;;  %v6581_v57 = vpop.f32.mrb[1].mxu0 }
 0x1f7   : > { %v6657_v36 = vpop.f32.mrb[1].mxu1  ;;  %v6582_v58 = vadd.f32 %v6581_v57, %v6580_v15  ;;  %v6583_v1 = vpop.f32.mrb[2].mxu0 }
 0x1f8   : > { %v6658_v20 = vadd.f32 %v6657_v36, %v6656_v55  ;;  %v6659_v32 = vpop.f32.mrb[2].mxu1  ;;  %v6584_v5 = vpop.f32.mrb[3].mxu0 }
 0x1f9   : > { %v6660_v35 = vpop.f32.mrb[3].mxu1  ;;  %v6585_v59 = vadd.f32 %v6584_v5, %v6583_v1 }
 0x1fa   : > { %v6661_v21 = vadd.f32 %v6660_v35, %v6659_v32  ;;  %v9050_v43 = vadd.f32 %v6658_v20, %v6582_v58 }
 0x1fc   : > { %v9052_v31 = vadd.f32 %v6661_v21, %v6585_v59 }
 0x1fd   : > { %v6586_v0 = vpop.f32.mrb[4].mxu0 }
 0x1fe   : > { %v6662_v30 = vpop.f32.mrb[4].mxu1  ;;  %v6587_v47 = vpop.f32.mrb[5].mxu0 }
 0x1ff   : > { %v6663_v62 = vpop.f32.mrb[5].mxu1  ;;  %v6588_v6 = vadd.f32 %v6587_v47, %v6586_v0  ;;  %v6589_v38 = vpop.f32.mrb[6].mxu0 }
 0x200   : > { %v6664_v25 = vadd.f32 %v6663_v62, %v6662_v30  ;;  %v6665_v45 = vpop.f32.mrb[6].mxu1  ;;  %v6590_v12 = vpop.f32.mrb[7].mxu0 }
 0x201   : > { %v6666_v39 = vpop.f32.mrb[7].mxu1  ;;  %v6591_v22 = vadd.f32 %v6590_v12, %v6589_v38 }
 0x202   : > { %v6667_v10 = vadd.f32 %v6666_v39, %v6665_v45  ;;  %v9054_v18 = vadd.f32 %v6664_v25, %v6588_v6 }
 0x204   : > { %v9056_v23 = vadd.f32 %v6667_v10, %v6591_v22 }
 0x205   : > { %v6592_v27 = vpop.f32.mrb[8].mxu0 }
 0x206   : > { %v6668_v24 = vpop.f32.mrb[8].mxu1  ;;  %v6593_v2 = vpop.f32.mrb[9].mxu0 }
 0x207   : > { %v6669_v19 = vpop.f32.mrb[9].mxu1  ;;  %v6594_v63 = vadd.f32 %v6593_v2, %v6592_v27  ;;  %v6595_v16 = vpop.f32.mrb[10].mxu0 }
 0x208   : > { %v6670_v9 = vadd.f32 %v6669_v19, %v6668_v24  ;;  %v6671_v29 = vpop.f32.mrb[10].mxu1  ;;  %v6596_v13 = vpop.f32.mrb[11].mxu0 }
 0x209   : > { %v6672_v3 = vpop.f32.mrb[11].mxu1  ;;  %v6597_v7 = vadd.f32 %v6596_v13, %v6595_v16 }
 0x20a   : > { %v6673_v34 = vadd.f32 %v6672_v3, %v6671_v29  ;;  %v9058_v33 = vadd.f32 %v6670_v9, %v6594_v63 }
 0x20c   : > { %v9060_v53 = vadd.f32 %v6673_v34, %v6597_v7 }
 0x20d   : > { %v6598_v26 = vpop.f32.mrb[12].mxu0 }
 0x20e   : > { %v6674_v40 = vpop.f32.mrb[12].mxu1  ;;  %v6599_v41 = vpop.f32.mrb[13].mxu0 }
 0x20f   : > { %v6675_v42 = vpop.f32.mrb[13].mxu1  ;;  %v6600_v51 = vadd.f32 %v6599_v41, %v6598_v26  ;;  %v6601_v14 = vpop.f32.mrb[14].mxu0 }
 0x210   : > { %v6676_v28 = vadd.f32 %v6675_v42, %v6674_v40  ;;  %v6677_v37 = vpop.f32.mrb[14].mxu1  ;;  %v6602_v4 = vpop.f32.mrb[15].mxu0 }
 0x211   : > { %v6678_v49 = vpop.f32.mrb[15].mxu1  ;;  %v6603_v46 = vadd.f32 %v6602_v4, %v6601_v14 }
 0x212   : > { %v6679_v56 = vadd.f32 %v6678_v49, %v6677_v37  ;;  %v9062_v60 = vadd.f32 %v6676_v28, %v6600_v51 }
 0x214   : > { %v9064_v48 = vadd.f32 %v6679_v56, %v6603_v46 }
 0x215   : > { %v6604_v50 = vpop.f32.mrb[16].mxu0 }
 0x216   : > { %v6680_v17 = vpop.f32.mrb[16].mxu1  ;;  %v6605_v44 = vpop.f32.mrb[17].mxu0 }
 0x217   : > { %v6681_v52 = vpop.f32.mrb[17].mxu1  ;;  %v6606_v11 = vadd.f32 %v6605_v44, %v6604_v50  ;;  %v6607_v55 = vpop.f32.mrb[18].mxu0 }
 0x218   : > { %v6682_v54 = vadd.f32 %v6681_v52, %v6680_v17  ;;  %v6683_v8 = vpop.f32.mrb[18].mxu1  ;;  %v6608_v15 = vpop.f32.mrb[19].mxu0 }
 0x219   : > { %v6684_v61 = vpop.f32.mrb[19].mxu1  ;;  %v6609_v32 = vadd.f32 %v6608_v15, %v6607_v55 }
 0x21a   : > { %v6685_v36 = vadd.f32 %v6684_v61, %v6683_v8  ;;  %v9066_v20 = vadd.f32 %v6682_v54, %v6606_v11 }
 0x21c   : > { %v9068_v57 = vadd.f32 %v6685_v36, %v6609_v32 }
 0x21d   : > { %v6610_v1 = vpop.f32.mrb[20].mxu0 }
 0x21e   : > { %v6686_v35 = vpop.f32.mrb[20].mxu1  ;;  %v6611_v59 = vpop.f32.mrb[21].mxu0 }
 0x21f   : > { %v6687_v58 = vpop.f32.mrb[21].mxu1  ;;  %v6612_v62 = vadd.f32 %v6611_v59, %v6610_v1  ;;  %v6613_v0 = vpop.f32.mrb[22].mxu0 }
 0x220   : > { %v6688_v21 = vadd.f32 %v6687_v58, %v6686_v35  ;;  %v6689_v5 = vpop.f32.mrb[22].mxu1  ;;  %v6614_v45 = vpop.f32.mrb[23].mxu0 }
 0x221   : > { %v6690_v30 = vpop.f32.mrb[23].mxu1  ;;  %v6615_v39 = vadd.f32 %v6614_v45, %v6613_v0 }
 0x222   : > { %v6691_v25 = vadd.f32 %v6690_v30, %v6689_v5  ;;  %v9070_v47 = vadd.f32 %v6688_v21, %v6612_v62 }
 0x224   : > { %v9072_v6 = vadd.f32 %v6691_v25, %v6615_v39 }
 0x225   : > { %v6616_v12 = vpop.f32.mrb[24].mxu0 }
 0x226   : > { %v6692_v38 = vpop.f32.mrb[24].mxu1  ;;  %v6617_v19 = vpop.f32.mrb[25].mxu0 }
 0x227   : > { %v6693_v10 = vpop.f32.mrb[25].mxu1  ;;  %v6618_v9 = vadd.f32 %v6617_v19, %v6616_v12  ;;  %v6619_v29 = vpop.f32.mrb[26].mxu0 }
 0x228   : > { %v6694_v22 = vadd.f32 %v6693_v10, %v6692_v38  ;;  %v6695_v24 = vpop.f32.mrb[26].mxu1  ;;  %v6620_v3 = vpop.f32.mrb[27].mxu0 }
 0x229   : > { %v6696_v27 = vpop.f32.mrb[27].mxu1  ;;  %v6621_v16 = vadd.f32 %v6620_v3, %v6619_v29 }
 0x22a   : > { %v6697_v2 = vadd.f32 %v6696_v27, %v6695_v24  ;;  %v9074_v63 = vadd.f32 %v6694_v22, %v6618_v9 }
 0x22c   : > { %v9076_v34 = vadd.f32 %v6697_v2, %v6621_v16 }
 0x22d   : > { %v6622_v40 = vpop.f32.mrb[28].mxu0 }
 0x22e   : > { %v6698_v13 = vpop.f32.mrb[28].mxu1  ;;  %v6623_v28 = vpop.f32.mrb[29].mxu0 }
 0x22f   : > { %v6699_v7 = vpop.f32.mrb[29].mxu1  ;;  %v6624_v41 = vadd.f32 %v6623_v28, %v6622_v40  ;;  %v6625_v49 = vpop.f32.mrb[30].mxu0 }
 0x230   : > { %v6700_v42 = vadd.f32 %v6699_v7, %v6698_v13  ;;  %v6701_v26 = vpop.f32.mrb[30].mxu1  ;;  %v6626_v14 = vpop.f32.mrb[31].mxu0 }
 0x231   : > { %v6702_v37 = vpop.f32.mrb[31].mxu1  ;;  %v6627_v4 = vadd.f32 %v6626_v14, %v6625_v49 }
 0x232   : > { %v6703_v51 = vadd.f32 %v6702_v37, %v6701_v26  ;;  %v9078_v56 = vadd.f32 %v6700_v42, %v6624_v41 }
 0x234   : > { %v9080_v46 = vadd.f32 %v6703_v51, %v6627_v4 }
 0x235   : > { %v6628_v50 = vpop.f32.mrb[32].mxu0 }
 0x236   : > { %v6704_v17 = vpop.f32.mrb[32].mxu1  ;;  %v6629_v44 = vpop.f32.mrb[33].mxu0 }
 0x237   : > { %v6705_v52 = vpop.f32.mrb[33].mxu1  ;;  %v6630_v11 = vadd.f32 %v6629_v44, %v6628_v50  ;;  %v6631_v55 = vpop.f32.mrb[34].mxu0 }
 0x238   : > { %v6706_v54 = vadd.f32 %v6705_v52, %v6704_v17  ;;  %v6707_v8 = vpop.f32.mrb[34].mxu1  ;;  %v6632_v15 = vpop.f32.mrb[35].mxu0 }
 0x239   : > { %v6708_v61 = vpop.f32.mrb[35].mxu1  ;;  %v6633_v35 = vadd.f32 %v6632_v15, %v6631_v55 }
 0x23a   : > { %v6709_v36 = vadd.f32 %v6708_v61, %v6707_v8  ;;  %v9082_v32 = vadd.f32 %v6706_v54, %v6630_v11 }
 0x23c   : > { %v9084_v58 = vadd.f32 %v6709_v36, %v6633_v35 }
 0x23d   : > { %v6634_v5 = vpop.f32.mrb[36].mxu0 }
 0x23e   : > { %v6710_v1 = vpop.f32.mrb[36].mxu1  ;;  %v6635_v62 = vpop.f32.mrb[37].mxu0 }
 0x23f   : > { %v6711_v21 = vpop.f32.mrb[37].mxu1  ;;  %v6636_v25 = vadd.f32 %v6635_v62, %v6634_v5  ;;  %v6637_v45 = vpop.f32.mrb[38].mxu0 }
 0x240   : > { %v6712_v59 = vadd.f32 %v6711_v21, %v6710_v1  ;;  %v6713_v30 = vpop.f32.mrb[38].mxu1  ;;  %v6638_v38 = vpop.f32.mrb[39].mxu0 }
 0x241   : > { %v6714_v0 = vpop.f32.mrb[39].mxu1  ;;  %v6639_v12 = vadd.f32 %v6638_v38, %v6637_v45 }
 0x242   : > { %v6715_v39 = vadd.f32 %v6714_v0, %v6713_v30  ;;  %v9086_v10 = vadd.f32 %v6712_v59, %v6636_v25 }
 0x244   : > { %v9088_v22 = vadd.f32 %v6715_v39, %v6639_v12 }
 0x245   : > { %v6732_v27 = vpop.f32.mrb[40].mxu0 }
 0x246   : > { %v6808_v24 = vpop.f32.mrb[40].mxu1  ;;  %v6733_v2 = vpop.f32.mrb[41].mxu0 }
 0x247   : > { %v6809_v19 = vpop.f32.mrb[41].mxu1  ;;  %v6734_v16 = vadd.f32 %v6733_v2, %v6732_v27  ;;  %v6735_v13 = vpop.f32.mrb[42].mxu0 }
 0x248   : > { %v6810_v9 = vadd.f32 %v6809_v19, %v6808_v24  ;;  %v6811_v29 = vpop.f32.mrb[42].mxu1  ;;  %v6736_v40 = vpop.f32.mrb[43].mxu0 }
 0x249   : > { %v6812_v3 = vpop.f32.mrb[43].mxu1  ;;  %v2950_v42 = vadd.f32 %v6734_v16, %v9050_v43  ;;  %v6737_v26 = vadd.f32 %v6736_v40, %v6735_v13 }
 0x24a   : > { %v6813_v7 = vadd.f32 %v6812_v3, %v6811_v29 }
 0x24b   : > { %v2953_v28 = vadd.f32 %v6737_v26, %v9052_v31  ;;  %v9092_v41 = vadd.f32 %v6810_v9, %v2950_v42 }
 0x24d   : > { %v6738_v51 = vpop.f32.mrb[44].mxu0  ;;  %v9094_v17 = vadd.f32 %v6813_v7, %v2953_v28 }
 0x24e   : > { %v6814_v37 = vpop.f32.mrb[44].mxu1  ;;  %v6739_v52 = vpop.f32.mrb[45].mxu0 }
 0x24f   : > { %v6815_v49 = vpop.f32.mrb[45].mxu1  ;;  %v6740_v54 = vadd.f32 %v6739_v52, %v6738_v51  ;;  %v6741_v8 = vpop.f32.mrb[46].mxu0 }
 0x250   : > { %v6816_v14 = vadd.f32 %v6815_v49, %v6814_v37  ;;  %v6817_v4 = vpop.f32.mrb[46].mxu1  ;;  %v6742_v61 = vpop.f32.mrb[47].mxu0 }
 0x251   : > { %v6818_v50 = vpop.f32.mrb[47].mxu1  ;;  %v2958_v43 = vadd.f32 %v6740_v54, %v9054_v18  ;;  %v6743_v11 = vadd.f32 %v6742_v61, %v6741_v8 }
 0x252   : > { %v6819_v44 = vadd.f32 %v6818_v50, %v6817_v4 }
 0x253   : > { %v2961_v31 = vadd.f32 %v6743_v11, %v9056_v23  ;;  %v9098_v36 = vadd.f32 %v6816_v14, %v2958_v43 }
 0x255   : > { %v6744_v35 = vpop.f32.mrb[48].mxu0  ;;  %v9100_v5 = vadd.f32 %v6819_v44, %v2961_v31 }
 0x256   : > { %v6820_v55 = vpop.f32.mrb[48].mxu1  ;;  %v6745_v59 = vpop.f32.mrb[49].mxu0 }
 0x257   : > { %v6821_v15 = vpop.f32.mrb[49].mxu1  ;;  %v6746_v62 = vadd.f32 %v6745_v59, %v6744_v35  ;;  %v6747_v0 = vpop.f32.mrb[50].mxu0 }
 0x258   : > { %v6822_v1 = vadd.f32 %v6821_v15, %v6820_v55  ;;  %v6823_v21 = vpop.f32.mrb[50].mxu1  ;;  %v6748_v45 = vpop.f32.mrb[51].mxu0 }
 0x259   : > { %v6824_v30 = vpop.f32.mrb[51].mxu1  ;;  %v2966_v18 = vadd.f32 %v6746_v62, %v9058_v33  ;;  %v6749_v39 = vadd.f32 %v6748_v45, %v6747_v0 }
 0x25a   : > { %v6825_v25 = vadd.f32 %v6824_v30, %v6823_v21 }
 0x25b   : > { %v2969_v23 = vadd.f32 %v6749_v39, %v9060_v53  ;;  %v9104_v12 = vadd.f32 %v6822_v1, %v2966_v18 }
 0x25d   : > { %v6750_v19 = vpop.f32.mrb[52].mxu0  ;;  %v9106_v29 = vadd.f32 %v6825_v25, %v2969_v23 }
 0x25e   : > { %v6826_v38 = vpop.f32.mrb[52].mxu1  ;;  %v6751_v2 = vpop.f32.mrb[53].mxu0 }
 0x25f   : > { %v6827_v24 = vpop.f32.mrb[53].mxu1  ;;  %v6752_v16 = vadd.f32 %v6751_v2, %v6750_v19  ;;  %v6753_v13 = vpop.f32.mrb[54].mxu0 }
 0x260   : > { %v6828_v27 = vadd.f32 %v6827_v24, %v6826_v38  ;;  %v6829_v9 = vpop.f32.mrb[54].mxu1  ;;  %v6754_v40 = vpop.f32.mrb[55].mxu0 }
 0x261   : > { %v6830_v3 = vpop.f32.mrb[55].mxu1  ;;  %v2974_v33 = vadd.f32 %v6752_v16, %v9062_v60  ;;  %v6755_v42 = vadd.f32 %v6754_v40, %v6753_v13 }
 0x262   : > { %v6831_v7 = vadd.f32 %v6830_v3, %v6829_v9 }
 0x263   : > { %v2977_v53 = vadd.f32 %v6755_v42, %v9064_v48  ;;  %v9110_v28 = vadd.f32 %v6828_v27, %v2974_v33 }
 0x265   : > { %v6756_v49 = vpop.f32.mrb[56].mxu0  ;;  %v9112_v4 = vadd.f32 %v6831_v7, %v2977_v53 }
 0x266   : > { %v6832_v26 = vpop.f32.mrb[56].mxu1  ;;  %v6757_v52 = vpop.f32.mrb[57].mxu0 }
 0x267   : > { %v6833_v37 = vpop.f32.mrb[57].mxu1  ;;  %v6758_v54 = vadd.f32 %v6757_v52, %v6756_v49  ;;  %v6759_v8 = vpop.f32.mrb[58].mxu0 }
 0x268   : > { %v6834_v51 = vadd.f32 %v6833_v37, %v6832_v26  ;;  %v6835_v14 = vpop.f32.mrb[58].mxu1  ;;  %v6760_v61 = vpop.f32.mrb[59].mxu0 }
 0x269   : > { %v6836_v50 = vpop.f32.mrb[59].mxu1  ;;  %v2982_v60 = vadd.f32 %v6758_v54, %v9066_v20  ;;  %v6761_v43 = vadd.f32 %v6760_v61, %v6759_v8 }
 0x26a   : > { %v6837_v44 = vadd.f32 %v6836_v50, %v6835_v14 }
 0x26b   : > { %v2985_v48 = vadd.f32 %v6761_v43, %v9068_v57  ;;  %v9116_v31 = vadd.f32 %v6834_v51, %v2982_v60 }
 0x26d   : > { %v6762_v15 = vpop.f32.mrb[60].mxu0  ;;  %v9118_v21 = vadd.f32 %v6837_v44, %v2985_v48 }
 0x26e   : > { %v6838_v11 = vpop.f32.mrb[60].mxu1  ;;  %v6763_v59 = vpop.f32.mrb[61].mxu0 }
 0x26f   : > { %v6839_v55 = vpop.f32.mrb[61].mxu1  ;;  %v6764_v62 = vadd.f32 %v6763_v59, %v6762_v15  ;;  %v6765_v0 = vpop.f32.mrb[62].mxu0 }
 0x270   : > { %v6840_v35 = vadd.f32 %v6839_v55, %v6838_v11  ;;  %v6841_v1 = vpop.f32.mrb[62].mxu1  ;;  %v6766_v45 = vpop.f32.mrb[63].mxu0 }
 0x271   : > { %v6842_v30 = vpop.f32.mrb[63].mxu1  ;;  %v2990_v20 = vadd.f32 %v6764_v62, %v9070_v47  ;;  %v6767_v18 = vadd.f32 %v6766_v45, %v6765_v0 }
 0x272   : > { %v6843_v25 = vadd.f32 %v6842_v30, %v6841_v1 }
 0x273   : > { %v2993_v57 = vadd.f32 %v6767_v18, %v9072_v6  ;;  %v9122_v23 = vadd.f32 %v6840_v35, %v2990_v20 }
 0x275   : > { %v6768_v24 = vpop.f32.mrb[64].mxu0  ;;  %v9124_v9 = vadd.f32 %v6843_v25, %v2993_v57 }
 0x276   : > { %v6844_v39 = vpop.f32.mrb[64].mxu1  ;;  %v6769_v2 = vpop.f32.mrb[65].mxu0 }
 0x277   : > { %v6845_v38 = vpop.f32.mrb[65].mxu1  ;;  %v6770_v16 = vadd.f32 %v6769_v2, %v6768_v24  ;;  %v6771_v13 = vpop.f32.mrb[66].mxu0 }
 0x278   : > { %v6846_v19 = vadd.f32 %v6845_v38, %v6844_v39  ;;  %v6847_v27 = vpop.f32.mrb[66].mxu1  ;;  %v6772_v40 = vpop.f32.mrb[67].mxu0 }
 0x279   : > { %v6848_v3 = vpop.f32.mrb[67].mxu1  ;;  %v2998_v47 = vadd.f32 %v6770_v16, %v9074_v63  ;;  %v6773_v33 = vadd.f32 %v6772_v40, %v6771_v13 }
 0x27a   : > { %v6849_v7 = vadd.f32 %v6848_v3, %v6847_v27 }
 0x27b   : > { %v3001_v6 = vadd.f32 %v6773_v33, %v9076_v34  ;;  %v9128_v53 = vadd.f32 %v6846_v19, %v2998_v47 }
 0x27d   : > { %v6774_v37 = vpop.f32.mrb[68].mxu0  ;;  %v9130_v14 = vadd.f32 %v6849_v7, %v3001_v6 }
 0x27e   : > { %v6850_v42 = vpop.f32.mrb[68].mxu1  ;;  %v6775_v52 = vpop.f32.mrb[69].mxu0 }
 0x27f   : > { %v6851_v26 = vpop.f32.mrb[69].mxu1  ;;  %v6776_v54 = vadd.f32 %v6775_v52, %v6774_v37  ;;  %v6777_v8 = vpop.f32.mrb[70].mxu0 }
 0x280   : > { %v6852_v49 = vadd.f32 %v6851_v26, %v6850_v42  ;;  %v6853_v51 = vpop.f32.mrb[70].mxu1  ;;  %v6778_v61 = vpop.f32.mrb[71].mxu0  ;;  %v9151_v42 = vld [vmem:[%s9968_s2] ss:$0 sm:$0xff] }
 0x281   : > { %v6854_v50 = vpop.f32.mrb[71].mxu1  ;;  %v3006_v63 = vadd.f32 %v6776_v54, %v9078_v56  ;;  %v6779_v60 = vadd.f32 %v6778_v61, %v6777_v8 }
 0x282   : > { %v6855_v44 = vadd.f32 %v6854_v50, %v6853_v51 }
 0x283   : > { %v3009_v34 = vadd.f32 %v6779_v60, %v9080_v46  ;;  %v9134_v48 = vadd.f32 %v6852_v49, %v3006_v63 }
 0x285   : > { %v6780_v55 = vpop.f32.mrb[72].mxu0  ;;  %v9136_v1 = vadd.f32 %v6855_v44, %v3009_v34 }
 0x286   : > { %v6856_v43 = vpop.f32.mrb[72].mxu1  ;;  %v6781_v59 = vpop.f32.mrb[73].mxu0 }
 0x287   : > { %v6857_v11 = vpop.f32.mrb[73].mxu1  ;;  %v6782_v62 = vadd.f32 %v6781_v59, %v6780_v55  ;;  %v6783_v0 = vpop.f32.mrb[74].mxu0 }
 0x288   : > { %v6858_v15 = vadd.f32 %v6857_v11, %v6856_v43  ;;  %v6859_v35 = vpop.f32.mrb[74].mxu1  ;;  %v6784_v45 = vpop.f32.mrb[75].mxu0 }
 0x289   : > { %v6860_v30 = vpop.f32.mrb[75].mxu1  ;;  %v3014_v56 = vadd.f32 %v6782_v62, %v9082_v32  ;;  %v6785_v20 = vadd.f32 %v6784_v45, %v6783_v0 }
 0x28a   : > { %v6861_v25 = vadd.f32 %v6860_v30, %v6859_v35 }
 0x28b   : > { %v3017_v46 = vadd.f32 %v6785_v20, %v9084_v58  ;;  %v9140_v57 = vadd.f32 %v6858_v15, %v3014_v56 }
 0x28d   : > { %v6786_v38 = vpop.f32.mrb[76].mxu0  ;;  %v9142_v27 = vadd.f32 %v6861_v25, %v3017_v46 }
 0x28e   : > { %v6862_v18 = vpop.f32.mrb[76].mxu1  ;;  %v6787_v2 = vpop.f32.mrb[77].mxu0 }
 0x28f   : > { %v6863_v39 = vpop.f32.mrb[77].mxu1  ;;  %v6788_v16 = vadd.f32 %v6787_v2, %v6786_v38  ;;  %v6789_v13 = vpop.f32.mrb[78].mxu0 }
 0x290   : > { %v6864_v24 = vadd.f32 %v6863_v39, %v6862_v18  ;;  %v6865_v19 = vpop.f32.mrb[78].mxu1  ;;  %v6790_v40 = vpop.f32.mrb[79].mxu0 }
 0x291   : > { %v6866_v3 = vpop.f32.mrb[79].mxu1  ;;  %v3022_v32 = vadd.f32 %v6788_v16, %v9086_v10  ;;  %v6791_v47 = vadd.f32 %v6790_v40, %v6789_v13  ;;  %v9159_v10 = vld [vmem:[%s9969_s3] ss:$0 sm:$0xff] }
 0x292   : > { %v6867_v7 = vadd.f32 %v6866_v3, %v6865_v19 }
 0x293   : > { %v3025_v58 = vadd.f32 %v6791_v47, %v9088_v22  ;;  %v9146_v33 = vadd.f32 %v6864_v24, %v3022_v32 }
 0x295   : > { %v7176_v6 = vpop.f32.mrb[80].mxu0  ;;  %v9153_v26 = vadd.f32 %v6867_v7, %v3025_v58 }
 0x296   : > { %v3184_v37 = vadd.f32 %v7176_v6, %v9098_v36  ;;  %v3175_v49 = vpop.f32.mrb[81].mxu0 }
 0x297   : > { %v3176_v22 = vadd.f32 %v3175_v49, %v9092_v41  ;;  %v7177_v51 = vpop.f32.mrb[82].mxu0 }
 0x298   : > { %v3263_v52 = vmul.f32 %v9151_v42, %v3184_v37  ;;  %v3187_v50 = vadd.f32 %v7177_v51, %v9100_v5  ;;  %v3178_v54 = vpop.f32.mrb[83].mxu0 }
 0x299   : > { %v3261_v8 = vmul.f32 %v9151_v42, %v3176_v22  ;;  %v3179_v44 = vadd.f32 %v3178_v54, %v9094_v17 }
 0x29a   : > { %v9167_v36 = vadd.f32 %v9159_v10, %v3263_v52  ;;  %v3264_v61 = vmul.f32 %v9151_v42, %v3187_v50 }
 0x29b   : > { %v9171_v63 = vadd.f32 %v9159_v10, %v3261_v8  ;;  %v3262_v41 = vmul.f32 %v9151_v42, %v3179_v44 }
 0x29c   : > { %v6298_v60 = vmul.f32 -1.442695, %v9167_v36  ;;  %v9176_v34 = vadd.f32 %v9159_v10, %v3264_v61 }
 0x29d   : > { %v6296_v5 = vmul.f32 -1.442695, %v9171_v63  ;;  %v9180_v43 = vadd.f32 %v9159_v10, %v3262_v41  ;;  %v7180_v17 = vpop.f32.mrb[84].mxu0 }
 0x29e   : > { %7520 = vpow2.f32 %v6298_v60  ;;  %v6299_v11 = vmul.f32 -1.442695, %v9176_v34  ;;  %v3200_v55 = vadd.f32 %v7180_v17, %v9110_v28  ;;  %v3191_v15 = vpop.f32.mrb[85].mxu0 }
 0x29f   : > { %7522 = vpow2.f32 %v6296_v5  ;;  %v6297_v35 = vmul.f32 -1.442695, %v9180_v43  ;;  %v3192_v59 = vadd.f32 %v3191_v15, %v9104_v12  ;;  %v7181_v30 = vpop.f32.mrb[86].mxu0 }
 0x2a0   : > { %7524 = vpow2.f32 %v6299_v11  ;;  %v3267_v62 = vmul.f32 %v9151_v42, %v3200_v55  ;;  %v3203_v0 = vadd.f32 %v7181_v30, %v9112_v4  ;;  %v3194_v25 = vpop.f32.mrb[87].mxu0 }
 0x2a1   : > { %7526 = vpow2.f32 %v6297_v35  ;;  %v3265_v45 = vmul.f32 %v9151_v42, %v3192_v59  ;;  %v3195_v56 = vadd.f32 %v3194_v25, %v9106_v29 }
 0x2a2   : > { %v9191_v28 = vadd.f32 %v9159_v10, %v3267_v62  ;;  %v3268_v20 = vmul.f32 %v9151_v42, %v3203_v0 }
 0x2a3   : > { %v9195_v46 = vadd.f32 %v9159_v10, %v3265_v45  ;;  %v3266_v12 = vmul.f32 %v9151_v42, %v3195_v56 }
 0x2a4   : > { %v6302_v18 = vmul.f32 -1.442695, %v9191_v28  ;;  %v9200_v4 = vadd.f32 %v9159_v10, %v3268_v20 }
 0x2a5   : > { %v6300_v39 = vmul.f32 -1.442695, %v9195_v46  ;;  %v9204_v38 = vadd.f32 %v9159_v10, %v3266_v12  ;;  %v7184_v29 = vpop.f32.mrb[88].mxu0 }
 0x2a6   : > { %7528 = vpow2.f32 %v6302_v18  ;;  %v6303_v24 = vmul.f32 -1.442695, %v9200_v4  ;;  %v3216_v19 = vadd.f32 %v7184_v29, %v9122_v23  ;;  %v3207_v2 = vpop.f32.mrb[89].mxu0 }
 0x2a7   : > { %7530 = vpow2.f32 %v6300_v39  ;;  %v6301_v3 = vmul.f32 -1.442695, %v9204_v38  ;;  %v3208_v16 = vadd.f32 %v3207_v2, %v9116_v31  ;;  %v7185_v13 = vpop.f32.mrb[90].mxu0 }
 0x2a8   : > { %v7521_v7 = vpop.eup %7520  ;;  %7532 = vpow2.f32 %v6303_v24  ;;  %v3271_v40 = vmul.f32 %v9151_v42, %v3216_v19  ;;  %v3219_v32 = vadd.f32 %v7185_v13, %v9124_v9  ;;  %v3210_v47 = vpop.f32.mrb[91].mxu0 }
 0x2a9   : > { %v7523_v58 = vpop.eup %7522  ;;  %v3370_v6 = vadd.f32 1.0, %v7521_v7  ;;  %7534 = vpow2.f32 %v6301_v3  ;;  %v3269_v37 = vmul.f32 %v9151_v42, %v3208_v16  ;;  %v3211_v23 = vadd.f32 %v3210_v47, %v9118_v21 }
 0x2aa   : > { %v7525_v49 = vpop.eup %7524  ;;  %v3368_v22 = vadd.f32 1.0, %v7523_v58  ;;  %v9215_v51 = vadd.f32 %v9159_v10, %v3271_v40  ;;  %v3272_v31 = vmul.f32 %v9151_v42, %v3219_v32 }
 0x2ab   : > { %v7527_v52 = vpop.eup %7526  ;;  %7536 = vrcp.f32 %v3370_v6  ;;  %v3371_v50 = vadd.f32 1.0, %v7525_v49  ;;  %v9219_v9 = vadd.f32 %v9159_v10, %v3269_v37  ;;  %v3270_v54 = vmul.f32 %v9151_v42, %v3211_v23 }
 0x2ac   : > { %7538 = vrcp.f32 %v3368_v22  ;;  %v3369_v8 = vadd.f32 1.0, %v7527_v52  ;;  %v6306_v44 = vmul.f32 -1.442695, %v9215_v51  ;;  %v9224_v21 = vadd.f32 %v9159_v10, %v3272_v31 }
 0x2ad   : > { %7540 = vrcp.f32 %v3371_v50  ;;  %v6304_v61 = vmul.f32 -1.442695, %v9219_v9  ;;  %v9228_v41 = vadd.f32 %v9159_v10, %v3270_v54  ;;  %v7188_v60 = vpop.f32.mrb[92].mxu0 }
 0x2ae   : > { %7542 = vrcp.f32 %v3369_v8  ;;  %v6307_v5 = vmul.f32 -1.442695, %v9224_v21  ;;  %v3232_v17 = vadd.f32 %v7188_v60, %v9134_v48  ;;  %v3223_v11 = vpop.f32.mrb[93].mxu0 }
 0x2af   : > { %7544 = vpow2.f32 %v6306_v44  ;;  %v6305_v55 = vmul.f32 -1.442695, %v9228_v41  ;;  %v3224_v15 = vadd.f32 %v3223_v11, %v9128_v53  ;;  %v7189_v35 = vpop.f32.mrb[94].mxu0 }
 0x2b0   : > { %v7529_v59 = vpop.eup %7528  ;;  %7546 = vpow2.f32 %v6304_v61  ;;  %v3275_v30 = vmul.f32 %v9151_v42, %v3232_v17  ;;  %v3235_v62 = vadd.f32 %v7189_v35, %v9136_v1  ;;  %v3226_v0 = vpop.f32.mrb[95].mxu0 }
 0x2b1   : > { %v7531_v25 = vpop.eup %7530  ;;  %v3374_v45 = vadd.f32 1.0, %v7529_v59  ;;  %7548 = vpow2.f32 %v6307_v5  ;;  %v3273_v56 = vmul.f32 %v9151_v42, %v3224_v15  ;;  %v3227_v48 = vadd.f32 %v3226_v0, %v9130_v14 }
 0x2b2   : > { %v7533_v20 = vpop.eup %7532  ;;  %v3372_v12 = vadd.f32 1.0, %v7531_v25  ;;  %7550 = vpow2.f32 %v6305_v55  ;;  %v9239_v53 = vadd.f32 %v9159_v10, %v3275_v30  ;;  %v3276_v18 = vmul.f32 %v9151_v42, %v3235_v62 }
 0x2b3   : > { %v7535_v39 = vpop.eup %7534  ;;  %7552 = vrcp.f32 %v3374_v45  ;;  %v3375_v1 = vadd.f32 1.0, %v7533_v20  ;;  %v9243_v29 = vadd.f32 %v9159_v10, %v3273_v56  ;;  %v3274_v24 = vmul.f32 %v9151_v42, %v3227_v48  ;;  %v3723_v45 = vld [vmem:[#allocation3 + $0xc] sm:$0xf] }
 0x2b4   : > { %7554 = vrcp.f32 %v3372_v12  ;;  %v3373_v14 = vadd.f32 1.0, %v7535_v39  ;;  %v6310_v19 = vmul.f32 -1.442695, %v9239_v53  ;;  %v9248_v2 = vadd.f32 %v9159_v10, %v3276_v18 }
 0x2b5   : > { %v7537_v3 = vpop.eup %7536  ;;  %7556 = vrcp.f32 %v3375_v1  ;;  %v6308_v16 = vmul.f32 -1.442695, %v9243_v29  ;;  %v9252_v13 = vadd.f32 %v9159_v10, %v3274_v24  ;;  %v7192_v7 = vpop.f32.mrb[96].mxu0  ;;  %v3714_v1 = vld [vmem:[#allocation3] sm:$0xf] }
 0x2b6   : > { %v7539_v40 = vpop.eup %7538  ;;  %v3430_v32 = vmul.f32 %v7537_v3, %v9167_v36  ;;  %7558 = vrcp.f32 %v3373_v14  ;;  %v6311_v47 = vmul.f32 -1.442695, %v9248_v2  ;;  %v3248_v58 = vadd.f32 %v7192_v7, %v9146_v33  ;;  %v3239_v6 = vpop.f32.mrb[97].mxu0 }
 0x2b7   : > { %v7541_v37 = vpop.eup %7540  ;;  %v3428_v23 = vmul.f32 %v7539_v40, %v9171_v63  ;;  %7560 = vpow2.f32 %v6310_v19  ;;  %v9259_v49 = vadd.f32 %v3239_v6, %v9140_v57  ;;  %v9261_v22 = vpop.f32.mrb[98].mxu0  ;;  %v9265_v50 = vmul.f32 -1.442695, %v9252_v13 }
 0x2b8   : > { %v7543_v31 = vpop.eup %7542  ;;  %v6544_v52 = vpack.c.bf16 %v3430_v32, %v3430_v32  ;;  %v3431_v36 = vmul.f32 %v7541_v37, %v9176_v34  ;;  %7562 = vpow2.f32 %v6308_v16  ;;  %v9267_v33 = vpop.f32.mrb[99].mxu0  ;;  %v9271_v57 = vmul.f32 %v9151_v42, %v3248_v58  ;;  %v3727_v32 = vld [vmem:[#allocation3 + $0x14] sm:$0x1] }
 0x2b9   : > { %v7545_v54 = vpop.eup %7544  ;;  %v6542_v8 = vpack.c.bf16 %v3428_v23, %v3428_v23  ;;  %v3429_v63 = vmul.f32 %v7543_v31, %v9180_v43  ;;  %7564 = vpow2.f32 %v6311_v47 }
 0x2ba   : > { %v7547_v44 = vpop.eup %7546  ;;  %v3529_v61 = vshrl.u32 %v6544_v52, 16  ;;  %v3532_v60 = vshll.u32 %v6544_v52, 16  ;;  %v6545_v5 = vpack.c.bf16 %v3431_v36, %v3431_v36  ;;  %v3378_v17 = vadd.f32 1.0, %v7545_v54 }
 0x2bb   : > { %v7549_v34 = vpop.eup %7548  ;;  %v3512_v11 = vshrl.u32 %v6542_v8, 16  ;;  %v3515_v55 = vshll.u32 %v6542_v8, 16  ;;  %v6543_v15 = vpack.c.bf16 %v3429_v63, %v3429_v63  ;;  %v3376_v35 = vadd.f32 1.0, %v7547_v44 }
 0x2bc   : > { %v7551_v59 = vpop.eup %7550  ;;  %v3531_v30 = vrot.slane %v3529_v61, 7  ;;  %v3537_v62 = vshrl.u32 %v6545_v5, 16  ;;  %v3540_v0 = vshll.u32 %v6545_v5, 16  ;;  %7566 = vrcp.f32 %v3378_v17 }
 0x2bd   : > { %v7553_v43 = vpop.eup %7552  ;;  %v3514_v56 = vrot.slane %v3512_v11, 7  ;;  %v3520_v48 = vshrl.u32 %v6543_v15, 16  ;;  %v3523_v20 = vshll.u32 %v6543_v15, 16  ;;  %7568 = vrcp.f32 %v3376_v35 }
 0x2be   : > { %v7555_v12 = vpop.eup %7554  ;;  %v3534_v18 = vor.u32 %v3532_v60, %v3531_v30  ;;  %v3535_v39 = vrot.slane %v3531_v30, 4  ;;  %v3539_v24 = vrot.slane %v3537_v62, 7  ;;  %v3434_v19 = vmul.f32 %v7553_v43, %v9191_v28  ;;  %v3720_v28 = vld [vmem:[#allocation3 + $0x8] sm:$0x1] }
 0x2bf   : > { %v7557_v3 = vpop.eup %7556  ;;  %v3517_v16 = vor.u32 %v3515_v55, %v3514_v56  ;;  %v3518_v7 = vrot.slane %v3514_v56, 4  ;;  %v3522_v47 = vrot.slane %v3520_v48, 7  ;;  %v3432_v58 = vmul.f32 %v7555_v12, %v9195_v46 }
 0x2c0   : > { %v7559_v6 = vpop.eup %7558  ;;  %v3724_v37 = vsel %vm9275_vm0, %v3534_v18, %v3723_v45  ;;  %v3542_v23 = vor.u32 %v3540_v0, %v3539_v24  ;;  %v3544_v31 = vrot.slane %v3539_v24, 4  ;;  %v6548_v52 = vpack.c.bf16 %v3434_v19, %v3434_v19  ;;  %v3737_v45 = vld [vmem:[#allocation3 + $0x24] sm:$0xf] }
 0x2c1   : > { %v7561_v36 = vpop.eup %7560  ;;  %3725 = vst [vmem:[#allocation3 + $0xc] sm:$0xf] %v3724_v37  ;;  %v3715_v54 = vsel %vm9275_vm0, %v3517_v16, %v3714_v1  ;;  %v3525_v8 = vor.u32 %v3523_v20, %v3522_v47  ;;  %v3527_v63 = vrot.slane %v3522_v47, 4  ;;  %v6546_v44 = vpack.c.bf16 %v3432_v58, %v3432_v58  ;;  %v3730_v1 = vld [vmem:[#allocation3 + $0x18] sm:$0xf] }
 0x2c2   : > { %v7563_v61 = vpop.eup %7562  ;;  %3716 = vst [vmem:[#allocation3] sm:$0xf] %v3715_v54  ;;  %v3543_v46 = vsel %vm9288_vm2, %v3535_v39, %v3542_v23  ;;  %v3728_v60 = vsel %vm9281_vm1, %v3544_v31, %v3727_v32  ;;  %v3563_v5 = vshrl.u32 %v6548_v52, 16  ;;  %v9303_v17 = vmul.f32 %v9151_v42, %v9259_v49 }
 0x2c3   : > { %v7565_v11 = vpop.eup %7564  ;;  %3726 = vst [vmem:[#allocation3 + $0x10] sm:$0xf] %v3543_v46  ;;  %3729 = vst [vmem:[#allocation3 + $0x14] sm:$0x1] %v3728_v60  ;;  %v3526_v55 = vsel %vm9288_vm2, %v3518_v7, %v3525_v8  ;;  %v3721_v15 = vsel %vm9281_vm1, %v3527_v63, %v3720_v28  ;;  %v3566_v35 = vshll.u32 %v6548_v52, 16  ;;  %v3546_v30 = vshrl.u32 %v6546_v44, 16 }
 0x2c4   : > { %3717 = vst [vmem:[#allocation3 + $0x4] sm:$0xf] %v3526_v55  ;;  %3722 = vst [vmem:[#allocation3 + $0x8] sm:$0x1] %v3721_v15  ;;  %v3565_v62 = vrot.slane %v3563_v5, 7  ;;  %v3435_v0 = vmul.f32 %v7557_v3, %v9200_v4  ;;  %v3433_v43 = vmul.f32 %v7559_v6, %v9204_v38  ;;  %v3379_v49 = vadd.f32 1.0, %v7549_v34 }
 0x2c5   : > { %v3548_v56 = vrot.slane %v3546_v30, 7  ;;  %v3549_v48 = vshll.u32 %v6546_v44, 16  ;;  %v3377_v20 = vadd.f32 1.0, %v7551_v59  ;;  %v3382_v12 = vadd.f32 1.0, %v7561_v36  ;;  %v3734_v36 = vld [vmem:[#allocation3 + $0x20] sm:$0x1] }
 0x2c6   : > { %v7567_v18 = vpop.eup %7566  ;;  %v3568_v39 = vor.u32 %v3566_v35, %v3565_v62  ;;  %v6549_v24 = vpack.c.bf16 %v3435_v0, %v3435_v0  ;;  %v6547_v19 = vpack.c.bf16 %v3433_v43, %v3433_v43  ;;  %v3380_v16 = vadd.f32 1.0, %v7563_v61 }
 0x2c7   : > { %v7569_v7 = vpop.eup %7568  ;;  %v3569_v32 = vrot.slane %v3565_v62, 4  ;;  %v3551_v47 = vor.u32 %v3549_v48, %v3548_v56  ;;  %v3438_v58 = vmul.f32 %v7567_v18, %v9215_v51  ;;  %7570 = vrcp.f32 %v3379_v49  ;;  %v3741_v51 = vld [vmem:[#allocation3 + $0x2c] sm:$0x1]  ;;  %v3751_v62 = vld [vmem:[#allocation3 + $0x3c] sm:$0xf] }
 0x2c8   : > { %v3738_v4 = vsel %vm9275_vm0, %v3568_v39, %v3737_v45  ;;  %v3552_v38 = vrot.slane %v3548_v56, 4  ;;  %v3571_v34 = vshrl.u32 %v6549_v24, 16  ;;  %v3554_v3 = vshrl.u32 %v6547_v19, 16  ;;  %v3744_v45 = vld [vmem:[#allocation3 + $0x30] sm:$0xf] }
 0x2c9   : > { %3739 = vst [vmem:[#allocation3 + $0x24] sm:$0xf] %v3738_v4  ;;  %v3731_v59 = vsel %vm9275_vm0, %v3551_v47, %v3730_v1  ;;  %v3574_v6 = vshll.u32 %v6549_v24, 16  ;;  %v6552_v37 = vpack.c.bf16 %v3438_v58, %v3438_v58  ;;  %v3436_v23 = vmul.f32 %v7569_v7, %v9219_v9 }
 0x2ca   : > { %3732 = vst [vmem:[#allocation3 + $0x18] sm:$0xf] %v3731_v59  ;;  %v3573_v31 = vrot.slane %v3571_v34, 7  ;;  %v3556_v28 = vrot.slane %v3554_v3, 7  ;;  %v3557_v52 = vshll.u32 %v6547_v19, 16  ;;  %7572 = vrcp.f32 %v3377_v20 }
 0x2cb   : > { %v3597_v54 = vshrl.u32 %v6552_v37, 16  ;;  %v6550_v8 = vpack.c.bf16 %v3436_v23, %v3436_v23  ;;  %7574 = vrcp.f32 %v3382_v12  ;;  %v3383_v63 = vadd.f32 1.0, %v7565_v11 }
 0x2cc   : > { %v3576_v44 = vor.u32 %v3574_v6, %v3573_v31  ;;  %v3578_v61 = vrot.slane %v3573_v31, 4  ;;  %v3559_v46 = vor.u32 %v3557_v52, %v3556_v28  ;;  %v3561_v60 = vrot.slane %v3556_v28, 4 }
 0x2cd   : > { %v9317_v5 = vrot.slane %v3597_v54, 7  ;;  %v3600_v55 = vshll.u32 %v6552_v37, 16  ;;  %v3580_v15 = vshrl.u32 %v6550_v8, 16  ;;  %7576 = vrcp.f32 %v3380_v16 }
 0x2ce   : > { %v3577_v9 = vsel %vm9288_vm2, %v3569_v32, %v3576_v44  ;;  %v3742_v35 = vsel %vm9281_vm1, %v3578_v61, %v3741_v51  ;;  %v3560_v30 = vsel %vm9288_vm2, %v3552_v38, %v3559_v46  ;;  %v3735_v11 = vsel %vm9281_vm1, %v3561_v60, %v3734_v36  ;;  %v3748_v61 = vld [vmem:[#allocation3 + $0x38] sm:$0x1] }
 0x2cf   : > { %3740 = vst [vmem:[#allocation3 + $0x28] sm:$0xf] %v3577_v9  ;;  %3743 = vst [vmem:[#allocation3 + $0x2c] sm:$0x1] %v3742_v35  ;;  %v3602_v0 = vor.u32 %v3600_v55, %v9317_v5  ;;  %v9328_v43 = vrot.slane %v3580_v15, 7  ;;  %v3583_v49 = vshll.u32 %v6550_v8, 16  ;;  %7578 = vrcp.f32 %v3383_v63 }
 0x2d0   : > { %3733 = vst [vmem:[#allocation3 + $0x1c] sm:$0xf] %v3560_v30  ;;  %3736 = vst [vmem:[#allocation3 + $0x20] sm:$0x1] %v3735_v11  ;;  %7580 = vpow2.f32 %v9265_v50  ;;  %v9333_v56 = vadd.f32 %v9159_v10, %v9271_v57  ;;  %v9337_v48 = vadd.f32 %v9159_v10, %v9303_v17  ;;  %v3251_v20 = vadd.f32 %v9261_v22, %v9153_v26  ;;  %v3765_v9 = vld [vmem:[#allocation3 + $0x54] sm:$0xf] }
 0x2d1   : > { %v7571_v12 = vpop.eup %7570  ;;  %v3752_v18 = vsel %vm9275_vm0, %v3602_v0, %v3751_v62  ;;  %v3585_v39 = vor.u32 %v3583_v49, %v9328_v43  ;;  %v3243_v50 = vadd.f32 %v9267_v33, %v9142_v27  ;;  %v3603_v37 = vrot.slane %v9317_v5, 4 }
 0x2d2   : > { %3753 = vst [vmem:[#allocation3 + $0x3c] sm:$0xf] %v3752_v18  ;;  %v3439_v57 = vmul.f32 %v7571_v12, %v9224_v21  ;;  %v6314_v1 = vmul.f32 -1.442695, %v9333_v56  ;;  %v6312_v17 = vmul.f32 -1.442695, %v9337_v48  ;;  %v3280_v24 = vmul.f32 %v9151_v42, %v3251_v20 }
 0x2d3   : > { %v3745_v26 = vsel %vm9275_vm0, %v3585_v39, %v3744_v45  ;;  %v3278_v22 = vmul.f32 %v9151_v42, %v3243_v50  ;;  %v3586_v5 = vrot.slane %v9328_v43, 4  ;;  %v3758_v18 = vld [vmem:[#allocation3 + $0x48] sm:$0xf] }
 0x2d4   : > { %v7573_v19 = vpop.eup %7572  ;;  %3746 = vst [vmem:[#allocation3 + $0x30] sm:$0xf] %v3745_v26  ;;  %v6553_v16 = vpack.c.bf16 %v3439_v57, %v3439_v57  ;;  %7582 = vpow2.f32 %v6314_v1  ;;  %v9354_v27 = vadd.f32 %v9159_v10, %v3280_v24 }
 0x2d5   : > { %v7575_v33 = vpop.eup %7574  ;;  %v3437_v21 = vmul.f32 %v7573_v19, %v9228_v41  ;;  %7584 = vpow2.f32 %v6312_v17  ;;  %v9358_v7 = vadd.f32 %v9159_v10, %v3278_v22  ;;  %v3755_v10 = vld [vmem:[#allocation3 + $0x44] sm:$0x1]  ;;  %v3769_v19 = vld [vmem:[#allocation3 + $0x5c] sm:$0x1] }
 0x2d6   : > { %v3605_v32 = vshrl.u32 %v6553_v16, 16  ;;  %v3442_v47 = vmul.f32 %v7575_v33, %v9239_v53  ;;  %v6315_v58 = vmul.f32 -1.442695, %v9354_v27  ;;  %v3608_v4 = vshll.u32 %v6553_v16, 16 }
 0x2d7   : > { %v7577_v42 = vpop.eup %7576  ;;  %v6551_v38 = vpack.c.bf16 %v3437_v21, %v3437_v21  ;;  %v6313_v34 = vmul.f32 -1.442695, %v9358_v7 }
 0x2d8   : > { %v3607_v3 = vrot.slane %v3605_v32, 7  ;;  %v6556_v59 = vpack.c.bf16 %v3442_v47, %v3442_v47  ;;  %v3440_v6 = vmul.f32 %v7577_v42, %v9243_v29  ;;  %7586 = vpow2.f32 %v6315_v58 }
 0x2d9   : > { %v7579_v41 = vpop.eup %7578  ;;  %v3588_v23 = vshrl.u32 %v6551_v38, 16  ;;  %7588 = vpow2.f32 %v6313_v34  ;;  %v3591_v52 = vshll.u32 %v6551_v38, 16 }
 0x2da   : > { %v7581_v31 = vpop.eup %7580  ;;  %v3610_v53 = vor.u32 %v3608_v4, %v3607_v3  ;;  %v3612_v28 = vrot.slane %v3607_v3, 4  ;;  %v3631_v51 = vshrl.u32 %v6556_v59, 16  ;;  %v6554_v54 = vpack.c.bf16 %v3440_v6, %v3440_v6 }
 0x2db   : > { %v3590_v36 = vrot.slane %v3588_v23, 7  ;;  %v3443_v8 = vmul.f32 %v7579_v41, %v9248_v2  ;;  %v3381_v63 = vadd.f32 1.0, %v7581_v31  ;;  %v3634_v60 = vshll.u32 %v6556_v59, 16 }
 0x2dc   : > { %v3611_v29 = vsel %vm9288_vm2, %v3603_v37, %v3610_v53  ;;  %v3756_v44 = vsel %vm9281_vm1, %v3612_v28, %v3755_v10  ;;  %v3633_v46 = vrot.slane %v3631_v51, 7  ;;  %v3614_v35 = vshrl.u32 %v6554_v54, 16  ;;  %v3762_v51 = vld [vmem:[#allocation3 + $0x50] sm:$0x1] }
 0x2dd   : > { %3754 = vst [vmem:[#allocation3 + $0x40] sm:$0xf] %v3611_v29  ;;  %3757 = vst [vmem:[#allocation3 + $0x44] sm:$0x1] %v3756_v44  ;;  %v3593_v55 = vor.u32 %v3591_v52, %v3590_v36  ;;  %v3595_v15 = vrot.slane %v3590_v36, 4  ;;  %v3617_v11 = vshll.u32 %v6554_v54, 16  ;;  %v6557_v62 = vpack.c.bf16 %v3443_v8, %v3443_v8 }
 0x2de   : > { %v7583_v30 = vpop.eup %7582  ;;  %v3636_v2 = vor.u32 %v3634_v60, %v3633_v46  ;;  %7590 = vrcp.f32 %v3381_v63  ;;  %v3616_v20 = vrot.slane %v3614_v35, 7  ;;  %v3637_v33 = vrot.slane %v3633_v46, 4 }
 0x2df   : > { %v7585_v0 = vpop.eup %7584  ;;  %v3594_v49 = vsel %vm9288_vm2, %v3586_v5, %v3593_v55  ;;  %v3749_v45 = vsel %vm9281_vm1, %v3595_v15, %v3748_v61  ;;  %v3386_v43 = vadd.f32 1.0, %v7583_v30  ;;  %v3639_v39 = vshrl.u32 %v6557_v62, 16  ;;  %v3779_v5 = vld [vmem:[#allocation3 + $0x6c] sm:$0xf] }
 0x2e0   : > { %3747 = vst [vmem:[#allocation3 + $0x34] sm:$0xf] %v3594_v49  ;;  %3750 = vst [vmem:[#allocation3 + $0x38] sm:$0x1] %v3749_v45  ;;  %v3766_v12 = vsel %vm9275_vm0, %v3636_v2, %v3765_v9  ;;  %v3384_v50 = vadd.f32 1.0, %v7585_v0  ;;  %v3619_v57 = vor.u32 %v3617_v11, %v3616_v20  ;;  %v3642_v24 = vshll.u32 %v6557_v62, 16 }
 0x2e1   : > { %3767 = vst [vmem:[#allocation3 + $0x54] sm:$0xf] %v3766_v12  ;;  %7592 = vrcp.f32 %v3386_v43  ;;  %v3641_v17 = vrot.slane %v3639_v39, 7  ;;  %v3620_v8 = vrot.slane %v3616_v20, 4  ;;  %v3772_v9 = vld [vmem:[#allocation3 + $0x60] sm:$0xf] }
 0x2e2   : > { %v7587_v1 = vpop.eup %7586  ;;  %7594 = vrcp.f32 %v3384_v50  ;;  %v3759_v22 = vsel %vm9275_vm0, %v3619_v57, %v3758_v18  ;;  %v3783_v49 = vld [vmem:[#allocation3 + $0x74] sm:$0x1] }
 0x2e3   : > { %v7589_v26 = vpop.eup %7588  ;;  %v3387_v16 = vadd.f32 1.0, %v7587_v1  ;;  %3760 = vst [vmem:[#allocation3 + $0x48] sm:$0xf] %v3759_v22  ;;  %v3644_v21 = vor.u32 %v3642_v24, %v3641_v17  ;;  %v3646_v32 = vrot.slane %v3641_v17, 4  ;;  %v3776_v1 = vld [vmem:[#allocation3 + $0x68] sm:$0x1] }
 0x2e4   : > { %v3385_v47 = vadd.f32 1.0, %v7589_v26 }
 0x2e5   : > { %7596 = vrcp.f32 %v3387_v16  ;;  %v3645_v58 = vsel %vm9288_vm2, %v3637_v33, %v3644_v21  ;;  %v3770_v42 = vsel %vm9281_vm1, %v3646_v32, %v3769_v19  ;;  %v8030_v19 = vmov (!%p6013_p4), 0  }
 0x2e6   : > { %7598 = vrcp.f32 %v3385_v47  ;;  %3768 = vst [vmem:[#allocation3 + $0x58] sm:$0xf] %v3645_v58  ;;  %3771 = vst [vmem:[#allocation3 + $0x5c] sm:$0x1] %v3770_v42 }
 0x2e7   : > { %3789 = vst [vmem:[#allocation3] sm:$0xf] (!%p6013_p4), %v8030_v19  ;;  %3790 = vst [vmem:[#allocation3 + $0x4] sm:$0xf] (!%p6013_p4), %v8030_v19 }
 0x2e8   : > { %v7591_v4 = vpop.eup %7590  ;;  %3791 = vst [vmem:[#allocation3 + $0x8] sm:$0x1] (!%p6013_p4), %v8030_v19 }
 0x2e9   : > { %v3441_v38 = vmul.f32 %v7591_v4, %v9252_v13 }
 0x2eb   : > { %v7593_v34 = vpop.eup %7592  ;;  %v6555_v3 = vpack.c.bf16 %v3441_v38, %v3441_v38 }
 0x2ec   : > { %v7595_v59 = vpop.eup %7594  ;;  %v3446_v6 = vmul.f32 %v7593_v34, %v9333_v56 }
 0x2ed   : > { %v3622_v41 = vshrl.u32 %v6555_v3, 16  ;;  %v3444_v37 = vmul.f32 %v7595_v59, %v9337_v48  ;;  %v3625_v53 = vshll.u32 %v6555_v3, 16 }
 0x2ee   : > { %v6560_v10 = vpack.c.bf16 %v3446_v6, %v3446_v6 }
 0x2ef   : > { %v7597_v23 = vpop.eup %7596  ;;  %v3624_v31 = vrot.slane %v3622_v41, 7  ;;  %v6558_v28 = vpack.c.bf16 %v3444_v37, %v3444_v37 }
 0x2f0   : > { %v7599_v52 = vpop.eup %7598  ;;  %v3665_v36 = vshrl.u32 %v6560_v10, 16  ;;  %v3447_v54 = vmul.f32 %v7597_v23, %v9354_v27  ;;  %v3668_v61 = vshll.u32 %v6560_v10, 16 }
 0x2f1   : > { %v3627_v13 = vor.u32 %v3625_v53, %v3624_v31  ;;  %v3629_v63 = vrot.slane %v3624_v31, 4  ;;  %v3648_v29 = vshrl.u32 %v6558_v28, 16  ;;  %v3445_v46 = vmul.f32 %v7599_v52, %v9358_v7 }
 0x2f2   : > { %v3667_v44 = vrot.slane %v3665_v36, 7  ;;  %v6561_v56 = vpack.c.bf16 %v3447_v54, %v3447_v54  ;;  %v3651_v15 = vshll.u32 %v6558_v28, 16 }
 0x2f3   : > { %v3628_v48 = vsel %vm9288_vm2, %v3620_v8, %v3627_v13  ;;  %v3763_v60 = vsel %vm9281_vm1, %v3629_v63, %v3762_v51  ;;  %v3650_v55 = vrot.slane %v3648_v29, 7  ;;  %v6559_v2 = vpack.c.bf16 %v3445_v46, %v3445_v46 }
 0x2f4   : > { %3761 = vst [vmem:[#allocation3 + $0x4c] sm:$0xf] %v3628_v48  ;;  %3764 = vst [vmem:[#allocation3 + $0x50] sm:$0x1] %v3763_v60  ;;  %v3670_v27 = vor.u32 %v3668_v61, %v3667_v44  ;;  %v3673_v35 = vshrl.u32 %v6561_v56, 16  ;;  %v3676_v62 = vshll.u32 %v6561_v56, 16 }
 0x2f5   : > { %v3653_v30 = vor.u32 %v3651_v15, %v3650_v55  ;;  %v3656_v45 = vshrl.u32 %v6559_v2, 16  ;;  %v3671_v20 = vrot.slane %v3667_v44, 4  ;;  %v3659_v39 = vshll.u32 %v6559_v2, 16 }
 0x2f6   : > { %v3780_v11 = vsel %vm9275_vm0, %v3670_v27, %v3779_v5  ;;  %v3675_v7 = vrot.slane %v3673_v35, 7  ;;  %v3654_v17 = vrot.slane %v3650_v55, 4  ;;  %3788 = sbr.rel (%p6013_p4) target bundleno = 765 (0x2fd), region = 68 }
 0x2f7   : > { %3781 = vst [vmem:[#allocation3 + $0x6c] sm:$0xf] %v3780_v11  ;;  %v3773_v0 = vsel %vm9275_vm0, %v3653_v30, %v3772_v9  ;;  %v3658_v18 = vrot.slane %v3656_v45, 7 }
 0x2f8   : > { %3774 = vst [vmem:[#allocation3 + $0x60] sm:$0xf] %v3773_v0  ;;  %v3678_v43 = vor.u32 %v3676_v62, %v3675_v7  ;;  %v3680_v12 = vrot.slane %v3675_v7, 4 }
 0x2f9   : > { %v3661_v25 = vor.u32 %v3659_v39, %v3658_v18  ;;  %v3663_v24 = vrot.slane %v3658_v18, 4 }
 0x2fa   : > { %v3679_v50 = vsel %vm9288_vm2, %v3671_v20, %v3678_v43  ;;  %v3784_v57 = vsel %vm9281_vm1, %v3680_v12, %v3783_v49 }
 0x2fb   : > { %3782 = vst [vmem:[#allocation3 + $0x70] sm:$0xf] %v3679_v50  ;;  %3785 = vst [vmem:[#allocation3 + $0x74] sm:$0x1] %v3784_v57  ;;  %v3662_v26 = vsel %vm9288_vm2, %v3654_v17, %v3661_v25  ;;  %v3777_v22 = vsel %vm9281_vm1, %v3663_v24, %v3776_v1 }
 0x2fc   : > { %3775 = vst [vmem:[#allocation3 + $0x64] sm:$0xf] %v3662_v26  ;;  %3778 = vst [vmem:[#allocation3 + $0x68] sm:$0x1] %v3777_v22 }
 0x2fd PF: > { %p6337_p1 = scmp.ne.s32.totalorder %s8004_s30, 1 }
 0x2fe   : > { %v8031_v16 = vmov (!%p6337_p1), 0  }
 0x2ff   : > { %3795 = sbr.rel (%p6337_p1) target bundleno = 774 (0x306), region = 72  ;;  %3797 = vst [vmem:[#allocation3 + $0x6c] sm:$0xf] (!%p6337_p1), %v8031_v16  ;;  %3798 = vst [vmem:[#allocation3 + $0x70] sm:$0xf] (!%p6337_p1), %v8031_v16 }
 0x300   : > { %3799 = vst [vmem:[#allocation3 + $0x74] sm:$0x1] (!%p6337_p1), %v8031_v16 }
 0x306 PF: > { %v7600_v14 = vld [vmem:[#allocation9 + $0x40] sm:$0xff]   ;;  %v7604_v32 = vld [vmem:[#allocation9 + $0x48] sm:$0xff]   ;;  %v7608_v4 = vld [vmem:[#allocation9 + $0x50] sm:$0xff]   ;;  %s6562_s23 = sshll.u32 %s8004_s30, 7  ;;  %s10024_s12 = sld [smem:[#allocation22_spill]] }
 0x307   : > { %v7601_v40 = vld [vmem:[#allocation9 + $0xc0] sm:$0xff]   ;;  %6886 = vmatprep.subr.bf16.mxu1 %v7600_v14  ;;  %v7605_v47 = vld [vmem:[#allocation9 + $0xc8] sm:$0xff]   ;;  %v7609_v38 = vld [vmem:[#allocation9 + $0xd0] sm:$0xff]   ;;  %s9743_s1 = scalar_lea.vmem %s8293_s13, %s6562_s23 [#allocation4]  ;;  %s10025_s13 = sld [smem:[#allocation15_spill]] }
 0x308   : > { %v7602_v33 = vld [vmem:[#allocation9] sm:$0xff]   ;;  %6950 = vmatprep.subr.bf16.mxu0 %v7601_v40  ;;  %v7606_v58 = vld [vmem:[#allocation9 + $0x8] sm:$0xff]   ;;  %v7610_v34 = vld [vmem:[#allocation9 + $0x10] sm:$0xff]   ;;  %s6563_s19 = sshll.u32 %s8004_s30, 4  ;;  %s5880_s18 = sshll.u32 %s8306_s6, 4  ;;  %s9897_s18 = int_to_ptr.vmem [resolvable:$true] %s5880_s18 }
 0x309   : > { %v7603_v21 = vld [vmem:[#allocation9 + $0x80] sm:$0xff]   ;;  %6887 = vmatpush3.bf16.msra.mxu1 %v7602_v33  ;;  %v7607_v42 = vld [vmem:[#allocation9 + $0x88] sm:$0xff]   ;;  %v7611_v3 = vld [vmem:[#allocation9 + $0x90] sm:$0xff]   ;;  %s10026_s30 = sld [smem:[#allocation17_spill]]  ;;  %s10027_s23 = sld [smem:[#allocation23_spill]] }
 0x30a   : > { %6951 = vmatpush3.bf16.msra.mxu0 %v7603_v21  ;;  %6888 = vmatprep.subr.bf16.mxu1 %v7604_v32  ;;  %v7612_v59 = vld [vmem:[#allocation9 + $0x58] sm:$0xff]   ;;  %v7616_v10 = vld [vmem:[#allocation9 + $0x60] sm:$0xff]   ;;  %v7620_v28 = vld [vmem:[#allocation9 + $0x68] sm:$0xff]   ;;  %s9905_s22 = scalar_lea.sflag [#allocation6], %s337_s9  ;;  %s8032_s17 = smov [#allocation10]  }
 0x30b   : > { %6952 = vmatprep.subr.bf16.mxu0 %v7605_v47  ;;  %v7613_v6 = vld [vmem:[#allocation9 + $0xd8] sm:$0xff]   ;;  %v7617_v23 = vld [vmem:[#allocation9 + $0xe0] sm:$0xff]   ;;  %v7621_v52 = vld [vmem:[#allocation9 + $0xe8] sm:$0xff]   ;;  %s7898_s24 = sshll.u32 %s8032_s17, 4  ;;  %s7899_s24 = int_to_ptr.vmem [resolvable:$false] %s7898_s24 }
 0x30c   : > { %v7614_v41 = vld [vmem:[#allocation9 + $0x18] sm:$0xff]   ;;  %v7618_v31 = vld [vmem:[#allocation9 + $0x20] sm:$0xff]   ;;  %v7622_v51 = vld [vmem:[#allocation9 + $0x28] sm:$0xff]   ;;  %p7901_p11 = scmp.lt.s32.totalorder %s9897_s18, %s7899_s24 }
 0x30d   : > { %6889 = vmatpush3.bf16.msra.mxu1 %v7606_v58  ;;  %v7615_v37 = vld [vmem:[#allocation9 + $0x98] sm:$0xff]   ;;  %v7619_v53 = vld [vmem:[#allocation9 + $0xa0] sm:$0xff]   ;;  %v7623_v36 = vld [vmem:[#allocation9 + $0xa8] sm:$0xff]   ;;  %s6504_s14 = sshll.u32 %s10025_s13, 5 }
 0x30e   : > { %6953 = vmatpush3.bf16.msra.mxu0 %v7607_v42  ;;  %6890 = vmatprep.subr.bf16.mxu1 %v7608_v4  ;;  %v7624_v54 = vld [vmem:[#allocation9 + $0x70] sm:$0xff]   ;;  %v7628_v29 = vld [vmem:[#allocation9 + $0x78] sm:$0xff]   ;;  %v3800_v46 = vld [vmem:[#allocation3] sm:$0xf]  ;;  %s5877_s16 = sadd.s32 %s6563_s19, %s6504_s14 }
 0x30f   : > { %6954 = vmatprep.subr.bf16.mxu0 %v7609_v38  ;;  %v7625_v8 = vld [vmem:[#allocation9 + $0xf0] sm:$0xff]   ;;  %v7629_v44 = vld [vmem:[#allocation9 + $0xf8] sm:$0xff]   ;;  %v3801_v48 = vld [vmem:[#allocation3 + $0x4] sm:$0xf]  ;;  %s6505_s15 = sshll.u32 %s5877_s16, 7  ;;  %p10028_p13 = scmp.ne.s32.totalorder %s10026_s30, 0 }
 0x310   : > { %v7626_v13 = vld [vmem:[#allocation9 + $0x30] sm:$0xff]   ;;  %v7630_v61 = vld [vmem:[#allocation9 + $0x38] sm:$0xff]   ;;  %v6338_v60 = vcombine.low %v3800_v46, %v3801_v48  ;;  %v7636_v15 = vld [vmem:[#allocation9 + $0x140] sm:$0xff]   ;;  %s9895_s21 = scalar_lea.hbm %s10027_s23, %s6505_s15 }
 0x311   : > { %6891 = vmatpush3.bf16.msra.mxu1 %v7610_v34  ;;  %v7627_v63 = vld [vmem:[#allocation9 + $0xb0] sm:$0xff]   ;;  %v7631_v56 = vld [vmem:[#allocation9 + $0xb8] sm:$0xff]   ;;  %v3824_v9 = vld [vmem:[#allocation3] sm:$0xe] }
 0x312   : > { %6955 = vmatpush3.bf16.msra.mxu0 %v7611_v3  ;;  %6892 = vmatprep.subr.bf16.mxu1 %v7612_v59  ;;  %v7633_v5 = vld [vmem:[#allocation3 + $0x8] ss:$0 sps:$4 sm:$0x11]   ;;  %v3833_v55 = vld [vmem:[#allocation3 + $0xc] sm:$0xf]  ;;  %v3971_v35 = vshrl.u32 %v6338_v60, 16  ;;  %v6354_v7 = vcombine.low %v3824_v9, %v3801_v48 }
 0x313   : > { %6956 = vmatprep.subr.bf16.mxu0 %v7613_v6  ;;  %v9407_v27 = vld [vmem:[#allocation3 + $0x10] sm:$0xf]  ;;  %v3973_v30 = vshll.u32 %v6338_v60, 16  ;;  %v3978_v2 = vshll.u32 %v7633_v5, 16  ;;  %v4099_v62 = vrot.slane %v7633_v5, 1  ;;  %v7637_v18 = vld [vmem:[#allocation9 + $0x100] sm:$0xff]  }
 0x314   : > { %v9410_v11 = vcombine.low %v3833_v55, %v9407_v27  ;;  %v3802_v45 = vld [vmem:[#allocation3 + $0xc] sm:$0xf]  ;;  %v4098_v20 = vrot.slane %v6354_v7, 1  ;;  %v3803_v43 = vld [vmem:[#allocation3 + $0x10] sm:$0xf]  ;;  %v7642_v16 = vld [vmem:[#allocation9 + $0x148] sm:$0xff]  }
 0x315   : > { %6893 = vmatpush3.bf16.msra.mxu1 %v7614_v41  ;;  %v3975_v0 = vrot.slane %v3973_v30, 1  ;;  %v3980_v49 = vrot.slane %v3978_v2, 1  ;;  %v6339_v39 = vcombine.low %v3802_v45, %v3803_v43  ;;  %v7639_v50 = vld [vmem:[#allocation3 + $0x14] ss:$0 sps:$4 sm:$0x11]   ;;  %v7643_v21 = vld [vmem:[#allocation9 + $0x108] sm:$0xff]  }
 0x316   : > { %6957 = vmatpush3.bf16.msra.mxu0 %v7615_v37  ;;  %6894 = vmatprep.subr.bf16.mxu1 %v7616_v10  ;;  %v3835_v57 = vld [vmem:[#allocation3 + $0x18] sm:$0xf]  ;;  %v4100_v1 = vsel %vm1492_vm9, %v4098_v20, %v4099_v62  ;;  %v9414_v17 = vld [vmem:[#allocation3 + $0x1c] sm:$0xf]  ;;  %v3825_v25 = vld [vmem:[#allocation3 + $0xc] sm:$0xe] }
 0x317   : > { %6958 = vmatprep.subr.bf16.mxu0 %v7617_v23  ;;  %5299 = vmatprep.mubr.bf16.mxu0 %v9410_v11  ;;  %v3976_v12 = vor.u32 %v3975_v0, %v3971_v35  ;;  %v3983_v26 = vshrl.u32 %v6339_v39, 16  ;;  %v3985_v22 = vshll.u32 %v6339_v39, 16  ;;  %v3990_v19 = vshll.u32 %v7639_v50, 16  ;;  %v3804_v58 = vld [vmem:[#allocation3 + $0x18] sm:$0xf]  ;;  %v7648_v4 = vld [vmem:[#allocation9 + $0x150] sm:$0xff]  }
 0x318   : > { %v9418_v14 = vcombine.low %v3835_v57, %v9414_v17  ;;  %v6355_v40 = vcombine.low %v3825_v25, %v3803_v43  ;;  %v4102_v33 = vrot.slane %v7639_v50, 1  ;;  %v3805_v42 = vld [vmem:[#allocation3 + $0x1c] sm:$0xf]  ;;  %v7645_v3 = vld [vmem:[#allocation3 + $0x20] ss:$0 sps:$4 sm:$0x11]  }
 0x319   : > { %6895 = vmatpush3.bf16.msra.mxu1 %v7618_v31  ;;  %v3981_v24 = vsel %vm1331_vm10, %v3976_v12, %v3980_v49  ;;  %v3987_v32 = vrot.slane %v3985_v22, 1  ;;  %v3992_v47 = vrot.slane %v3990_v19, 1  ;;  %v9421_v34 = vcombine.low %v3804_v58, %v3805_v42  ;;  %v3837_v6 = vld [vmem:[#allocation3 + $0x24] sm:$0xf]  ;;  %v9423_v41 = vld [vmem:[#allocation3 + $0x28] sm:$0xf] }
 0x31a   : > { %6959 = vmatpush3.bf16.msra.mxu0 %v7619_v53  ;;  %6896 = vmatprep.subr.bf16.mxu1 %v7620_v28  ;;  %v4101_v38 = vrot.slane %v6355_v40, 1  ;;  %v3826_v37 = vld [vmem:[#allocation3 + $0x18] sm:$0xe]  ;;  %v4002_v53 = vshll.u32 %v7645_v3, 16  ;;  %v7649_v28 = vld [vmem:[#allocation9 + $0x110] sm:$0xff]   ;;  %v7655_v62 = vld [vmem:[#allocation9 + $0x118] sm:$0xff]  }
 0x31b   : > { %6960 = vmatprep.subr.bf16.mxu0 %v7621_v52  ;;  %5202 = vmatprep.mubr.bf16.mxu1 %v3981_v24  ;;  %v3988_v59 = vor.u32 %v3987_v32, %v3983_v26  ;;  %v3995_v23 = vshrl.u32 %v9421_v34, 16  ;;  %v3997_v31 = vshll.u32 %v9421_v34, 16  ;;  %v3839_v5 = vld [vmem:[#allocation3 + $0x30] sm:$0xf]  ;;  %v7657_v55 = vld [vmem:[#allocation9 + $0x180] sm:$0xff]   ;;  %v7664_v57 = vld [vmem:[#allocation9 + $0x1c8] sm:$0xff]  }
 0x31c   : > { %v4103_v10 = vsel %vm1492_vm9, %v4101_v38, %v4102_v33  ;;  %v3827_v9 = vld [vmem:[#allocation3 + $0x24] sm:$0xe]  ;;  %v7662_v45 = vld [vmem:[#allocation9 + $0x160] sm:$0xff]   ;;  %v3808_v25 = vld [vmem:[#allocation3 + $0x30] sm:$0xf] }
 0x31d   : > { %6897 = vmatpush3.bf16.msra.mxu1 %v7622_v51  ;;  %v3993_v52 = vsel %vm1331_vm10, %v3988_v59, %v3992_v47  ;;  %v9430_v51 = vcombine.low %v3837_v6, %v9423_v41  ;;  %v3809_v24 = vld [vmem:[#allocation3 + $0x34] sm:$0xf]  ;;  %v7659_v22 = vld [vmem:[#allocation3 + $0x38] ss:$0 sps:$4 sm:$0x11]   ;;  %v7671_v38 = vld [vmem:[#allocation9 + $0x128] sm:$0xff]  }
 0x31e   : > { %6961 = vmatpush3.bf16.msra.mxu0 %v7623_v36  ;;  %6898 = vmatprep.subr.bf16.mxu1 %v7624_v54  ;;  %v6356_v36 = vcombine.low %v3826_v37, %v3805_v42  ;;  %v4105_v54 = vrot.slane %v7645_v3, 1  ;;  %v9444_v26 = vcombine.low %v3808_v25, %v3809_v24  ;;  %v3841_v19 = vld [vmem:[#allocation3 + $0x3c] sm:$0xf]  ;;  %v9448_v33 = vld [vmem:[#allocation3 + $0x40] sm:$0xf]  ;;  %v4026_v58 = vshll.u32 %v7659_v22, 16 }
 0x31f   : > { %6962 = vmatprep.subr.bf16.mxu0 %v7625_v8  ;;  %v7654_v8 = vld [vmem:[#allocation9 + $0x158] sm:$0xff]   ;;  %v7670_v42 = vld [vmem:[#allocation9 + $0x168] sm:$0xff]   ;;  %v9455_v37 = vcombine.low %v3841_v19, %v9448_v33  ;;  %v7683_v19 = vld [vmem:[#allocation9 + $0x1a0] sm:$0xff]  }
 0x320   : > { %v4019_v32 = vshrl.u32 %v9444_v26, 16  ;;  %v4021_v47 = vshll.u32 %v9444_v26, 16  ;;  %v4028_v59 = vrot.slane %v4026_v58, 1 }
 0x321   : > { %6899 = vmatpush3.bf16.msra.mxu1 %v7626_v13  ;;  %v3999_v13 = vrot.slane %v3997_v31, 1  ;;  %v3811_v31 = vld [vmem:[#allocation3 + $0x40] sm:$0xf] }
 0x322   : > { %6963 = vmatpush3.bf16.msra.mxu0 %v7627_v63  ;;  %6900 = vmatprep.subr.bf16.mxu1 %v7628_v29  ;;  %v4004_v63 = vrot.slane %v4002_v53, 1  ;;  %v3806_v29 = vld [vmem:[#allocation3 + $0x24] sm:$0xf]  ;;  %v4023_v3 = vrot.slane %v4021_v47, 1 }
 0x323   : > { %6964 = vmatprep.subr.bf16.mxu0 %v7629_v44  ;;  %v4104_v44 = vrot.slane %v6356_v36, 1  ;;  %v4000_v46 = vor.u32 %v3999_v13, %v3995_v23  ;;  %v3810_v23 = vld [vmem:[#allocation3 + $0x3c] sm:$0xf]  ;;  %v7667_v36 = vld [vmem:[#allocation3 + $0x44] ss:$0 sps:$4 sm:$0x11]  }
 0x324   : > { %v3843_v13 = vld [vmem:[#allocation3 + $0x48] sm:$0xf] }
 0x325   : > { %6901 = vmatpush3.bf16.msra.mxu1 %v7630_v61  ;;  %v3807_v61 = vld [vmem:[#allocation3 + $0x28] sm:$0xf]  ;;  %v4005_v35 = vsel %vm1331_vm10, %v4000_v46, %v4004_v63  ;;  %v4106_v20 = vsel %vm1492_vm9, %v4104_v44, %v4105_v54  ;;  %v9460_v63 = vld [vmem:[#allocation3 + $0x4c] sm:$0xf]  ;;  %v7674_v46 = vld [vmem:[#allocation9 + $0x1d8] sm:$0xff]  }
 0x326   : > { %6965 = vmatpush3.bf16.msra.mxu0 %v7631_v56  ;;  %7014 = vmatprep.subr.bf16.mxu1 %v7636_v15  ;;  %v7656_v56 = vld [vmem:[#allocation9 + $0x1c0] sm:$0xff]   ;;  %v9433_v48 = vcombine.low %v3806_v29, %v3807_v61  ;;  %v9435_v15 = vld [vmem:[#allocation3 + $0x34] sm:$0xf]  ;;  %v6357_v0 = vcombine.low %v3827_v9, %v3807_v61  ;;  %v7673_v54 = vld [vmem:[#allocation9 + $0x190] sm:$0xff]  }
 0x327   : > { %7078 = vmatprep.subr.bf16.mxu0 %v7656_v56  ;;  %v3829_v29 = vld [vmem:[#allocation3 + $0x3c] sm:$0xe]  ;;  %v4038_v56 = vshll.u32 %v7667_v36, 16 }
 0x328   : > { %5203 = vmatmul.mubr.bf16.vlgmr.msra.gmra.mrb[80].mxu1 %v6338_v60  ;;  %v7651_v60 = vld [vmem:[#allocation3 + $0x2c] ss:$0 sps:$4 sm:$0x11]   ;;  %v4007_v30 = vshrl.u32 %v9433_v48, 16  ;;  %v4009_v2 = vshll.u32 %v9433_v48, 16  ;;  %v4107_v50 = vrot.slane %v6357_v0, 1 }
 0x329   : > { %5300 = vmatmul.mubr.bf16.vlgmr.msra.gmra.mrb[100].mxu0 %v4100_v1  ;;  %7015 = vmatpush3.bf16.msra.mxu1 %v7637_v18  ;;  %v4014_v7 = vshll.u32 %v7651_v60, 16  ;;  %v4108_v49 = vrot.slane %v7651_v60, 1  ;;  %v9442_v18 = vcombine.low %v3839_v5, %v9435_v15  ;;  %v7678_v60 = vld [vmem:[#allocation9 + $0x198] sm:$0xff]   ;;  %v4040_v9 = vrot.slane %v4038_v56, 1  ;;  %v3813_v0 = vld [vmem:[#allocation3 + $0x4c] sm:$0xf] }
 0x32a   : > { %5307 = vmatprep.mubr.bf16.mxu0 %v9418_v14  ;;  %7016 = vmatprep.subr.bf16.mxu1 %v7642_v16  ;;  %v4011_v43 = vrot.slane %v4009_v2, 1  ;;  %v7665_v16 = vld [vmem:[#allocation9 + $0x188] sm:$0xff]   ;;  %v7692_v56 = vld [vmem:[#allocation9 + $0x1f0] sm:$0xff]  }
 0x32b   : > { %5210 = vmatprep.mubr.bf16.mxu1 %v3993_v52  ;;  %7079 = vmatpush3.bf16.msra.mxu0 %v7657_v55  ;;  %v4016_v12 = vrot.slane %v4014_v7, 1  ;;  %v4109_v6 = vsel %vm1492_vm9, %v4107_v50, %v4108_v49  ;;  %v9457_v52 = vcombine.low %v3810_v23, %v3811_v31  ;;  %v6359_v55 = vcombine.low %v3829_v29, %v3811_v31  ;;  %v9473_v50 = vld [vmem:[#allocation3 + $0x58] sm:$0xf]  ;;  %v3847_v23 = vld [vmem:[#allocation3 + $0x60] sm:$0xf] }
 0x32c   : > { %v4012_v1 = vor.u32 %v4011_v43, %v4007_v30  ;;  %7080 = vmatprep.subr.bf16.mxu0 %v7664_v57  ;;  %v9468_v7 = vcombine.low %v3843_v13, %v9460_v63  ;;  %v7681_v43 = vld [vmem:[#allocation9 + $0x130] sm:$0xff]   ;;  %v9486_v31 = vld [vmem:[#allocation3 + $0x64] sm:$0xf]  ;;  %v7691_v13 = vld [vmem:[#allocation9 + $0x138] sm:$0xff]   ;;  %v4205_v29 = vshll.u32 %v9410_v11, 16 }
 0x32d   : > { %7017 = vmatpush3.bf16.msra.mxu1 %v7643_v21  ;;  %v3828_v21 = vld [vmem:[#allocation3 + $0x30] sm:$0xe]  ;;  %v4031_v44 = vshrl.u32 %v9457_v52, 16  ;;  %v4033_v61 = vshll.u32 %v9457_v52, 16  ;;  %v4113_v49 = vrot.slane %v6359_v55, 1 }
 0x32e   : > { %7018 = vmatprep.subr.bf16.mxu1 %v7648_v4  ;;  %v4017_v40 = vsel %vm1331_vm10, %v4012_v1, %v4016_v12  ;;  %v6358_v4 = vcombine.low %v3828_v21, %v3809_v24  ;;  %v3830_v57 = vld [vmem:[#allocation3 + $0x48] sm:$0xe] }
 0x32f   : > { %7081 = vmatpush3.bf16.msra.mxu0 %v7665_v16  ;;  %v4035_v5 = vrot.slane %v4033_v61, 1  ;;  %v6360_v21 = vcombine.low %v3830_v57, %v3813_v0 }
 0x330   : > { %5211 = vmatmul.mubr.bf16.gmra.mrb[84].mxu1 %v6339_v39  ;;  %v7663_v39 = vld [vmem:[#allocation9 + $0x120] sm:$0xff]   ;;  %v4110_v53 = vrot.slane %v6358_v4, 1  ;;  %v3814_v4 = vld [vmem:[#allocation3 + $0x54] sm:$0xf] }
 0x331   : > { %5308 = vmatmul.mubr.bf16.gmra.mrb[104].mxu0 %v4103_v10  ;;  %7019 = vmatpush3.bf16.msra.mxu1 %v7649_v28  ;;  %v4024_v10 = vor.u32 %v4023_v3, %v4019_v32  ;;  %v4111_v28 = vrot.slane %v7659_v22, 1  ;;  %v4036_v2 = vor.u32 %v4035_v5, %v4031_v44  ;;  %v7682_v22 = vld [vmem:[#allocation9 + $0x1e0] sm:$0xff]   ;;  %v7684_v32 = vld [vmem:[#allocation9 + $0x1e8] sm:$0xff]   ;;  %v4116_v3 = vrot.slane %v6360_v21, 1 }
 0x332   : > { %5315 = vmatprep.mubr.bf16.mxu0 %v9430_v51  ;;  %5218 = vmatprep.mubr.bf16.mxu1 %v4005_v35  ;;  %v7680_v35 = vld [vmem:[#allocation9 + $0x170] sm:$0xff]   ;;  %v9495_v5 = vcombine.low %v3847_v23, %v9486_v31 }
 0x333   : > { %7020 = vmatprep.subr.bf16.mxu1 %v7654_v8  ;;  %v4029_v8 = vsel %vm1331_vm10, %v4024_v10, %v4028_v59  ;;  %v4112_v30 = vsel %vm1492_vm9, %v4110_v53, %v4111_v28  ;;  %v4041_v12 = vsel %vm1331_vm10, %v4036_v2, %v4040_v9  ;;  %v7693_v9 = vld [vmem:[#allocation9 + $0x1b0] sm:$0xff]  }
 0x335   : > { %7021 = vmatpush3.bf16.msra.mxu1 %v7655_v62  ;;  %v3812_v62 = vld [vmem:[#allocation3 + $0x48] sm:$0xf] }
 0x336   : > { %7022 = vmatprep.subr.bf16.mxu1 %v7662_v45  ;;  %v4114_v45 = vrot.slane %v7667_v36, 1 }
 0x338   : > { %5219 = vmatmul.mubr.bf16.gmra.mrb[88].mxu1 %v9421_v34  ;;  %v7672_v34 = vld [vmem:[#allocation9 + $0x1d0] sm:$0xff]   ;;  %v4115_v47 = vsel %vm1492_vm9, %v4113_v49, %v4114_v45  ;;  %v7697_v49 = vld [vmem:[#allocation9 + $0x1b8] sm:$0xff]  }
 0x339   : > { %5316 = vmatmul.mubr.bf16.gmra.mrb[108].mxu0 %v4106_v20  ;;  %5226 = vmatprep.mubr.bf16.mxu1 %v4017_v40  ;;  %v7676_v20 = vld [vmem:[#allocation3 + $0x50] ss:$0 sps:$4 sm:$0x11]  }
 0x33a   : > { %5323 = vmatprep.mubr.bf16.mxu0 %v9442_v18  ;;  %7023 = vmatpush3.bf16.msra.mxu1 %v7663_v39  ;;  %v3845_v39 = vld [vmem:[#allocation3 + $0x54] sm:$0xf]  ;;  %v4050_v24 = vshll.u32 %v7676_v20, 16  ;;  %v4117_v59 = vrot.slane %v7676_v20, 1  ;;  %v9500_v20 = vld [vmem:[#allocation9 + $0x200] sm:$0xff]  }
 0x33b   : > { %7024 = vmatprep.subr.bf16.mxu1 %v7670_v42  ;;  %7082 = vmatprep.subr.bf16.mxu0 %v7672_v34  ;;  %v9481_v42 = vcombine.low %v3845_v39, %v9473_v50  ;;  %v7688_v34 = vld [vmem:[#allocation9 + $0x1a8] sm:$0xff]   ;;  %v9503_v39 = vld [vmem:[#allocation3 + $0x1c] sm:$0xf] }
 0x33c   : > { %7083 = vmatpush3.bf16.msra.mxu0 %v7673_v54  ;;  %v4052_v40 = vrot.slane %v4050_v24, 1  ;;  %v3831_v54 = vld [vmem:[#allocation3 + $0x54] sm:$0xe]  ;;  %v4203_v24 = vshrl.u32 %v9410_v11, 16 }
 0x33d   : > { %7084 = vmatprep.subr.bf16.mxu0 %v7674_v46  ;;  %v4118_v46 = vsel %vm1492_vm9, %v4116_v3, %v4117_v59  ;;  %v9514_v59 = vld [vmem:[#allocation3 + $0x28] sm:$0xf] }
 0x33e   : > { %7025 = vmatpush3.bf16.msra.mxu1 %v7671_v38  ;;  %v3815_v38 = vld [vmem:[#allocation3 + $0x58] sm:$0xf] }
 0x33f   : > { %7026 = vmatprep.subr.bf16.mxu1 %v7680_v35  ;;  %v6361_v55 = vcombine.low %v3831_v54, %v3815_v38 }
 0x340   : > { %5227 = vmatmul.mubr.bf16.gmra.mrb[92].mxu1 %v9433_v48  ;;  %7085 = vmatpush3.bf16.msra.mxu0 %v7678_v60  ;;  %v9470_v48 = vcombine.low %v3812_v62, %v3813_v0  ;;  %v7695_v62 = vld [vmem:[#allocation3 + $0x14] ss:$0 sps:$4 sm:$0x11]  }
 0x341   : > { %5324 = vmatmul.mubr.bf16.gmra.mrb[112].mxu0 %v4109_v6  ;;  %5234 = vmatprep.mubr.bf16.mxu1 %v4029_v8  ;;  %v7686_v6 = vld [vmem:[#allocation3 + $0x5c] ss:$0 sps:$4 sm:$0x11]   ;;  %v7690_v8 = vld [vmem:[#allocation9 + $0x178] sm:$0xff]   ;;  %v4119_v45 = vrot.slane %v6361_v55, 1  ;;  %v4331_v57 = vrot.slane %v7695_v62, 1 }
 0x342   : > { %5331 = vmatprep.mubr.bf16.mxu0 %v9455_v37  ;;  %v4043_v1 = vshrl.u32 %v9470_v48, 16  ;;  %v4045_v25 = vshll.u32 %v9470_v48, 16  ;;  %7027 = vmatpush3.bf16.msra.mxu1 %v7681_v43  ;;  %v4062_v36 = vshll.u32 %v7686_v6, 16  ;;  %v4120_v35 = vrot.slane %v7686_v6, 1 }
 0x343   : > { %7086 = vmatprep.subr.bf16.mxu0 %v7682_v22  ;;  %7028 = vmatprep.subr.bf16.mxu1 %v7690_v8  ;;  %v4207_v22 = vrot.slane %v4205_v29, 1  ;;  %v4215_v29 = vshrl.u32 %v9418_v14, 16 }
 0x344   : > { %v4047_v16 = vrot.slane %v4045_v25, 1  ;;  %7087 = vmatpush3.bf16.msra.mxu0 %v7683_v19  ;;  %v4064_v61 = vrot.slane %v4062_v36, 1  ;;  %v3858_v25 = vld [vmem:[#allocation3 + $0x18] sm:$0xe]  ;;  %v4121_v19 = vsel %vm1492_vm9, %v4119_v45, %v4120_v35 }
 0x345   : > { %7088 = vmatprep.subr.bf16.mxu0 %v7684_v32  ;;  %v6379_v32 = vcombine.low %v3858_v25, %v9414_v17  ;;  %v4208_v11 = vor.u32 %v4207_v22, %v4203_v24  ;;  %v9533_v35 = vld [vmem:[#allocation3 + $0x38] ss:$0 sps:$4 sm:$0x11]   ;;  %v7708_v22 = vld [vmem:[#allocation9 + $0x210] sm:$0xff]  }
 0x346   : > { %v4048_v58 = vor.u32 %v4047_v16, %v4043_v1  ;;  %7029 = vmatpush3.bf16.msra.mxu1 %v7691_v13 }
 0x347   : > { %7194 = vmatprep.subr.bf16.mxu1 %v9500_v20  ;;  %v4333_v17 = vrot.slane %v6379_v32, 1 }
 0x348   : > { %5235 = vmatmul.mubr.bf16.gmra.mrb[96].mxu1 %v9444_v26  ;;  %v9483_v26 = vcombine.low %v3814_v4, %v3815_v38  ;;  %v4053_v10 = vsel %vm1331_vm10, %v4048_v58, %v4052_v40  ;;  %7089 = vmatpush3.bf16.msra.mxu0 %v7688_v34  ;;  %v3868_v58 = vld [vmem:[#allocation3 + $0x24] sm:$0xf]  ;;  %v9519_v34 = vld [vmem:[#allocation3 + $0x2c] ss:$0 sps:$4 sm:$0x11]  }
 0x349   : > { %5332 = vmatmul.mubr.bf16.gmra.mrb[116].mxu0 %v4112_v30  ;;  %5242 = vmatprep.mubr.bf16.mxu1 %v4041_v12  ;;  %v3857_v30 = vld [vmem:[#allocation3 + $0xc] sm:$0xe]  ;;  %v3866_v12 = vld [vmem:[#allocation3 + $0x18] sm:$0xf]  ;;  %v9517_v6 = vcombine.low %v3868_v58, %v9514_v59  ;;  %v4454_v8 = vshll.u32 %v9519_v34, 16 }
 0x34a   : > { %5339 = vmatprep.mubr.bf16.mxu0 %v9468_v7  ;;  %v4055_v53 = vshrl.u32 %v9483_v26, 16  ;;  %v4057_v28 = vshll.u32 %v9483_v26, 16  ;;  %7090 = vmatprep.subr.bf16.mxu0 %v7692_v56  ;;  %v6378_v0 = vcombine.low %v3857_v30, %v9407_v27  ;;  %v6386_v1 = vcombine.low %v3866_v12, %v9503_v39  ;;  %v9507_v27 = vld [vmem:[#allocation3 + $0x20] ss:$0 sps:$4 sm:$0x11]  }
 0x34b   : > { %v4442_v21 = vshll.u32 %v9507_v27, 16  ;;  %v4447_v36 = vshrl.u32 %v9517_v6, 16  ;;  %v4449_v54 = vshll.u32 %v9517_v6, 16  ;;  %v4456_v56 = vrot.slane %v4454_v8, 1 }
 0x34c   : > { %v4059_v44 = vrot.slane %v4057_v28, 1  ;;  %7091 = vmatpush3.bf16.msra.mxu0 %v7693_v9  ;;  %v4330_v43 = vrot.slane %v6378_v0, 1  ;;  %v4435_v16 = vshrl.u32 %v6386_v1, 16  ;;  %v4437_v40 = vshll.u32 %v6386_v1, 16 }
 0x34d   : > { %v4444_v3 = vrot.slane %v4442_v21, 1  ;;  %v9549_v58 = vld [vmem:[#allocation3 + $0x44] ss:$0 sps:$4 sm:$0x11]  }
 0x34e   : > { %v4060_v60 = vor.u32 %v4059_v44, %v4055_v53  ;;  %v4332_v4 = vsel %vm1492_vm9, %v4330_v43, %v4331_v57  ;;  %v4439_v38 = vrot.slane %v4437_v40, 1  ;;  %v4217_v53 = vshll.u32 %v9418_v14, 16  ;;  %v7706_v44 = vld [vmem:[#allocation3 + $0x2c] ss:$0 sps:$4 sm:$0x11]  }
 0x34f   : > { %v4466_v43 = vshll.u32 %v9533_v35, 16  ;;  %v4229_v57 = vshll.u32 %v9430_v51, 16  ;;  %v4337_v24 = vrot.slane %v7706_v44, 1  ;;  %v9544_v40 = vld [vmem:[#allocation3 + $0x40] sm:$0xf] }
 0x350   : > { %5243 = vmatmul.mubr.bf16.gmra.mrb[100].mxu1 %v9457_v52  ;;  %v7694_v52 = vld [vmem:[#allocation9 + $0x1f8] sm:$0xff]   ;;  %v4065_v2 = vsel %vm1331_vm10, %v4060_v60, %v4064_v61  ;;  %v4440_v23 = vor.u32 %v4439_v38, %v4435_v16 }
 0x351   : > { %5340 = vmatmul.mubr.bf16.gmra.mrb[120].mxu0 %v4115_v47  ;;  %5250 = vmatprep.mubr.bf16.mxu1 %v4053_v10  ;;  %v7701_v47 = vld [vmem:[#allocation3 + $0x20] ss:$0 sps:$4 sm:$0x11]   ;;  %v3870_v61 = vld [vmem:[#allocation3 + $0x30] sm:$0xf]  ;;  %v4231_v38 = vrot.slane %v4229_v57, 1 }
 0x352   : > { %5347 = vmatprep.mubr.bf16.mxu0 %v9481_v42  ;;  %7092 = vmatprep.subr.bf16.mxu0 %v7694_v52  ;;  %v4334_v28 = vrot.slane %v7701_v47, 1  ;;  %v4445_v13 = vsel %vm1331_vm10, %v4440_v23, %v4444_v3  ;;  %v9528_v60 = vld [vmem:[#allocation3 + $0x34] sm:$0xf]  ;;  %v4222_v55 = vshll.u32 %v7701_v47, 16  ;;  %v3860_v16 = vld [vmem:[#allocation3 + $0x30] sm:$0xe] }
 0x353   : > { %7093 = vmatpush3.bf16.msra.mxu0 %v7697_v49  ;;  %v9531_v9 = vcombine.low %v3870_v61, %v9528_v60  ;;  %v4234_v3 = vshll.u32 %v7706_v44, 16  ;;  %v9565_v44 = vld [vmem:[#allocation3 + $0x50] ss:$0 sps:$4 sm:$0x11]   ;;  %v4241_v61 = vshll.u32 %v9442_v18, 16 }
 0x354   : > { %v4335_v30 = vsel %vm1492_vm9, %v4333_v17, %v4334_v28  ;;  %v4224_v25 = vrot.slane %v4222_v55, 1  ;;  %v7711_v17 = vld [vmem:[#allocation3 + $0x38] ss:$0 sps:$4 sm:$0x11]   ;;  %v4478_v28 = vshll.u32 %v9549_v58, 16 }
 0x355   : > { %v4459_v49 = vshrl.u32 %v9531_v9, 16  ;;  %v4461_v45 = vshll.u32 %v9531_v9, 16 }
 0x358   : > { %5251 = vmatmul.mubr.bf16.gmra.mrb[104].mxu1 %v9470_v48  ;;  %v4210_v48 = vshll.u32 %v7695_v62, 16  ;;  %v7703_v62 = vld [vmem:[#allocation9 + $0x208] sm:$0xff]  }
 0x359   : > { %5348 = vmatmul.mubr.bf16.gmra.mrb[124].mxu0 %v4118_v46  ;;  %5258 = vmatprep.mubr.bf16.mxu1 %v4065_v2  ;;  %v3859_v46 = vld [vmem:[#allocation3 + $0x24] sm:$0xe]  ;;  %v4219_v2 = vrot.slane %v4217_v53, 1  ;;  %v6381_v53 = vcombine.low %v3860_v16, %v9435_v15  ;;  %v4236_v15 = vrot.slane %v4234_v3, 1 }
 0x35a   : > { %5355 = vmatprep.mubr.bf16.mxu0 %v9495_v5  ;;  %v4212_v10 = vrot.slane %v4210_v48, 1  ;;  %v6380_v0 = vcombine.low %v3859_v46, %v9423_v41  ;;  %v3872_v48 = vld [vmem:[#allocation3 + $0x3c] sm:$0xf]  ;;  %v7723_v16 = vld [vmem:[#allocation9 + $0x228] sm:$0xff]  }
 0x35b   : > { %v4220_v41 = vor.u32 %v4219_v2, %v4215_v29  ;;  %v9547_v47 = vcombine.low %v3872_v48, %v9544_v40  ;;  %v4339_v55 = vrot.slane %v6381_v53, 1  ;;  %v9584_v3 = vld [vmem:[#allocation3 + $0x5c] ss:$0 sps:$4 sm:$0x11]  }
 0x35c   : > { %v4213_v52 = vsel %vm1331_vm10, %v4208_v11, %v4212_v10  ;;  %v4336_v21 = vrot.slane %v6380_v0, 1 }
 0x35d   : > { %v4473_v10 = vshll.u32 %v9547_v47, 16  ;;  %v4225_v23 = vsel %vm1331_vm10, %v4220_v41, %v4224_v25  ;;  %v9573_v25 = vld [vmem:[#allocation3 + $0x58] sm:$0xf] }
 0x35f   : > { %v4475_v8 = vrot.slane %v4473_v10, 1  ;;  %v7728_v10 = vld [vmem:[#allocation9 + $0x230] sm:$0xff]  }
 0x360   : > { %5259 = vmatmul.mubr.bf16.gmra.mrb[108].mxu1 %v9483_v26  ;;  %v4451_v26 = vrot.slane %v4449_v54, 1  ;;  %v7713_v54 = vld [vmem:[#allocation9 + $0x218] sm:$0xff]  }
 0x361   : > { %5356 = vmatmul.mubr.bf16.gmra.mrb[128].mxu0 %v4121_v19  ;;  %5396 = vmatprep.mubr.bf16.mxu1 %v4332_v4  ;;  %v4463_v19 = vrot.slane %v4461_v45, 1  ;;  %v4227_v4 = vshrl.u32 %v9430_v51, 16  ;;  %v4338_v51 = vsel %vm1492_vm9, %v4336_v21, %v4337_v24  ;;  %v4490_v45 = vshll.u32 %v9565_v44, 16 }
 0x362   : > { %5493 = vmatprep.mubr.bf16.mxu0 %v4445_v13  ;;  %v4452_v14 = vor.u32 %v4451_v26, %v4447_v36  ;;  %v3874_v36 = vld [vmem:[#allocation3 + $0x48] sm:$0xf]  ;;  %v9560_v13 = vld [vmem:[#allocation3 + $0x4c] sm:$0xf] }
 0x363   : > { %v4464_v32 = vor.u32 %v4463_v19, %v4459_v49  ;;  %v9563_v29 = vcombine.low %v3874_v36, %v9560_v13  ;;  %v4232_v46 = vor.u32 %v4231_v38, %v4227_v4  ;;  %v4253_v19 = vshll.u32 %v9455_v37, 16 }
 0x364   : > { %v4457_v12 = vsel %vm1331_vm10, %v4452_v14, %v4456_v56  ;;  %v4480_v56 = vrot.slane %v4478_v28, 1  ;;  %v3861_v14 = vld [vmem:[#allocation3 + $0x3c] sm:$0xe]  ;;  %v4492_v38 = vrot.slane %v4490_v45, 1  ;;  %v3862_v28 = vld [vmem:[#allocation3 + $0x48] sm:$0xe] }
 0x365   : > { %v4485_v2 = vshll.u32 %v9563_v29, 16  ;;  %v4483_v0 = vshrl.u32 %v9563_v29, 16  ;;  %v4237_v24 = vsel %vm1331_vm10, %v4232_v46, %v4236_v15  ;;  %v6382_v41 = vcombine.low %v3861_v14, %v9448_v33  ;;  %v3878_v33 = vld [vmem:[#allocation3 + $0x60] sm:$0xf]  ;;  %v3891_v45 = vld [vmem:[#allocation3 + $0x24] sm:$0xe] }
 0x366   : > { %v6383_v46 = vcombine.low %v3862_v28, %v9460_v63  ;;  %v3890_v63 = vld [vmem:[#allocation3 + $0x18] sm:$0xe] }
 0x367   : > { %v4487_v49 = vrot.slane %v4485_v2, 1  ;;  %v9601_v2 = vld [vmem:[#allocation3 + $0x68] ss:$0 sps:$4 sm:$0x11]  }
 0x368   : > { %5397 = vmatmul.mubr.bf16.vlgmr.msra.gmra.mrb[112].mxu1 %v4213_v52  ;;  %v4340_v52 = vrot.slane %v7711_v17, 1 }
 0x369   : > { %5494 = vmatmul.mubr.bf16.vlgmr.msra.gmra.mrb[132].mxu0 %v6386_v1  ;;  %v4468_v1 = vrot.slane %v4466_v43, 1  ;;  %7195 = vmatpush3.bf16.msra.mxu1 %v9500_v20  ;;  %v4471_v20 = vshrl.u32 %v9547_v47, 16  ;;  %v3876_v43 = vld [vmem:[#allocation3 + $0x54] sm:$0xf]  ;;  %v4488_v4 = vor.u32 %v4487_v49, %v4483_v0  ;;  %v3880_v0 = vld [vmem:[#allocation3 + $0x6c] sm:$0xf] }
 0x36a   : > { %5501 = vmatprep.mubr.bf16.mxu0 %v4457_v12  ;;  %5404 = vmatprep.mubr.bf16.mxu1 %v4335_v30  ;;  %v7716_v30 = vld [vmem:[#allocation3 + $0x44] ss:$0 sps:$4 sm:$0x11]   ;;  %v4239_v12 = vshrl.u32 %v9442_v18, 16  ;;  %v4341_v48 = vsel %vm1492_vm9, %v4339_v55, %v4340_v52  ;;  %v4251_v18 = vshrl.u32 %v9455_v37, 16  ;;  %v4342_v37 = vrot.slane %v6382_v41, 1 }
 0x36b   : > { %7196 = vmatprep.subr.bf16.mxu1 %v7703_v62  ;;  %v4469_v11 = vsel %vm1331_vm10, %v4464_v32, %v4468_v1  ;;  %v4476_v26 = vor.u32 %v4475_v8, %v4471_v20  ;;  %v9578_v1 = vcombine.low %v3876_v43, %v9573_v25  ;;  %v4343_v32 = vrot.slane %v7716_v30, 1  ;;  %v7733_v55 = vld [vmem:[#allocation9 + $0x238] sm:$0xff]  }
 0x36c   : > { %v4255_v20 = vrot.slane %v4253_v19, 1  ;;  %v4493_v53 = vsel %vm1331_vm10, %v4488_v4, %v4492_v38  ;;  %v4263_v52 = vshrl.u32 %v9468_v7, 16  ;;  %v9604_v49 = vld [vmem:[#allocation3 + $0x70] sm:$0xf]  ;;  %v4563_v19 = vrot.slane %v9507_v27, 1 }
 0x36d   : > { %7197 = vmatpush3.bf16.msra.mxu1 %v7703_v62  ;;  %v4246_v62 = vshll.u32 %v7711_v17, 16  ;;  %v4481_v57 = vsel %vm1331_vm10, %v4476_v26, %v4480_v56  ;;  %v4258_v17 = vshll.u32 %v7716_v30, 16  ;;  %v4495_v36 = vshrl.u32 %v9578_v1, 16  ;;  %v7726_v27 = vld [vmem:[#allocation3 + $0x5c] ss:$0 sps:$4 sm:$0x11]  }
 0x36e   : > { %7198 = vmatprep.subr.bf16.mxu1 %v7708_v22  ;;  %v4256_v26 = vor.u32 %v4255_v20, %v4251_v18  ;;  %v4265_v30 = vshll.u32 %v9468_v7, 16  ;;  %v4566_v41 = vrot.slane %v9519_v34, 1 }
 0x36f   : > { %v4248_v21 = vrot.slane %v4246_v62, 1  ;;  %v4260_v56 = vrot.slane %v4258_v17, 1 }
 0x370   : > { %5405 = vmatmul.mubr.bf16.gmra.mrb[116].mxu1 %v4225_v23  ;;  %v9587_v23 = vld [vmem:[#allocation3 + $0x64] sm:$0xf]  ;;  %v4267_v4 = vrot.slane %v4265_v30, 1  ;;  %v7731_v30 = vld [vmem:[#allocation3 + $0x68] ss:$0 sps:$4 sm:$0x11]  }
 0x371   : > { %5502 = vmatmul.mubr.bf16.gmra.mrb[136].mxu0 %v9517_v6  ;;  %v7718_v6 = vld [vmem:[#allocation9 + $0x220] sm:$0xff]   ;;  %5412 = vmatprep.mubr.bf16.mxu1 %v4338_v51  ;;  %v9593_v8 = vcombine.low %v3878_v33, %v9587_v23  ;;  %v4261_v43 = vsel %vm1331_vm10, %v4256_v26, %v4260_v56 }
 0x372   : > { %5509 = vmatprep.mubr.bf16.mxu0 %v4469_v11  ;;  %7199 = vmatpush3.bf16.msra.mxu1 %v7708_v22  ;;  %v4243_v22 = vrot.slane %v4241_v61, 1  ;;  %v4497_v11 = vshll.u32 %v9578_v1, 16  ;;  %v4344_v61 = vsel %vm1492_vm9, %v4342_v37, %v4343_v32  ;;  %v6393_v32 = vcombine.low %v3880_v0, %v9604_v49  ;;  %v9620_v37 = vld [vmem:[#allocation3 + $0x74] ss:$0 sps:$4 sm:$0x11]  }
 0x373   : > { %7200 = vmatprep.subr.bf16.mxu1 %v7713_v54  ;;  %v4507_v7 = vshrl.u32 %v9593_v8, 16  ;;  %v4526_v26 = vshll.u32 %v9620_v37, 16 }
 0x374   : > { %v4499_v51 = vrot.slane %v4497_v11, 1  ;;  %v4521_v17 = vshll.u32 %v6393_v32, 16 }
 0x376   : > { %7201 = vmatpush3.bf16.msra.mxu1 %v7713_v54  ;;  %v4502_v54 = vshll.u32 %v9584_v3, 16  ;;  %v4500_v14 = vor.u32 %v4499_v51, %v4495_v36  ;;  %v4349_v51 = vrot.slane %v7726_v27, 1 }
 0x377   : > { %7202 = vmatprep.subr.bf16.mxu1 %v7718_v6 }
 0x378   : > { %5413 = vmatmul.mubr.bf16.gmra.mrb[120].mxu1 %v4237_v24  ;;  %v4504_v62 = vrot.slane %v4502_v54, 1  ;;  %v3863_v24 = vld [vmem:[#allocation3 + $0x54] sm:$0xe]  ;;  %v3864_v54 = vld [vmem:[#allocation3 + $0x60] sm:$0xe] }
 0x379   : > { %5510 = vmatmul.mubr.bf16.gmra.mrb[140].mxu0 %v9531_v9  ;;  %5420 = vmatprep.mubr.bf16.mxu1 %v4341_v48  ;;  %v4244_v9 = vor.u32 %v4243_v22, %v4239_v12  ;;  %v4345_v12 = vrot.slane %v6383_v46, 1  ;;  %v6402_v22 = vcombine.low %v3890_v63, %v9503_v39  ;;  %v6403_v48 = vcombine.low %v3891_v45, %v9514_v59 }
 0x37a   : > { %5517 = vmatprep.mubr.bf16.mxu0 %v4481_v57  ;;  %7203 = vmatpush3.bf16.msra.mxu1 %v7718_v6  ;;  %v7721_v6 = vld [vmem:[#allocation3 + $0x50] ss:$0 sps:$4 sm:$0x11]   ;;  %v4505_v18 = vsel %vm1331_vm10, %v4500_v14, %v4504_v62  ;;  %v6384_v59 = vcombine.low %v3863_v24, %v9473_v50  ;;  %v6385_v14 = vcombine.low %v3864_v54, %v9486_v31  ;;  %v4289_v45 = vshll.u32 %v9495_v5, 16 }
 0x37b   : > { %7204 = vmatprep.subr.bf16.mxu1 %v7723_v16  ;;  %v4249_v15 = vsel %vm1331_vm10, %v4244_v9, %v4248_v21  ;;  %v4346_v57 = vrot.slane %v7721_v6, 1  ;;  %v4514_v21 = vshll.u32 %v9601_v2, 16  ;;  %v4270_v38 = vshll.u32 %v7721_v6, 16 }
 0x37c   : > { %v4562_v11 = vrot.slane %v6402_v22, 1  ;;  %v4565_v9 = vrot.slane %v6403_v48, 1  ;;  %v4348_v36 = vrot.slane %v6384_v59, 1  ;;  %v4275_v6 = vshrl.u32 %v9481_v42, 16  ;;  %v3892_v48 = vld [vmem:[#allocation3 + $0x30] sm:$0xe] }
 0x37d   : > { %v4347_v39 = vsel %vm1492_vm9, %v4345_v12, %v4346_v57  ;;  %v4516_v33 = vrot.slane %v4514_v21, 1  ;;  %v4272_v28 = vrot.slane %v4270_v38, 1  ;;  %v4287_v57 = vshrl.u32 %v9495_v5, 16  ;;  %v3893_v21 = vld [vmem:[#allocation3 + $0x3c] sm:$0xe] }
 0x37e   : > { %7205 = vmatpush3.bf16.msra.mxu1 %v7723_v16  ;;  %v4564_v34 = vsel %vm1492_vm9, %v4562_v11, %v4563_v19  ;;  %v4567_v20 = vsel %vm1492_vm9, %v4565_v9, %v4566_v41  ;;  %v4294_v24 = vshll.u32 %v7731_v30, 16  ;;  %v3896_v59 = vld [vmem:[#allocation3 + $0x60] sm:$0xe] }
 0x37f   : > { %7206 = vmatprep.subr.bf16.mxu1 %v7728_v10 }
 0x380   : > { %5421 = vmatmul.mubr.bf16.gmra.mrb[124].mxu1 %v4249_v15  ;;  %v4519_v15 = vshrl.u32 %v6393_v32, 16  ;;  %v4296_v19 = vrot.slane %v4294_v24, 1 }
 0x381   : > { %5518 = vmatmul.mubr.bf16.gmra.mrb[144].mxu0 %v9547_v47  ;;  %v4509_v47 = vshll.u32 %v9593_v8, 16  ;;  %5428 = vmatprep.mubr.bf16.mxu1 %v4344_v61  ;;  %v4523_v61 = vrot.slane %v4521_v17, 1  ;;  %v3897_v17 = vld [vmem:[#allocation3 + $0x6c] sm:$0xe] }
 0x382   : > { %5525 = vmatprep.mubr.bf16.mxu0 %v4493_v53  ;;  %7207 = vmatpush3.bf16.msra.mxu1 %v7728_v10  ;;  %v4268_v53 = vor.u32 %v4267_v4, %v4263_v52  ;;  %v4350_v52 = vsel %vm1492_vm9, %v4348_v36, %v4349_v51  ;;  %v6405_v4 = vcombine.low %v3893_v21, %v9544_v40 }
 0x383   : > { %7208 = vmatprep.subr.bf16.mxu1 %v7733_v55  ;;  %v4511_v16 = vrot.slane %v4509_v47, 1  ;;  %v4524_v62 = vor.u32 %v4523_v61, %v4519_v15  ;;  %v4528_v47 = vrot.slane %v4526_v26, 1 }
 0x384   : > { %v4273_v56 = vsel %vm1331_vm10, %v4268_v53, %v4272_v28  ;;  %v4571_v9 = vrot.slane %v6405_v4, 1  ;;  %v6409_v53 = vcombine.low %v3897_v17, %v9604_v49 }
 0x385   : > { %v4512_v10 = vor.u32 %v4511_v16, %v4507_v7  ;;  %v4529_v12 = vsel %vm1331_vm10, %v4524_v62, %v4528_v47  ;;  %v4291_v7 = vrot.slane %v4289_v45, 1  ;;  %v4569_v16 = vrot.slane %v9533_v35, 1 }
 0x386   : > { %7209 = vmatpush3.bf16.msra.mxu1 %v7733_v55  ;;  %v4282_v55 = vshll.u32 %v7726_v27, 16  ;;  %v3895_v27 = vld [vmem:[#allocation3 + $0x54] sm:$0xe] }
 0x387   : > { %v4517_v50 = vsel %vm1331_vm10, %v4512_v10, %v4516_v33  ;;  %v4292_v22 = vor.u32 %v4291_v7, %v4287_v57  ;;  %v6408_v10 = vcombine.low %v3896_v59, %v9587_v23  ;;  %v4584_v23 = vrot.slane %v9620_v37, 1 }
 0x388   : > { %5429 = vmatmul.mubr.bf16.gmra.mrb[128].mxu1 %v4261_v43  ;;  %v4284_v63 = vrot.slane %v4282_v55, 1  ;;  %v4351_v43 = vrot.slane %v6385_v14, 1 }
 0x389   : > { %5526 = vmatmul.mubr.bf16.gmra.mrb[148].mxu0 %v9563_v29  ;;  %5436 = vmatprep.mubr.bf16.mxu1 %v4347_v39  ;;  %v4277_v29 = vshll.u32 %v9481_v42, 16  ;;  %v4352_v42 = vrot.slane %v7731_v30, 1  ;;  %v4297_v41 = vsel %vm1331_vm10, %v4292_v22, %v4296_v19  ;;  %v4580_v33 = vrot.slane %v6408_v10, 1 }
 0x38a   : > { %5533 = vmatprep.mubr.bf16.mxu0 %v4505_v18  ;;  %v6404_v18 = vcombine.low %v3892_v48, %v9528_v60  ;;  %v4575_v60 = vrot.slane %v9565_v44, 1 }
 0x38b   : > { %v4279_v46 = vrot.slane %v4277_v29, 1  ;;  %v4353_v31 = vsel %vm1492_vm9, %v4351_v43, %v4352_v42 }
 0x38c   : > { %v4568_v5 = vrot.slane %v6404_v18, 1 }
 0x38d   : > { %v4280_v0 = vor.u32 %v4279_v46, %v4275_v6 }
 0x38e   : > { %v4570_v38 = vsel %vm1492_vm9, %v4568_v5, %v4569_v16 }
 0x390   : > { %5437 = vmatmul.mubr.bf16.gmra.mrb[132].mxu1 %v4273_v56 }
 0x391   : > { %5534 = vmatmul.mubr.bf16.gmra.mrb[152].mxu0 %v9578_v1  ;;  %5444 = vmatprep.mubr.bf16.mxu1 %v4350_v52  ;;  %v4285_v1 = vsel %vm1331_vm10, %v4280_v0, %v4284_v63 }
 0x392   : > { %5541 = vmatprep.mubr.bf16.mxu0 %v4517_v50 }
 0x398   : > { %5445 = vmatmul.mubr.bf16.gmra.mrb[136].mxu1 %v4285_v1 }
 0x399   : > { %5542 = vmatmul.mubr.bf16.gmra.mrb[156].mxu0 %v9593_v8  ;;  %5452 = vmatprep.mubr.bf16.mxu1 %v4353_v31  ;;  %v3894_v8 = vld [vmem:[#allocation3 + $0x48] sm:$0xe] }
 0x39a   : > { %5549 = vmatprep.mubr.bf16.mxu0 %v4529_v12  ;;  %v6406_v11 = vcombine.low %v3894_v8, %v9560_v13 }
 0x39c   : > { %v4574_v39 = vrot.slane %v6406_v11, 1 }
 0x39e   : > { %v4576_v40 = vsel %vm1492_vm9, %v4574_v39, %v4575_v60 }
 0x3a0   : > { %5453 = vmatmul.mubr.bf16.gmra.mrb[140].mxu1 %v4297_v41 }
 0x3a1   : > { %5550 = vmatmul.mubr.bf16.gmra.mrb[160].mxu0 %v6393_v32  ;;  %7210 = vmatprep.mubr.bf16.mxu1 %v4564_v34  ;;  %v4572_v32 = vrot.slane %v9549_v58, 1  ;;  %v6407_v34 = vcombine.low %v3895_v27, %v9573_v25  ;;  %v4581_v58 = vrot.slane %v9601_v2, 1  ;;  %v4583_v25 = vrot.slane %v6409_v53, 1 }
 0x3a3   : > { %v4573_v35 = vsel %vm1492_vm9, %v4571_v9, %v4572_v32  ;;  %v4577_v13 = vrot.slane %v6407_v34, 1  ;;  %v4582_v28 = vsel %vm1492_vm9, %v4580_v33, %v4581_v58  ;;  %v4585_v29 = vsel %vm1492_vm9, %v4583_v25, %v4584_v23 }
 0x3a8   : > { %7211 = vmatmul.mubr.bf16.vlgmr.msra.gmra.mrb[144].mxu1 %v4567_v20  ;;  %v4578_v20 = vrot.slane %v9584_v3, 1 }
 0x3a9   : > { %7214 = vmatprep.mubr.bf16.mxu1 %v4570_v38 }
 0x3aa   : > { %v4579_v44 = vsel %vm1492_vm9, %v4577_v13, %v4578_v20 }
 0x3b0   : > { %7215 = vmatmul.mubr.bf16.gmra.mrb[148].mxu1 %v4573_v35 }
 0x3b1   : > { %7218 = vmatprep.mubr.bf16.mxu1 %v4576_v40 }
 0x3b8   : > { %7219 = vmatmul.mubr.bf16.gmra.mrb[152].mxu1 %v4579_v44 }
 0x3b9   : > { %7222 = vmatprep.mubr.bf16.mxu1 %v4582_v28 }
 0x3c0   : > { %7223 = vmatmul.mubr.bf16.gmra.mrb[156].mxu1 %v4585_v29 }
 0x3fb   : > { %v6902_v51 = vpop.f32.mrb[80].mxu1 }
 0x3fc   : > { %v6966_v36 = vpop.f32.mrb[100].mxu0  ;;  %v6903_v50 = vpop.f32.mrb[81].mxu1 }
 0x3fd   : > { %v6967_v3 = vpop.f32.mrb[101].mxu0  ;;  %v6904_v61 = vadd.f32 %v6903_v50, %v6902_v51  ;;  %v6905_v26 = vpop.f32.mrb[82].mxu1 }
 0x3fe   : > { %v6968_v54 = vadd.f32 %v6967_v3, %v6966_v36  ;;  %v6969_v2 = vpop.f32.mrb[102].mxu0  ;;  %v6906_v56 = vpop.f32.mrb[83].mxu1 }
 0x3ff   : > { %v6970_v15 = vpop.f32.mrb[103].mxu0  ;;  %v6907_v46 = vadd.f32 %v6906_v56, %v6905_v26 }
 0x400   : > { %v6971_v49 = vadd.f32 %v6970_v15, %v6969_v2  ;;  %v9655_v6 = vadd.f32 %v6968_v54, %v6904_v61 }
 0x402   : > { %v9657_v55 = vadd.f32 %v6971_v49, %v6907_v46 }
 0x403   : > { %v6908_v30 = vpop.f32.mrb[84].mxu1 }
 0x404   : > { %v6972_v37 = vpop.f32.mrb[104].mxu0  ;;  %v6909_v47 = vpop.f32.mrb[85].mxu1 }
 0x405   : > { %v6973_v52 = vpop.f32.mrb[105].mxu0  ;;  %v6910_v63 = vadd.f32 %v6909_v47, %v6908_v30  ;;  %v6911_v45 = vpop.f32.mrb[86].mxu1 }
 0x406   : > { %v6974_v14 = vadd.f32 %v6973_v52, %v6972_v37  ;;  %v6975_v62 = vpop.f32.mrb[106].mxu0  ;;  %v6912_v42 = vpop.f32.mrb[87].mxu1 }
 0x407   : > { %v6976_v0 = vpop.f32.mrb[107].mxu0  ;;  %v6913_v1 = vadd.f32 %v6912_v42, %v6911_v45 }
 0x408   : > { %v6977_v43 = vadd.f32 %v6976_v0, %v6975_v62  ;;  %v9659_v12 = vadd.f32 %v6974_v14, %v6910_v63 }
 0x40a   : > { %v9661_v57 = vadd.f32 %v6977_v43, %v6913_v1 }
 0x40b   : > { %v6914_v31 = vpop.f32.mrb[88].mxu1 }
 0x40c   : > { %v6978_v7 = vpop.f32.mrb[108].mxu0  ;;  %v6915_v48 = vpop.f32.mrb[89].mxu1 }
 0x40d   : > { %v6979_v24 = vpop.f32.mrb[109].mxu0  ;;  %v6916_v18 = vadd.f32 %v6915_v48, %v6914_v31  ;;  %v6917_v5 = vpop.f32.mrb[90].mxu1 }
 0x40e   : > { %v6980_v22 = vadd.f32 %v6979_v24, %v6978_v7  ;;  %v6981_v19 = vpop.f32.mrb[110].mxu0  ;;  %v6918_v21 = vpop.f32.mrb[91].mxu1 }
 0x40f   : > { %v6982_v41 = vpop.f32.mrb[111].mxu0  ;;  %v6919_v4 = vadd.f32 %v6918_v21, %v6917_v5 }
 0x410   : > { %v6983_v16 = vadd.f32 %v6982_v41, %v6981_v19  ;;  %v9663_v8 = vadd.f32 %v6980_v22, %v6916_v18 }
 0x412   : > { %v9665_v38 = vadd.f32 %v6983_v16, %v6919_v4 }
 0x413   : > { %v6920_v32 = vpop.f32.mrb[92].mxu1 }
 0x414   : > { %v6984_v11 = vpop.f32.mrb[112].mxu0  ;;  %v6921_v27 = vpop.f32.mrb[93].mxu1 }
 0x415   : > { %v6985_v9 = vpop.f32.mrb[113].mxu0  ;;  %v6922_v35 = vadd.f32 %v6921_v27, %v6920_v32  ;;  %v6923_v34 = vpop.f32.mrb[94].mxu1 }
 0x416   : > { %v6986_v39 = vadd.f32 %v6985_v9, %v6984_v11  ;;  %v6987_v60 = vpop.f32.mrb[114].mxu0  ;;  %v6924_v10 = vpop.f32.mrb[95].mxu1 }
 0x417   : > { %v6988_v59 = vpop.f32.mrb[115].mxu0  ;;  %v6925_v20 = vadd.f32 %v6924_v10, %v6923_v34 }
 0x418   : > { %v6989_v40 = vadd.f32 %v6988_v59, %v6987_v60  ;;  %v9667_v13 = vadd.f32 %v6986_v39, %v6922_v35 }
 0x41a   : > { %v9669_v33 = vadd.f32 %v6989_v40, %v6925_v20 }
 0x41b   : > { %v6926_v44 = vpop.f32.mrb[96].mxu1 }
 0x41c   : > { %v6990_v58 = vpop.f32.mrb[116].mxu0  ;;  %v6927_v25 = vpop.f32.mrb[97].mxu1 }
 0x41d   : > { %v6991_v17 = vpop.f32.mrb[117].mxu0  ;;  %v6928_v29 = vadd.f32 %v6927_v25, %v6926_v44  ;;  %v6929_v36 = vpop.f32.mrb[98].mxu1 }
 0x41e   : > { %v6992_v53 = vadd.f32 %v6991_v17, %v6990_v58  ;;  %v6993_v28 = vpop.f32.mrb[118].mxu0  ;;  %v6930_v51 = vpop.f32.mrb[99].mxu1 }
 0x41f   : > { %v6994_v23 = vpop.f32.mrb[119].mxu0  ;;  %v6931_v2 = vadd.f32 %v6930_v51, %v6929_v36 }
 0x420   : > { %v6995_v3 = vadd.f32 %v6994_v23, %v6993_v28  ;;  %v9671_v54 = vadd.f32 %v6992_v53, %v6928_v29 }
 0x422   : > { %v9673_v50 = vadd.f32 %v6995_v3, %v6931_v2 }
 0x423   : > { %v6932_v26 = vpop.f32.mrb[100].mxu1 }
 0x424   : > { %v6996_v15 = vpop.f32.mrb[120].mxu0  ;;  %v6933_v46 = vpop.f32.mrb[101].mxu1 }
 0x425   : > { %v6997_v61 = vpop.f32.mrb[121].mxu0  ;;  %v6934_v52 = vadd.f32 %v6933_v46, %v6932_v26  ;;  %v6935_v30 = vpop.f32.mrb[102].mxu1 }
 0x426   : > { %v6998_v49 = vadd.f32 %v6997_v61, %v6996_v15  ;;  %v6999_v56 = vpop.f32.mrb[122].mxu0  ;;  %v6936_v62 = vpop.f32.mrb[103].mxu1 }
 0x427   : > { %v7000_v37 = vpop.f32.mrb[123].mxu0  ;;  %v6937_v0 = vadd.f32 %v6936_v62, %v6935_v30 }
 0x428   : > { %v7001_v14 = vadd.f32 %v7000_v37, %v6999_v56  ;;  %v9675_v47 = vadd.f32 %v6998_v49, %v6934_v52 }
 0x42a   : > { %v9677_v63 = vadd.f32 %v7001_v14, %v6937_v0 }
 0x42b   : > { %v6938_v42 = vpop.f32.mrb[104].mxu1 }
 0x42c   : > { %v7002_v45 = vpop.f32.mrb[124].mxu0  ;;  %v6939_v24 = vpop.f32.mrb[105].mxu1 }
 0x42d   : > { %v7003_v43 = vpop.f32.mrb[125].mxu0  ;;  %v6940_v22 = vadd.f32 %v6939_v24, %v6938_v42  ;;  %v6941_v19 = vpop.f32.mrb[106].mxu1 }
 0x42e   : > { %v7004_v1 = vadd.f32 %v7003_v43, %v7002_v45  ;;  %v7005_v7 = vpop.f32.mrb[126].mxu0  ;;  %v6942_v41 = vpop.f32.mrb[107].mxu1 }
 0x42f   : > { %v7006_v31 = vpop.f32.mrb[127].mxu0  ;;  %v6943_v5 = vadd.f32 %v6942_v41, %v6941_v19 }
 0x430   : > { %v7007_v48 = vadd.f32 %v7006_v31, %v7005_v7  ;;  %v9679_v18 = vadd.f32 %v7004_v1, %v6940_v22 }
 0x432   : > { %v9681_v16 = vadd.f32 %v7007_v48, %v6943_v5 }
 0x433   : > { %v6944_v11 = vpop.f32.mrb[108].mxu1 }
 0x434   : > { %v7008_v21 = vpop.f32.mrb[128].mxu0  ;;  %v6945_v39 = vpop.f32.mrb[109].mxu1 }
 0x435   : > { %v7009_v4 = vpop.f32.mrb[129].mxu0  ;;  %v6946_v27 = vadd.f32 %v6945_v39, %v6944_v11  ;;  %v6947_v59 = vpop.f32.mrb[110].mxu1 }
 0x436   : > { %v7010_v9 = vadd.f32 %v7009_v4, %v7008_v21  ;;  %v7011_v32 = vpop.f32.mrb[130].mxu0  ;;  %v6948_v34 = vpop.f32.mrb[111].mxu1 }
 0x437   : > { %v7012_v60 = vpop.f32.mrb[131].mxu0  ;;  %v6949_v10 = vadd.f32 %v6948_v34, %v6947_v59 }
 0x438   : > { %v7013_v35 = vadd.f32 %v7012_v60, %v7011_v32  ;;  %v9683_v40 = vadd.f32 %v7010_v9, %v6946_v27 }
 0x43a   : > { %v9685_v20 = vadd.f32 %v7013_v35, %v6949_v10 }
 0x43b   : > { %v7030_v44 = vpop.f32.mrb[112].mxu1 }
 0x43c   : > { %v7094_v58 = vpop.f32.mrb[132].mxu0  ;;  %v7031_v25 = vpop.f32.mrb[113].mxu1 }
 0x43d   : > { %v7095_v17 = vpop.f32.mrb[133].mxu0  ;;  %v7032_v29 = vadd.f32 %v7031_v25, %v7030_v44  ;;  %v7033_v36 = vpop.f32.mrb[114].mxu1 }
 0x43e   : > { %v7096_v53 = vadd.f32 %v7095_v17, %v7094_v58  ;;  %v7097_v28 = vpop.f32.mrb[134].mxu0  ;;  %v7034_v51 = vpop.f32.mrb[115].mxu1 }
 0x43f   : > { %v7098_v23 = vpop.f32.mrb[135].mxu0  ;;  %v5399_v2 = vadd.f32 %v7032_v29, %v9655_v6  ;;  %v7035_v15 = vadd.f32 %v7034_v51, %v7033_v36 }
 0x440   : > { %v7099_v3 = vadd.f32 %v7098_v23, %v7097_v28 }
 0x441   : > { %v5402_v61 = vadd.f32 %v7035_v15, %v9657_v55  ;;  %v9689_v49 = vadd.f32 %v7096_v53, %v5399_v2 }
 0x443   : > { %v7036_v46 = vpop.f32.mrb[116].mxu1  ;;  %v9691_v30 = vadd.f32 %v7099_v3, %v5402_v61 }
 0x444   : > { %v7100_v26 = vpop.f32.mrb[136].mxu0  ;;  %v7037_v14 = vpop.f32.mrb[117].mxu1 }
 0x445   : > { %v7101_v56 = vpop.f32.mrb[137].mxu0  ;;  %v7038_v0 = vadd.f32 %v7037_v14, %v7036_v46  ;;  %v7039_v45 = vpop.f32.mrb[118].mxu1 }
 0x446   : > { %v7102_v37 = vadd.f32 %v7101_v56, %v7100_v26  ;;  %v7103_v52 = vpop.f32.mrb[138].mxu0  ;;  %v7040_v42 = vpop.f32.mrb[119].mxu1 }
 0x447   : > { %v7104_v62 = vpop.f32.mrb[139].mxu0  ;;  %v5407_v6 = vadd.f32 %v7038_v0, %v9659_v12  ;;  %v7041_v1 = vadd.f32 %v7040_v42, %v7039_v45 }
 0x448   : > { %v7105_v43 = vadd.f32 %v7104_v62, %v7103_v52 }
 0x449   : > { %v5410_v55 = vadd.f32 %v7041_v1, %v9661_v57  ;;  %v9695_v24 = vadd.f32 %v7102_v37, %v5407_v6 }
 0x44b   : > { %v7042_v22 = vpop.f32.mrb[120].mxu1  ;;  %v9697_v41 = vadd.f32 %v7105_v43, %v5410_v55 }
 0x44c   : > { %v7106_v7 = vpop.f32.mrb[140].mxu0  ;;  %v7043_v5 = vpop.f32.mrb[121].mxu1 }
 0x44d   : > { %v7107_v31 = vpop.f32.mrb[141].mxu0  ;;  %v7044_v4 = vadd.f32 %v7043_v5, %v7042_v22  ;;  %v7045_v11 = vpop.f32.mrb[122].mxu1 }
 0x44e   : > { %v7108_v19 = vadd.f32 %v7107_v31, %v7106_v7  ;;  %v7109_v48 = vpop.f32.mrb[142].mxu0  ;;  %v7046_v32 = vpop.f32.mrb[123].mxu1 }
 0x44f   : > { %v7110_v21 = vpop.f32.mrb[143].mxu0  ;;  %v5415_v12 = vadd.f32 %v7044_v4, %v9663_v8  ;;  %v7047_v39 = vadd.f32 %v7046_v32, %v7045_v11 }
 0x450   : > { %v7111_v9 = vadd.f32 %v7110_v21, %v7109_v48 }
 0x451   : > { %v5418_v57 = vadd.f32 %v7047_v39, %v9665_v38  ;;  %v9701_v27 = vadd.f32 %v7108_v19, %v5415_v12 }
 0x453   : > { %v7048_v35 = vpop.f32.mrb[124].mxu1  ;;  %v9703_v58 = vadd.f32 %v7111_v9, %v5418_v57 }
 0x454   : > { %v7112_v60 = vpop.f32.mrb[144].mxu0  ;;  %v7049_v17 = vpop.f32.mrb[125].mxu1 }
 0x455   : > { %v7113_v59 = vpop.f32.mrb[145].mxu0  ;;  %v7050_v53 = vadd.f32 %v7049_v17, %v7048_v35  ;;  %v7051_v28 = vpop.f32.mrb[126].mxu1 }
 0x456   : > { %v7114_v34 = vadd.f32 %v7113_v59, %v7112_v60  ;;  %v7115_v10 = vpop.f32.mrb[146].mxu0  ;;  %v7052_v23 = vpop.f32.mrb[127].mxu1 }
 0x457   : > { %v7116_v44 = vpop.f32.mrb[147].mxu0  ;;  %v5423_v8 = vadd.f32 %v7050_v53, %v9667_v13  ;;  %v7053_v29 = vadd.f32 %v7052_v23, %v7051_v28 }
 0x458   : > { %v7117_v25 = vadd.f32 %v7116_v44, %v7115_v10 }
 0x459   : > { %v5426_v38 = vadd.f32 %v7053_v29, %v9669_v33  ;;  %v9707_v3 = vadd.f32 %v7114_v34, %v5423_v8 }
 0x45b   : > { %v7054_v2 = vpop.f32.mrb[128].mxu1  ;;  %v9709_v26 = vadd.f32 %v7117_v25, %v5426_v38 }
 0x45c   : > { %v7118_v36 = vpop.f32.mrb[148].mxu0  ;;  %v7055_v56 = vpop.f32.mrb[129].mxu1 }
 0x45d   : > { %v7119_v51 = vpop.f32.mrb[149].mxu0  ;;  %v7056_v37 = vadd.f32 %v7055_v56, %v7054_v2  ;;  %v7057_v52 = vpop.f32.mrb[130].mxu1 }
 0x45e   : > { %v7120_v15 = vadd.f32 %v7119_v51, %v7118_v36  ;;  %v7121_v61 = vpop.f32.mrb[150].mxu0  ;;  %v7058_v62 = vpop.f32.mrb[131].mxu1 }
 0x45f   : > { %v7122_v46 = vpop.f32.mrb[151].mxu0  ;;  %v5431_v13 = vadd.f32 %v7056_v37, %v9671_v54  ;;  %v7059_v0 = vadd.f32 %v7058_v62, %v7057_v52  ;;  %v9737_v62 = vld [vmem:[%s9971_s5] ss:$0 sm:$0xff] }
 0x460   : > { %v7123_v14 = vadd.f32 %v7122_v46, %v7121_v61 }
 0x461   : > { %v5434_v33 = vadd.f32 %v7059_v0, %v9673_v50  ;;  %v9713_v43 = vadd.f32 %v7120_v15, %v5431_v13 }
 0x463   : > { %v7060_v6 = vpop.f32.mrb[132].mxu1  ;;  %v9715_v7 = vadd.f32 %v7123_v14, %v5434_v33 }
 0x464   : > { %v7124_v45 = vpop.f32.mrb[152].mxu0  ;;  %v7061_v31 = vpop.f32.mrb[133].mxu1 }
 0x465   : > { %v7125_v42 = vpop.f32.mrb[153].mxu0  ;;  %v7062_v19 = vadd.f32 %v7061_v31, %v7060_v6  ;;  %v7063_v48 = vpop.f32.mrb[134].mxu1 }
 0x466   : > { %v7126_v1 = vadd.f32 %v7125_v42, %v7124_v45  ;;  %v7127_v55 = vpop.f32.mrb[154].mxu0  ;;  %v7064_v21 = vpop.f32.mrb[135].mxu1 }
 0x467   : > { %v7128_v22 = vpop.f32.mrb[155].mxu0  ;;  %v5439_v54 = vadd.f32 %v7062_v19, %v9675_v47  ;;  %v7065_v4 = vadd.f32 %v7064_v21, %v7063_v48  ;;  %v5703_v19 = vld [vmem:[%s9743_s1] sm:$0xff] }
 0x468   : > { %v7129_v5 = vadd.f32 %v7128_v22, %v7127_v55 }
 0x469   : > { %v5442_v50 = vadd.f32 %v7065_v4, %v9677_v63  ;;  %v9719_v9 = vadd.f32 %v7126_v1, %v5439_v54  ;;  %v5705_v1 = vld [vmem:[%s9743_s1 + $0x10] sm:$0xff]  ;;  %v5704_v4 = vld [vmem:[%s9743_s1 + $0x8] sm:$0xff] }
 0x46b   : > { %v7066_v12 = vpop.f32.mrb[136].mxu1  ;;  %v9721_v60 = vadd.f32 %v7129_v5, %v5442_v50 }
 0x46c   : > { %v7130_v11 = vpop.f32.mrb[156].mxu0  ;;  %v7067_v59 = vpop.f32.mrb[137].mxu1 }
 0x46d   : > { %v7131_v32 = vpop.f32.mrb[157].mxu0  ;;  %v7068_v34 = vadd.f32 %v7067_v59, %v7066_v12  ;;  %v7069_v10 = vpop.f32.mrb[138].mxu1 }
 0x46e   : > { %v7132_v39 = vadd.f32 %v7131_v32, %v7130_v11  ;;  %v7133_v57 = vpop.f32.mrb[158].mxu0  ;;  %v7070_v44 = vpop.f32.mrb[139].mxu1 }
 0x46f   : > { %v7134_v35 = vpop.f32.mrb[159].mxu0  ;;  %v5447_v47 = vadd.f32 %v7068_v34, %v9679_v18  ;;  %v7071_v53 = vadd.f32 %v7070_v44, %v7069_v10 }
 0x470   : > { %v7135_v17 = vadd.f32 %v7134_v35, %v7133_v57 }
 0x471   : > { %v5450_v63 = vadd.f32 %v7071_v53, %v9681_v16  ;;  %v9725_v25 = vadd.f32 %v7132_v39, %v5447_v47 }
 0x473   : > { %v7072_v8 = vpop.f32.mrb[140].mxu1  ;;  %v9727_v36 = vadd.f32 %v7135_v17, %v5450_v63  ;;  %v5709_v63 = vld [vmem:[%s9743_s1 + $0x30] sm:$0xff] }
 0x474   : > { %v7136_v28 = vpop.f32.mrb[160].mxu0  ;;  %v7073_v51 = vpop.f32.mrb[141].mxu1 }
 0x475   : > { %v7137_v23 = vpop.f32.mrb[161].mxu0  ;;  %v7074_v15 = vadd.f32 %v7073_v51, %v7072_v8  ;;  %v7075_v61 = vpop.f32.mrb[142].mxu1  ;;  %v5707_v8 = vld [vmem:[%s9743_s1 + $0x20] sm:$0xff] }
 0x476   : > { %v7138_v29 = vadd.f32 %v7137_v23, %v7136_v28  ;;  %v7139_v38 = vpop.f32.mrb[162].mxu0  ;;  %v7076_v18 = vpop.f32.mrb[143].mxu1 }
 0x477   : > { %v7140_v2 = vpop.f32.mrb[163].mxu0  ;;  %v5455_v46 = vadd.f32 %v7074_v15, %v9683_v40  ;;  %v7077_v16 = vadd.f32 %v7076_v18, %v7075_v61  ;;  %v5708_v61 = vld [vmem:[%s9743_s1 + $0x28] sm:$0xff] }
 0x478   : > { %v7141_v56 = vadd.f32 %v7140_v2, %v7139_v38 }
 0x479   : > { %v5458_v37 = vadd.f32 %v7077_v16, %v9685_v20  ;;  %v9732_v52 = vadd.f32 %v7138_v29, %v5455_v46  ;;  %v9748_v20 = vld [vmem:[%s10024_s12] ss:$0 sm:$0xff]  ;;  %s7900_s12 = scalar_lea.vmem %s7899_s24, 4096 }
 0x47b   : > { %v7212_v14 = vpop.f32.mrb[144].mxu1  ;;  %v9739_v13 = vadd.f32 %v7141_v56, %v5458_v37 }
 0x47c   : > { %v5601_v0 = vadd.f32 %v7212_v14, %v9695_v24  ;;  %v5592_v40 = vpop.f32.mrb[145].mxu1 }
 0x47d   : > { %v5593_v33 = vadd.f32 %v5592_v40, %v9689_v49  ;;  %v7213_v45 = vpop.f32.mrb[146].mxu1  ;;  %v5706_v49 = vld [vmem:[%s9743_s1 + $0x18] sm:$0xff] }
 0x47e   : > { %v5664_v42 = vmul.f32 %v9737_v62, %v5601_v0  ;;  %v5604_v6 = vadd.f32 %v7213_v45, %v9697_v41  ;;  %v5595_v24 = vpop.f32.mrb[147].mxu1 }
 0x47f   : > { %v5662_v55 = vmul.f32 %v9737_v62, %v5593_v33  ;;  %v5596_v31 = vadd.f32 %v5595_v24, %v9691_v30 }
 0x480   : > { %v5687_v22 = vadd.f32 %v9748_v20, %v5664_v42  ;;  %v5665_v48 = vmul.f32 %v9737_v62, %v5604_v6 }
 0x481   : > { %v5685_v5 = vadd.f32 %v9748_v20, %v5662_v55  ;;  %v5663_v21 = vmul.f32 %v9737_v62, %v5596_v31  ;;  %v5713_v55 = vld [vmem:[%s9743_s1 + $0x50] sm:$0xff] }
 0x482   : > { %v9762_v54 = vadd.f32 %v5705_v1, %v5687_v22  ;;  %v5688_v41 = vadd.f32 %v9748_v20, %v5665_v48  ;;  %v5711_v48 = vld [vmem:[%s9743_s1 + $0x40] sm:$0xff] }
 0x483   : > { %v9766_v50 = vadd.f32 %v5703_v19, %v5685_v5  ;;  %v5686_v11 = vadd.f32 %v9748_v20, %v5663_v21  ;;  %v7216_v30 = vpop.f32.mrb[148].mxu1 }
 0x484   : > { %v6487_v32 = vmul.f32 -1.442695, %v9762_v54  ;;  %v9770_v12 = vadd.f32 %v5706_v49, %v5688_v41  ;;  %v5617_v39 = vadd.f32 %v7216_v30, %v9707_v3  ;;  %v5608_v57 = vpop.f32.mrb[149].mxu1  ;;  %v5714_v41 = vld [vmem:[%s9743_s1 + $0x58] sm:$0xff] }
 0x485   : > { %v6485_v59 = vmul.f32 -1.442695, %v9766_v50  ;;  %v9774_v35 = vadd.f32 %v5704_v4, %v5686_v11  ;;  %v5609_v34 = vadd.f32 %v5608_v57, %v9701_v27  ;;  %v7217_v10 = vpop.f32.mrb[150].mxu1 }
 0x486   : > { %7744 = vpow2.f32 %v6487_v32  ;;  %v6488_v17 = vmul.f32 -1.442695, %v9770_v12  ;;  %v5668_v44 = vmul.f32 %v9737_v62, %v5617_v39  ;;  %v5620_v47 = vadd.f32 %v7217_v10, %v9709_v26  ;;  %v5611_v53 = vpop.f32.mrb[151].mxu1  ;;  %v5710_v26 = vld [vmem:[%s9743_s1 + $0x38] sm:$0xff]  ;;  %v5712_v39 = vld [vmem:[%s9743_s1 + $0x48] sm:$0xff] }
 0x487   : > { %7746 = vpow2.f32 %v6485_v59  ;;  %v6486_v3 = vmul.f32 -1.442695, %v9774_v35  ;;  %v5666_v28 = vmul.f32 %v9737_v62, %v5609_v34  ;;  %v5612_v23 = vadd.f32 %v5611_v53, %v9703_v58 }
 0x488   : > { %7748 = vpow2.f32 %v6488_v17  ;;  %v5691_v27 = vadd.f32 %v9748_v20, %v5668_v44  ;;  %v5669_v29 = vmul.f32 %v9737_v62, %v5620_v47 }
 0x489   : > { %7750 = vpow2.f32 %v6486_v3  ;;  %v5689_v38 = vadd.f32 %v9748_v20, %v5666_v28  ;;  %v5667_v51 = vmul.f32 %v9737_v62, %v5612_v23 }
 0x48a   : > { %v9790_v2 = vadd.f32 %v5709_v63, %v5691_v27  ;;  %v5692_v15 = vadd.f32 %v9748_v20, %v5669_v29 }
 0x48b   : > { %v9794_v56 = vadd.f32 %v5707_v8, %v5689_v38  ;;  %v5690_v58 = vadd.f32 %v9748_v20, %v5667_v51  ;;  %v7220_v18 = vpop.f32.mrb[152].mxu1 }
 0x48c   : > { %v6491_v46 = vmul.f32 -1.442695, %v9790_v2  ;;  %v9798_v16 = vadd.f32 %v5710_v26, %v5692_v15  ;;  %v5633_v37 = vadd.f32 %v7220_v18, %v9719_v9  ;;  %v5624_v14 = vpop.f32.mrb[153].mxu1 }
 0x48d   : > { %v6489_v0 = vmul.f32 -1.442695, %v9794_v56  ;;  %v9802_v40 = vadd.f32 %v5708_v61, %v5690_v58  ;;  %v5625_v33 = vadd.f32 %v5624_v14, %v9713_v43  ;;  %v7221_v45 = vpop.f32.mrb[154].mxu1  ;;  %v5715_v14 = vld [vmem:[%s9743_s1 + $0x60] sm:$0xff] }
 0x48e   : > { %7752 = vpow2.f32 %v6491_v46  ;;  %v6492_v42 = vmul.f32 -1.442695, %v9798_v16  ;;  %v5672_v6 = vmul.f32 %v9737_v62, %v5633_v37  ;;  %v5636_v24 = vadd.f32 %v7221_v45, %v9721_v60  ;;  %v5627_v1 = vpop.f32.mrb[155].mxu1 }
 0x48f   : > { %7754 = vpow2.f32 %v6489_v0  ;;  %v6490_v9 = vmul.f32 -1.442695, %v9802_v40  ;;  %v5670_v31 = vmul.f32 %v9737_v62, %v5625_v33  ;;  %v5628_v22 = vadd.f32 %v5627_v1, %v9715_v7  ;;  %v5718_v0 = vld [vmem:[%s9743_s1 + $0x78] sm:$0xff] }
 0x490   : > { %v7745_v43 = vpop.eup %7744  ;;  %7756 = vpow2.f32 %v6492_v42  ;;  %v5695_v19 = vadd.f32 %v9748_v20, %v5672_v6  ;;  %v5673_v5 = vmul.f32 %v9737_v62, %v5636_v24  ;;  %v5716_v24 = vld [vmem:[%s9743_s1 + $0x68] sm:$0xff] }
 0x491   : > { %v7747_v49 = vpop.eup %7746  ;;  %v5785_v60 = vadd.f32 1.0, %v7745_v43  ;;  %7758 = vpow2.f32 %v6490_v9  ;;  %v5693_v21 = vadd.f32 %v9748_v20, %v5670_v31  ;;  %v5671_v4 = vmul.f32 %v9737_v62, %v5628_v22 }
 0x492   : > { %v7749_v11 = vpop.eup %7748  ;;  %v5783_v30 = vadd.f32 1.0, %v7747_v49  ;;  %v9818_v32 = vadd.f32 %v5713_v55, %v5695_v19  ;;  %v5696_v7 = vadd.f32 %v9748_v20, %v5673_v5 }
 0x493   : > { %v7751_v57 = vpop.eup %7750  ;;  %7760 = vrcp.f32 %v5785_v60  ;;  %v5786_v59 = vadd.f32 1.0, %v7749_v11  ;;  %v9822_v34 = vadd.f32 %v5711_v48, %v5693_v21  ;;  %v5694_v10 = vadd.f32 %v9748_v20, %v5671_v4  ;;  %v7224_v17 = vpop.f32.mrb[156].mxu1 }
 0x494   : > { %7762 = vrcp.f32 %v5783_v30  ;;  %v5784_v44 = vadd.f32 1.0, %v7751_v57  ;;  %v6495_v47 = vmul.f32 -1.442695, %v9818_v32  ;;  %v9826_v53 = vadd.f32 %v5714_v41, %v5696_v7  ;;  %v5640_v3 = vpop.f32.mrb[157].mxu1 }
 0x495   : > { %7764 = vrcp.f32 %v5786_v59  ;;  %v6493_v63 = vmul.f32 -1.442695, %v9822_v34  ;;  %v9829_v28 = vadd.f32 %v5712_v39, %v5694_v10  ;;  %v5649_v23 = vadd.f32 %v7224_v17, %v9732_v52  ;;  %v7225_v27 = vpop.f32.mrb[158].mxu1  ;;  %v5717_v52 = vld [vmem:[%s9743_s1 + $0x70] sm:$0xff]  ;;  %s7894_s1 = scalar_lea.vmem %s9897_s18, 2048 }
 0x496   : > { %7766 = vrcp.f32 %v5784_v44  ;;  %v6496_v8 = vmul.f32 -1.442695, %v9826_v53  ;;  %v5641_v29 = vadd.f32 %v5640_v3, %v9725_v25  ;;  %v5652_v38 = vadd.f32 %v7225_v27, %v9739_v13  ;;  %v5643_v26 = vpop.f32.mrb[159].mxu1  ;;  %p7895_p3 = scmp.ne.s32.totalorder %s9897_s18, %s7894_s1  ;;  %p7902_p5 = scmp.lt.s32.totalorder %s7900_s12, %s7894_s1 }
 0x497   : > { %7768 = vpow2.f32 %v6495_v47  ;;  %v6494_v51 = vmul.f32 -1.442695, %v9829_v28  ;;  %v5676_v15 = vmul.f32 %v9737_v62, %v5649_v23  ;;  %v5644_v61 = vadd.f32 %v5643_v26, %v9727_v36 }
 0x498   : > { %v7753_v58 = vpop.eup %7752  ;;  %7770 = vpow2.f32 %v6493_v63  ;;  %v5674_v18 = vmul.f32 %v9737_v62, %v5641_v29  ;;  %v5677_v25 = vmul.f32 %v9737_v62, %v5652_v38  ;;  %p7896_p7 = pnand %p7895_p3, %p10028_p13  ;;  %p7903_p8 = por %p7902_p5, %p7901_p11 }
 0x499   : > { %v7755_v46 = vpop.eup %7754  ;;  %v5789_v37 = vadd.f32 1.0, %v7753_v58  ;;  %7772 = vpow2.f32 %v6496_v8  ;;  %v5699_v13 = vadd.f32 %v9748_v20, %v5676_v15  ;;  %v5675_v33 = vmul.f32 %v9737_v62, %v5644_v61 }
 0x49a   : > { %v7757_v45 = vpop.eup %7756  ;;  %v5787_v42 = vadd.f32 1.0, %v7755_v46  ;;  %7774 = vpow2.f32 %v6494_v51  ;;  %v5697_v36 = vadd.f32 %v9748_v20, %v5674_v18  ;;  %v5700_v6 = vadd.f32 %v9748_v20, %v5677_v25  ;;  %p7897_p9 = pneg %p7896_p7 }
 0x49b   : > { %v7759_v1 = vpop.eup %7758  ;;  %7776 = vrcp.f32 %v5789_v37  ;;  %v5790_v9 = vadd.f32 1.0, %v7757_v45  ;;  %v9848_v55 = vadd.f32 %v5717_v52, %v5699_v13  ;;  %v5698_v31 = vadd.f32 %v9748_v20, %v5675_v33 }
 0x49c   : > { %7778 = vrcp.f32 %v5787_v42  ;;  %v5788_v22 = vadd.f32 1.0, %v7759_v1  ;;  %v9851_v43 = vadd.f32 %v5715_v14, %v5697_v36  ;;  %v9853_v62 = vadd.f32 %v5718_v0, %v5700_v6  ;;  %p7904_p12 = pnand %p7903_p8, %p7897_p9 }
 0x49d   : > { %v7761_v19 = vpop.eup %7760  ;;  %7780 = vrcp.f32 %v5790_v9  ;;  %v6499_v48 = vmul.f32 -1.442695, %v9848_v55  ;;  %v9856_v5 = vadd.f32 %v5716_v24, %v5698_v31 }
 0x49e   : > { %v7763_v49 = vpop.eup %7762  ;;  %v5833_v60 = vmul.f32 %v7761_v19, %v9762_v54  ;;  %7782 = vrcp.f32 %v5788_v22  ;;  %v6497_v20 = vmul.f32 -1.442695, %v9851_v43  ;;  %v6500_v21 = vmul.f32 -1.442695, %v9853_v62 }
 0x49f   : > { %v7765_v41 = vpop.eup %7764  ;;  %v5831_v4 = vmul.f32 %v7763_v49, %v9766_v50  ;;  %7784 = vpow2.f32 %v6499_v48  ;;  %v6498_v11 = vmul.f32 -1.442695, %v9856_v5 }
 0x4a0   : > { %v7767_v30 = vpop.eup %7766  ;;  %5849 = vst [vmem:[%s8306_s6 + $0x10] sm:$0xff] %v5833_v60  ;;  %v5834_v7 = vmul.f32 %v7765_v41, %v9770_v12  ;;  %7786 = vpow2.f32 %v6497_v20 }
 0x4a1   : > { %v7769_v39 = vpop.eup %7768  ;;  %5847 = vst [vmem:[%s8306_s6] sm:$0xff] %v5831_v4  ;;  %v5832_v54 = vmul.f32 %v7767_v30, %v9774_v35  ;;  %7788 = vpow2.f32 %v6500_v21 }
 0x4a2   : > { %v7771_v57 = vpop.eup %7770  ;;  %5850 = vst [vmem:[%s8306_s6 + $0x18] sm:$0xff] %v5834_v7  ;;  %v5793_v59 = vadd.f32 1.0, %v7769_v39  ;;  %7790 = vpow2.f32 %v6498_v11 }
 0x4a3   : > { %v7773_v10 = vpop.eup %7772  ;;  %5848 = vst [vmem:[%s8306_s6 + $0x8] sm:$0xff] %v5832_v54  ;;  %v5791_v50 = vadd.f32 1.0, %v7771_v57 }
 0x4a4   : > { %v7775_v17 = vpop.eup %7774  ;;  %7792 = vrcp.f32 %v5793_v59  ;;  %v5794_v44 = vadd.f32 1.0, %v7773_v10 }
 0x4a5   : > { %v7777_v47 = vpop.eup %7776  ;;  %7794 = vrcp.f32 %v5791_v50  ;;  %v5792_v12 = vadd.f32 1.0, %v7775_v17 }
 0x4a6   : > { %v7779_v3 = vpop.eup %7778  ;;  %v5837_v35 = vmul.f32 %v7777_v47, %v9790_v2  ;;  %7796 = vrcp.f32 %v5794_v44 }
 0x4a7   : > { %v7781_v63 = vpop.eup %7780  ;;  %v5835_v23 = vmul.f32 %v7779_v3, %v9794_v56  ;;  %7798 = vrcp.f32 %v5792_v12 }
 0x4a8   : > { %v7783_v27 = vpop.eup %7782  ;;  %5853 = vst [vmem:[%s8306_s6 + $0x30] sm:$0xff] %v5837_v35  ;;  %v5838_v8 = vmul.f32 %v7781_v63, %v9798_v16 }
 0x4a9   : > { %v7785_v29 = vpop.eup %7784  ;;  %5851 = vst [vmem:[%s8306_s6 + $0x20] sm:$0xff] %v5835_v23  ;;  %v5836_v38 = vmul.f32 %v7783_v27, %v9802_v40 }
 0x4aa   : > { %v7787_v26 = vpop.eup %7786  ;;  %5854 = vst [vmem:[%s8306_s6 + $0x38] sm:$0xff] %v5838_v8  ;;  %v5797_v51 = vadd.f32 1.0, %v7785_v29 }
 0x4ab   : > { %v7789_v15 = vpop.eup %7788  ;;  %5852 = vst [vmem:[%s8306_s6 + $0x28] sm:$0xff] %v5836_v38  ;;  %v5795_v2 = vadd.f32 1.0, %v7787_v26 }
 0x4ac   : > { %v7791_v61 = vpop.eup %7790  ;;  %7800 = vrcp.f32 %v5797_v51  ;;  %v5798_v56 = vadd.f32 1.0, %v7789_v15 }
 0x4ad   : > { %7802 = vrcp.f32 %v5795_v2  ;;  %v5796_v16 = vadd.f32 1.0, %v7791_v61 }
 0x4ae   : > { %v7793_v58 = vpop.eup %7792  ;;  %7804 = vrcp.f32 %v5798_v56 }
 0x4af   : > { %v7795_v40 = vpop.eup %7794  ;;  %v5841_v52 = vmul.f32 %v7793_v58, %v9818_v32  ;;  %7806 = vrcp.f32 %v5796_v16 }
 0x4b0   : > { %v7797_v18 = vpop.eup %7796  ;;  %v5839_v25 = vmul.f32 %v7795_v40, %v9822_v34 }
 0x4b1   : > { %v7799_v46 = vpop.eup %7798  ;;  %5857 = vst [vmem:[%s8306_s6 + $0x50] sm:$0xff] %v5841_v52  ;;  %v5842_v37 = vmul.f32 %v7797_v18, %v9826_v53 }
 0x4b2   : > { %5855 = vst [vmem:[%s8306_s6 + $0x40] sm:$0xff] %v5839_v25  ;;  %v5840_v13 = vmul.f32 %v7799_v46, %v9829_v28 }
 0x4b3   : > { %5858 = vst [vmem:[%s8306_s6 + $0x58] sm:$0xff] %v5842_v37 }
 0x4b4   : > { %5856 = vst [vmem:[%s8306_s6 + $0x48] sm:$0xff] %v5840_v13 }
 0x4b6   : > { %v7801_v32 = vpop.eup %7800 }
 0x4b7   : > { %v7803_v34 = vpop.eup %7802  ;;  %v5845_v14 = vmul.f32 %v7801_v32, %v9848_v55 }
 0x4b8   : > { %v7805_v0 = vpop.eup %7804  ;;  %v5843_v53 = vmul.f32 %v7803_v34, %v9851_v43 }
 0x4b9   : > { %v7807_v33 = vpop.eup %7806  ;;  %5861 = vst [vmem:[%s8306_s6 + $0x70] sm:$0xff] %v5845_v14  ;;  %v5846_v28 = vmul.f32 %v7805_v0, %v9853_v62 }
 0x4ba   : > { %5859 = vst [vmem:[%s8306_s6 + $0x60] sm:$0xff] %v5843_v53  ;;  %v5844_v45 = vmul.f32 %v7807_v33, %v9856_v5 }
 0x4bb   : > { %5862 = vst [vmem:[%s8306_s6 + $0x78] sm:$0xff] %v5846_v28 }
 0x4bc   : > { %5860 = vst [vmem:[%s8306_s6 + $0x68] sm:$0xff] %v5844_v45 }
 0x4bd   : > { %7907 = shalt.err (!%p7904_p12)
}
 0x4be   : > { %s7908_s9 = scalar_lea.hbm %s9895_s21, 2048  ;;  %s7912_s19 = scalar_lea.hbm %s10027_s23, 8192 }
 0x4bf   : > { %p7909_p2 = scmp.ne.s32.totalorder %s9895_s21, %s7908_s9  ;;  %p7913_p0 = scmp.lt.u32.totalorder %s9895_s21, %s10027_s23 }
 0x4c0   : > { %p7914_p4 = scmp.lt.u32.totalorder %s7912_s19, %s7908_s9  ;;  %p7916_p3 = scmp.lt.u32.totalorder %s7908_s9, %s9895_s21 }
 0x4c1   : > { %p7910_p6 = pnand %p7909_p2, %p10028_p13 }
 0x4c2   : > { %p7915_p1 = por %p7914_p4, %p7913_p0 }
 0x4c3   : > { %p7911_p10 = pneg %p7910_p6 }
 0x4c4   : > { %p7917_p7 = por %p7916_p3, %p7915_p1 }
 0x4c6   : > { %p7918_p9 = pnand %p7917_p7, %p7911_p10 }
 0x4c8   : > { %7921 = shalt.err (!%p7918_p9)
}
 0x4c9   : > { %s8033_s15 = smov 128   ;;  %s8034_s27 = smov 8  }
 0x4ca   : > { %7236 = dma.vmem_to_hbm [thread:$0]  (%p10028_p13), %s9897_s18, 2048, %s9895_s21, %s9905_s22, %s8033_s15, %s8033_s15, %s8034_s27  }
 0x4cb PF: > { %s10029_s20 = sld [smem:[#allocation14_spill]]  ;;  %s10030_s1 = sld [smem:[#allocation18_spill]] }
 0x4cc   : > { %p7258_p11 = scmp.ge.s32.totalorder %s8020_s11, 2 }
 0x4d1   : > { %s5895_s17 = sand.u32 1, %s10029_s20   ;;  %p10031_p5 = scmp.ne.s32.totalorder %s10030_s1, 0 }
 0x4d2   : > { %s5896_s24 = scalar_lea.sflag [#allocation6], %s5895_s17 }
 0x4d3   : > { %p7250_p8 = pnand %p7258_p11, %p10031_p5 }
 0x4d5   : > { %7975 = dma.done.wait (!%p7250_p8), %s5896_s24, 2048  }
 0x4d6   : > { %7977 = vsyncadd (!%p7250_p8), %s5896_s24, 4294965248  ;;  %s24_s11 = sadd.s32 1, %s8020_s11   ;;  %s10032_s30 = sld [smem:[#allocation16_spill]] }
 0x4d7   : > { %p21_p12 = scmp.ge.s32.totalorder %s24_s11, 6   ;;  %s10033_s9 = sld [smem:[#allocation19_spill]] }
 0x4d8   : > { %s10034_s24 = smov %s7984_s25  ;;  %s10035_s25 = smov %s7988_s26 }
 0x4d9   : > { %s10036_s26 = smov %s8250_s4  ;;  %s10037_s27 = smov %s7996_s28 }
 0x4da   : > { %s10038_s28 = smov %s8000_s29  ;;  %s10039_s29 = smov %s8245_s8 }
 0x4db   : > { %s10040_s8 = smov %s8016_s10  ;;  %s10041_s10 = smov %s10047_s7 }
 0x4dc   :  { %23 = sbr.rel (!%p21_p12) target bundleno = 15 (0xf), region = 122 }
 0x4e3   :  { %5901 = vsyncpa [#allocation5], 1 }
 0x4e4   :  { %5903 = vsyncpa [#allocation5 + $0x1], 1 }
 0x4e5   :  { %5904 = vsyncpa [#allocation8], 1 }
 0x4e6   :  { %5905 = vsyncpa [#allocation6], 1 }
 0x4e7   :  { %5907 = vsyncpa [#allocation6 + $0x1], 1 }

</bundles_post_ra>
